<compile_context>
chip_gen: v7x
topology: tpu7x:2x2x1
jax: 0.10.0
libtpu: 0.0.40
codegen_flags: <defaults>
</compile_context>

<pallas_src>
import functools

import jax
import jax.numpy as jnp
from jax import lax
from jax.experimental import pallas as pl
from jax.experimental.pallas import tpu as pltpu


def _round_up(x, m):
    return (x + m - 1) // m * m


# ------------------------- fused Down forward kernel --------------------------
def _down_fused_kernel(xg_ref, w1_ref, bn1_ref, w2_ref, bn2_ref, o_ref,
                       pool_ref, pad2_ref, *,
                       N, Hh, Wh, Cin, Cmid, Cout, Wp, eps):
    L = Hh * Wp                        # flat conv-output rows per image (incl. junk cols)
    npix = float(N * Hh * Wh)          # true pixel count for BN batch statistics
    R2 = pad2_ref.shape[1]
    place = _round_up(Wp + 1, 8)       # aligned start of conv2's interior slab in pad2
    base2 = place - (Wp + 1)           # conv2 tap origin (keeps dy*Wp offsets aligned)
    tail = place + L                   # first tail-margin row (multiple of 8)

    # ---- 2x2 max-pool: the 4 window corners live on the lane axis ------------
    xg = xg_ref[...]                                        # (N, R1, 4*Cin)
    pooled = xg[:, :, 0:Cin]
    for k in range(1, 4):
        pooled = jnp.maximum(pooled, xg[:, :, k * Cin:(k + 1) * Cin])
    pool_ref[...] = pooled             # zero-padded pooled image, flat rows of width Wp

    # Junk-column predicate (column index >= Wh) and the ones LHS that pushes the
    # BN reductions onto the MXU.  Hoisted once (broadcasts are not CSE'd by JAX).
    keep = lax.broadcasted_iota(jnp.int32, (Hh, Wp, 1), 1) < Wh
    ones_lhs = jnp.ones((8, L), jnp.float32)   # 8 identical rows -> MXU-native M tile

    def mask_junk(v):
        # Zero the junk columns of an (L, C) slab.  Wp % 8 == 0 makes both
        # reshapes pure (layout-preserving) retilings.
        c = v.shape[-1]
        return jnp.where(keep, v.reshape(Hh, Wp, c), 0.0).reshape(L, c)

    def conv(src_ref, n, origin, w_ref, bias):
        # 3x3 'same' conv as 9 accumulating matmuls over flat row-slices — no
        # lane concatenation; every slice start is a static, mostly aligned int.
        co = w_ref.shape[-1]
        acc = jnp.zeros((L, co), jnp.float32) + bias
        for dy in range(3):
            for dx in range(3):
                tap = src_ref[n, pl.ds(origin + dy * Wp + dx, L), :]
                acc = acc + jnp.dot(tap, w_ref[dy * 3 + dx],
                                    preferred_element_type=jnp.float32)
        return acc

    bn1 = bn1_ref[...]                 # rows: bias, gamma, beta   (3, Cmid)
    bn2 = bn2_ref[...]                 #                           (3, Cout)
    b1, g1, be1 = bn1[0:1, :], bn1[1:2, :], bn1[2:3, :]
    b2, g2, be2 = bn2[0:1, :], bn2[1:2, :], bn2[2:3, :]

    # ---- conv1 + BN1 batch statistics (MXU reductions), staged in pad2 -------
    s1 = jnp.zeros((8, Cmid), jnp.float32)
    q1 = jnp.zeros((8, Cmid), jnp.float32)
    for n in range(N):
        y1 = conv(pool_ref, n, 0, w1_ref, b1)                # (L, Cmid)
        ym = mask_junk(y1)                                   # valid pixels only
        s1 = s1 + jnp.dot(ones_lhs, ym, preferred_element_type=jnp.float32)
        q1 = q1 + jnp.dot(ones_lhs, ym * ym, preferred_element_type=jnp.float32)
        # Zero only the margin rows (aligned stores; scratch is not zero-init),
        # then stage the masked conv1 output in the aligned interior slab.
        pad2_ref[n, pl.ds(0, place), :] = jnp.zeros((place, Cmid), jnp.float32)
        pad2_ref[n, pl.ds(tail, R2 - tail), :] = jnp.zeros((R2 - tail, Cmid),
                                                           jnp.float32)
        pad2_ref[n, pl.ds(place, L), :] = ym

    # NOTE: uncentered E[x^2]-E[x]^2 in f32 is fine at these magnitudes; switch
    # to a centered second pass if this kernel is scaled to large activations.
    mean1 = s1[0:1, :] / npix
    var1 = jnp.maximum(q1[0:1, :] / npix - mean1 * mean1, 0.0)
    sc1 = g1 * lax.rsqrt(var1 + eps)
    sh1 = be1 - mean1 * sc1

    # ---- BN1 + ReLU applied in place: pad2 interior becomes conv2's input ----
    for n in range(N):
        ym = pad2_ref[n, pl.ds(place, L), :]
        a1 = mask_junk(jnp.maximum(ym * sc1 + sh1, 0.0))     # junk cols -> 0 pad
        pad2_ref[n, pl.ds(place, L), :] = a1

    # ---- conv2 + BN2 statistics, staged in the VMEM-resident output block ----
    s2 = jnp.zeros((8, Cout), jnp.float32)
    q2 = jnp.zeros((8, Cout), jnp.float32)
    for n in range(N):
        y2 = conv(pad2_ref, n, base2, w2_ref, b2)            # (L, Cout)
        ym = mask_junk(y2)
        s2 = s2 + jnp.dot(ones_lhs, ym, preferred_element_type=jnp.float32)
        q2 = q2 + jnp.dot(ones_lhs, ym * ym, preferred_element_type=jnp.float32)
        o_ref[n] = y2                                        # stage pre-BN values

    mean2 = s2[0:1, :] / npix
    var2 = jnp.maximum(q2[0:1, :] / npix - mean2 * mean2, 0.0)
    sc2 = g2 * lax.rsqrt(var2 + eps)
    sh2 = be2 - mean2 * sc2

    for n in range(N):
        o_ref[n] = jnp.maximum(o_ref[n] * sc2 + sh2, 0.0)    # junk cols cropped outside


# ------------------------------ wrapper ---------------------------------------
def down_forward(x_nchw, p, eps=1e-5):
    N, Cin, H0, W0 = x_nchw.shape
    assert H0 % 2 == 0 and W0 % 2 == 0, "MaxPool2d(2) path assumes even H and W"
    Hh, Wh = H0 // 2, W0 // 2
    Wp = _round_up(Wh + 2, 8)          # flat conv-row width, sublane aligned
    Hp = Hh + 2
    L = Hh * Wp
    Cmid = p["w1"].shape[-1]
    Cout = p["w2"].shape[-1]

    place = _round_up(Wp + 1, 8)
    base2 = place - (Wp + 1)
    R1 = _round_up(L + 2 * Wp + 2, 8)                  # >= Hp*Wp, covers tap over-reads
    R2 = _round_up(base2 + L + 2 * Wp + 2, 8)

    # Pad by one pooled pixel (2 raw pixels) before pooling so the pooled image is
    # already zero-padded for the 3x3 'same' conv, extend the width to 2*Wp so the
    # pooled rows are Wp (multiple of 8) wide, and regroup each 2x2 pooling window
    # onto the lane axis with a single XLA transpose.
    xp = jnp.pad(x_nchw, ((0, 0), (0, 0),
                          (2, 2 * Hp - H0 - 2), (2, 2 * Wp - W0 - 2)))
    xg = xp.reshape(N, Cin, Hp, 2, Wp, 2).transpose(0, 2, 4, 3, 5, 1)
    xg = xg.reshape(N, Hp * Wp, 4 * Cin)
    xg = jnp.pad(xg, ((0, 0), (0, R1 - Hp * Wp), (0, 0)))

    w1r = p["w1"].reshape(9, Cin, Cmid)                # tap-major (dy, dx) weight slabs
    w2r = p["w2"].reshape(9, Cmid, Cout)
    bn1 = jnp.stack([p["b1"], p["g1"], p["be1"]]).astype(jnp.float32)   # (3, Cmid)
    bn2 = jnp.stack([p["b2"], p["g2"], p["be2"]]).astype(jnp.float32)   # (3, Cout)

    kern = functools.partial(_down_fused_kernel, N=N, Hh=Hh, Wh=Wh, Cin=Cin,
                             Cmid=Cmid, Cout=Cout, Wp=Wp, eps=eps)
    out = pl.pallas_call(
        kern,
        out_shape=jax.ShapeDtypeStruct((N, L, Cout), jnp.float32),
        grid=(1,),
        in_specs=[
            pl.BlockSpec((N, R1, 4 * Cin), lambda i: (0, 0, 0)),
            pl.BlockSpec((9, Cin, Cmid), lambda i: (0, 0, 0)),
            pl.BlockSpec((3, Cmid), lambda i: (0, 0)),
            pl.BlockSpec((9, Cmid, Cout), lambda i: (0, 0, 0)),
            pl.BlockSpec((3, Cout), lambda i: (0, 0)),
        ],
        out_specs=pl.BlockSpec((N, L, Cout), lambda i: (0, 0, 0)),
        scratch_shapes=[
            pltpu.VMEM((N, R1, Cin), jnp.float32),     # padded pooled image (flat rows)
            pltpu.VMEM((N, R2, Cmid), jnp.float32),    # padded conv2 input (flat rows)
        ],
        compiler_params=pltpu.CompilerParams(dimension_semantics=("arbitrary",)),
    )(xg, w1r, bn1, w2r, bn2)

    # Drop the junk columns and return NCHW (one fused XLA slice+transpose).
    out = out.reshape(N, Hh, Wp, Cout)[:, :, :Wh, :]
    return jnp.transpose(out, (0, 3, 1, 2))


# ------------------------------ pure-JAX reference ----------------------------
def _reference(x_nchw, p, eps=1e-5):
    x = jnp.transpose(x_nchw, (0, 2, 3, 1))
    x = jax.lax.reduce_window(x, -jnp.inf, jax.lax.max,
                              (1, 2, 2, 1), (1, 2, 2, 1), "VALID")

    def conv(x, w, b):
        y = jax.lax.conv_general_dilated(
            x, w, (1, 1), "SAME", dimension_numbers=("NHWC", "HWIO", "NHWC"))
        return y + b

    def bnrelu(x, g, be):
        m = x.mean(axis=(0, 1, 2))
        v = x.var(axis=(0, 1, 2))
        return jnp.maximum((x - m) / jnp.sqrt(v + eps) * g + be, 0.0)

    x = bnrelu(conv(x, p["w1"], p["b1"]), p["g1"], p["be1"])
    x = bnrelu(conv(x, p["w2"], p["b2"]), p["g2"], p["be2"])
    return jnp.transpose(x, (0, 3, 1, 2))


if __name__ == "__main__":
    key = jax.random.PRNGKey(0)
    kx, k1, k2, k3, k4, k5, k6 = jax.random.split(key, 7)
    Cin, Cout = 4, 8                                  # Down(4, 8)
    x = jax.random.normal(kx, (2, Cin, 16, 16), jnp.float32)
    params = {
        "w1": 0.2 * jax.random.normal(k1, (3, 3, Cin, Cout), jnp.float32),
        "b1": 0.1 * jax.random.normal(k2, (Cout,), jnp.float32),
        "g1": 1.0 + 0.1 * jax.random.normal(k3, (Cout,), jnp.float32),
        "be1": 0.05 * jax.random.normal(k4, (Cout,), jnp.float32),
        "w2": 0.2 * jax.random.normal(k5, (3, 3, Cout, Cout), jnp.float32),
        "b2": 0.1 * jax.random.normal(k6, (Cout,), jnp.float32),
        "g2": jnp.ones((Cout,), jnp.float32),
        "be2": jnp.zeros((Cout,), jnp.float32),
    }

    out = jax.jit(down_forward)(x, params)
    out = jax.block_until_ready(out)
    assert out.shape == (2, Cout, 8, 8) and out.dtype == jnp.float32

    ref = _reference(x, params)
    err = float(jnp.max(jnp.abs(out - ref)))
    assert err < 1e-3, f"max abs err vs reference: {err}"
    print("KERNEL_OK")
</pallas_src>

<mosaic_0001>
module attributes {stable_mosaic.version = 11 : i64} {
  func.func @_down_fused_kernel(%arg0: i32, %arg1: memref<2x168x16xf32, #tpu.memory_space<vmem>>, %arg2: memref<9x4x8xf32, #tpu.memory_space<vmem>>, %arg3: memref<3x8xf32, #tpu.memory_space<vmem>>, %arg4: memref<9x8x8xf32, #tpu.memory_space<vmem>>, %arg5: memref<3x8xf32, #tpu.memory_space<vmem>>, %arg6: memref<2x128x8xf32, #tpu.memory_space<vmem>>, %arg7: memref<2x168x4xf32, #tpu.memory_space<vmem>>, %arg8: memref<2x176x8xf32, #tpu.memory_space<vmem>>) attributes {dimension_semantics = [#tpu.dimension_semantics<arbitrary>], iteration_bounds = array<i64: 1>, scalar_prefetch = 0 : i64, scratch_operands = 2 : i64, tpu.core_type = #tpu.core_type<tc>, window_params = [{pipeline_mode = #tpu.pipeline_mode<synchronous>, transform_indices = @transform_0, window_bounds = array<i64: 2, 168, 16>}, {pipeline_mode = #tpu.pipeline_mode<synchronous>, transform_indices = @transform_1, window_bounds = array<i64: 9, 4, 8>}, {pipeline_mode = #tpu.pipeline_mode<synchronous>, transform_indices = @transform_2, window_bounds = array<i64: 3, 8>}, {pipeline_mode = #tpu.pipeline_mode<synchronous>, transform_indices = @transform_3, window_bounds = array<i64: 9, 8, 8>}, {pipeline_mode = #tpu.pipeline_mode<synchronous>, transform_indices = @transform_4, window_bounds = array<i64: 3, 8>}, {pipeline_mode = #tpu.pipeline_mode<synchronous>, transform_indices = @transform_5, window_bounds = array<i64: 2, 128, 8>}]} {
    %c0 = arith.constant 0 : index
    %c0_0 = arith.constant 0 : index
    %c0_1 = arith.constant 0 : index
    %0 = vector.load %arg1[%c0, %c0_0, %c0_1] : memref<2x168x16xf32, #tpu.memory_space<vmem>>, vector<2x168x16xf32>
    %1 = vector.extract_strided_slice %0 {offsets = [0, 0, 0], sizes = [2, 168, 4], strides = [1, 1, 1]} : vector<2x168x16xf32> to vector<2x168x4xf32>
    %2 = vector.extract_strided_slice %0 {offsets = [0, 0, 4], sizes = [2, 168, 4], strides = [1, 1, 1]} : vector<2x168x16xf32> to vector<2x168x4xf32>
    %3 = arith.maximumf %1, %2 : vector<2x168x4xf32>
    %4 = vector.extract_strided_slice %0 {offsets = [0, 0, 8], sizes = [2, 168, 4], strides = [1, 1, 1]} : vector<2x168x16xf32> to vector<2x168x4xf32>
    %5 = arith.maximumf %3, %4 : vector<2x168x4xf32>
    %6 = vector.extract_strided_slice %0 {offsets = [0, 0, 12], sizes = [2, 168, 4], strides = [1, 1, 1]} : vector<2x168x16xf32> to vector<2x168x4xf32>
    %7 = arith.maximumf %5, %6 : vector<2x168x4xf32>
    %c0_2 = arith.constant 0 : index
    %c0_3 = arith.constant 0 : index
    %c0_4 = arith.constant 0 : index
    %8 = vector.load %arg7[%c0_2, %c0_3, %c0_4] : memref<2x168x4xf32, #tpu.memory_space<vmem>>, vector<2x168x4xf32>
    tpu.vector_store %arg7[%c0_2, %c0_3, %c0_4], %7 {strides = array<i32>} : memref<2x168x4xf32, #tpu.memory_space<vmem>>, vector<2x168x4xf32>,
    %9 = tpu.iota {dimensions = array<i32: 1>} : vector<8x16x1xi32>
    %c8_i32 = arith.constant 8 : i32
    %10 = vector.broadcast %c8_i32 : i32 to vector<8x16x1xi32>
    %11 = arith.cmpi slt, %9, %10 : vector<8x16x1xi32>
    %cst = arith.constant 1.000000e+00 : f32
    %12 = vector.broadcast %cst : f32 to vector<8x128xf32>
    %c0_5 = arith.constant 0 : index
    %c0_6 = arith.constant 0 : index
    %13 = vector.load %arg3[%c0_5, %c0_6] : memref<3x8xf32, #tpu.memory_space<vmem>>, vector<3x8xf32>
    %c0_7 = arith.constant 0 : index
    %c0_8 = arith.constant 0 : index
    %14 = vector.load %arg5[%c0_7, %c0_8] : memref<3x8xf32, #tpu.memory_space<vmem>>, vector<3x8xf32>
    %15 = vector.extract_strided_slice %13 {offsets = [0, 0], sizes = [1, 8], strides = [1, 1]} : vector<3x8xf32> to vector<1x8xf32>
    %16 = vector.extract_strided_slice %13 {offsets = [1, 0], sizes = [1, 8], strides = [1, 1]} : vector<3x8xf32> to vector<1x8xf32>
    %17 = vector.extract_strided_slice %13 {offsets = [2, 0], sizes = [1, 8], strides = [1, 1]} : vector<3x8xf32> to vector<1x8xf32>
    %18 = vector.extract_strided_slice %14 {offsets = [0, 0], sizes = [1, 8], strides = [1, 1]} : vector<3x8xf32> to vector<1x8xf32>
    %19 = vector.extract_strided_slice %14 {offsets = [1, 0], sizes = [1, 8], strides = [1, 1]} : vector<3x8xf32> to vector<1x8xf32>
    %20 = vector.extract_strided_slice %14 {offsets = [2, 0], sizes = [1, 8], strides = [1, 1]} : vector<3x8xf32> to vector<1x8xf32>
    %cst_9 = arith.constant 0.000000e+00 : f32
    %21 = vector.broadcast %cst_9 : f32 to vector<8x8xf32>
    %cst_10 = arith.constant 0.000000e+00 : f32
    %22 = vector.broadcast %cst_10 : f32 to vector<8x8xf32>
    %cst_11 = arith.constant 0.000000e+00 : f32
    %23 = vector.broadcast %cst_11 : f32 to vector<128x8xf32>
    %24 = vector.broadcast %15 : vector<1x8xf32> to vector<128x8xf32>
    %25 = arith.addf %23, %24 : vector<128x8xf32>
    %c0_12 = arith.constant 0 : index
    %c0_13 = arith.constant 0 : index
    %c0_14 = arith.constant 0 : index
    %26 = vector.load %arg7[%c0_12, %c0_13, %c0_14] : memref<2x168x4xf32, #tpu.memory_space<vmem>>, vector<1x128x4xf32>
    %27 = vector.shape_cast %26 : vector<1x128x4xf32> to vector<128x4xf32>
    %c0_15 = arith.constant 0 : index
    %c0_16 = arith.constant 0 : index
    %c0_17 = arith.constant 0 : index
    %28 = vector.load %arg2[%c0_15, %c0_16, %c0_17] : memref<9x4x8xf32, #tpu.memory_space<vmem>>, vector<1x4x8xf32>
    %29 = vector.shape_cast %28 : vector<1x4x8xf32> to vector<4x8xf32>
    %cst_18 = arith.constant dense<0.000000e+00> : vector<128x8xf32>
    %30 = tpu.matmul %27, %29, %cst_18 {dimension_numbers = #tpu.dot_dimension_numbers<[1], [0], [0], [1], [0, 0, 1, 1], [], []>} : vector<128x4xf32>, vector<4x8xf32>, vector<128x8xf32> -> vector<128x8xf32>
    %31 = arith.addf %25, %30 : vector<128x8xf32>
    %c0_19 = arith.constant 0 : index
    %c1 = arith.constant 1 : index
    %c0_20 = arith.constant 0 : index
    %32 = vector.load %arg7[%c0_19, %c1, %c0_20] : memref<2x168x4xf32, #tpu.memory_space<vmem>>, vector<1x128x4xf32>
    %33 = vector.shape_cast %32 : vector<1x128x4xf32> to vector<128x4xf32>
    %c1_21 = arith.constant 1 : index
    %c0_22 = arith.constant 0 : index
    %c0_23 = arith.constant 0 : index
    %34 = vector.load %arg2[%c1_21, %c0_22, %c0_23] : memref<9x4x8xf32, #tpu.memory_space<vmem>>, vector<1x4x8xf32>
    %35 = vector.shape_cast %34 : vector<1x4x8xf32> to vector<4x8xf32>
    %cst_24 = arith.constant dense<0.000000e+00> : vector<128x8xf32>
    %36 = tpu.matmul %33, %35, %cst_24 {dimension_numbers = #tpu.dot_dimension_numbers<[1], [0], [0], [1], [0, 0, 1, 1], [], []>} : vector<128x4xf32>, vector<4x8xf32>, vector<128x8xf32> -> vector<128x8xf32>
    %37 = arith.addf %31, %36 : vector<128x8xf32>
    %c0_25 = arith.constant 0 : index
    %c2 = arith.constant 2 : index
    %c0_26 = arith.constant 0 : index
    %38 = vector.load %arg7[%c0_25, %c2, %c0_26] : memref<2x168x4xf32, #tpu.memory_space<vmem>>, vector<1x128x4xf32>
    %39 = vector.shape_cast %38 : vector<1x128x4xf32> to vector<128x4xf32>
    %c2_27 = arith.constant 2 : index
    %c0_28 = arith.constant 0 : index
    %c0_29 = arith.constant 0 : index
    %40 = vector.load %arg2[%c2_27, %c0_28, %c0_29] : memref<9x4x8xf32, #tpu.memory_space<vmem>>, vector<1x4x8xf32>
    %41 = vector.shape_cast %40 : vector<1x4x8xf32> to vector<4x8xf32>
    %cst_30 = arith.constant dense<0.000000e+00> : vector<128x8xf32>
    %42 = tpu.matmul %39, %41, %cst_30 {dimension_numbers = #tpu.dot_dimension_numbers<[1], [0], [0], [1], [0, 0, 1, 1], [], []>} : vector<128x4xf32>, vector<4x8xf32>, vector<128x8xf32> -> vector<128x8xf32>
    %43 = arith.addf %37, %42 : vector<128x8xf32>
    %c0_31 = arith.constant 0 : index
    %c16 = arith.constant 16 : index
    %c0_32 = arith.constant 0 : index
    %44 = vector.load %arg7[%c0_31, %c16, %c0_32] : memref<2x168x4xf32, #tpu.memory_space<vmem>>, vector<1x128x4xf32>
    %45 = vector.shape_cast %44 : vector<1x128x4xf32> to vector<128x4xf32>
    %c3 = arith.constant 3 : index
    %c0_33 = arith.constant 0 : index
    %c0_34 = arith.constant 0 : index
    %46 = vector.load %arg2[%c3, %c0_33, %c0_34] : memref<9x4x8xf32, #tpu.memory_space<vmem>>, vector<1x4x8xf32>
    %47 = vector.shape_cast %46 : vector<1x4x8xf32> to vector<4x8xf32>
    %cst_35 = arith.constant dense<0.000000e+00> : vector<128x8xf32>
    %48 = tpu.matmul %45, %47, %cst_35 {dimension_numbers = #tpu.dot_dimension_numbers<[1], [0], [0], [1], [0, 0, 1, 1], [], []>} : vector<128x4xf32>, vector<4x8xf32>, vector<128x8xf32> -> vector<128x8xf32>
    %49 = arith.addf %43, %48 : vector<128x8xf32>
    %c0_36 = arith.constant 0 : index
    %c17 = arith.constant 17 : index
    %c0_37 = arith.constant 0 : index
    %50 = vector.load %arg7[%c0_36, %c17, %c0_37] : memref<2x168x4xf32, #tpu.memory_space<vmem>>, vector<1x128x4xf32>
    %51 = vector.shape_cast %50 : vector<1x128x4xf32> to vector<128x4xf32>
    %c4 = arith.constant 4 : index
    %c0_38 = arith.constant 0 : index
    %c0_39 = arith.constant 0 : index
    %52 = vector.load %arg2[%c4, %c0_38, %c0_39] : memref<9x4x8xf32, #tpu.memory_space<vmem>>, vector<1x4x8xf32>
    %53 = vector.shape_cast %52 : vector<1x4x8xf32> to vector<4x8xf32>
    %cst_40 = arith.constant dense<0.000000e+00> : vector<128x8xf32>
    %54 = tpu.matmul %51, %53, %cst_40 {dimension_numbers = #tpu.dot_dimension_numbers<[1], [0], [0], [1], [0, 0, 1, 1], [], []>} : vector<128x4xf32>, vector<4x8xf32>, vector<128x8xf32> -> vector<128x8xf32>
    %55 = arith.addf %49, %54 : vector<128x8xf32>
    %c0_41 = arith.constant 0 : index
    %c18 = arith.constant 18 : index
    %c0_42 = arith.constant 0 : index
    %56 = vector.load %arg7[%c0_41, %c18, %c0_42] : memref<2x168x4xf32, #tpu.memory_space<vmem>>, vector<1x128x4xf32>
    %57 = vector.shape_cast %56 : vector<1x128x4xf32> to vector<128x4xf32>
    %c5 = arith.constant 5 : index
    %c0_43 = arith.constant 0 : index
    %c0_44 = arith.constant 0 : index
    %58 = vector.load %arg2[%c5, %c0_43, %c0_44] : memref<9x4x8xf32, #tpu.memory_space<vmem>>, vector<1x4x8xf32>
    %59 = vector.shape_cast %58 : vector<1x4x8xf32> to vector<4x8xf32>
    %cst_45 = arith.constant dense<0.000000e+00> : vector<128x8xf32>
    %60 = tpu.matmul %57, %59, %cst_45 {dimension_numbers = #tpu.dot_dimension_numbers<[1], [0], [0], [1], [0, 0, 1, 1], [], []>} : vector<128x4xf32>, vector<4x8xf32>, vector<128x8xf32> -> vector<128x8xf32>
    %61 = arith.addf %55, %60 : vector<128x8xf32>
    %c0_46 = arith.constant 0 : index
    %c32 = arith.constant 32 : index
    %c0_47 = arith.constant 0 : index
    %62 = vector.load %arg7[%c0_46, %c32, %c0_47] : memref<2x168x4xf32, #tpu.memory_space<vmem>>, vector<1x128x4xf32>
    %63 = vector.shape_cast %62 : vector<1x128x4xf32> to vector<128x4xf32>
    %c6 = arith.constant 6 : index
    %c0_48 = arith.constant 0 : index
    %c0_49 = arith.constant 0 : index
    %64 = vector.load %arg2[%c6, %c0_48, %c0_49] : memref<9x4x8xf32, #tpu.memory_space<vmem>>, vector<1x4x8xf32>
    %65 = vector.shape_cast %64 : vector<1x4x8xf32> to vector<4x8xf32>
    %cst_50 = arith.constant dense<0.000000e+00> : vector<128x8xf32>
    %66 = tpu.matmul %63, %65, %cst_50 {dimension_numbers = #tpu.dot_dimension_numbers<[1], [0], [0], [1], [0, 0, 1, 1], [], []>} : vector<128x4xf32>, vector<4x8xf32>, vector<128x8xf32> -> vector<128x8xf32>
    %67 = arith.addf %61, %66 : vector<128x8xf32>
    %c0_51 = arith.constant 0 : index
    %c33 = arith.constant 33 : index
    %c0_52 = arith.constant 0 : index
    %68 = vector.load %arg7[%c0_51, %c33, %c0_52] : memref<2x168x4xf32, #tpu.memory_space<vmem>>, vector<1x128x4xf32>
    %69 = vector.shape_cast %68 : vector<1x128x4xf32> to vector<128x4xf32>
    %c7 = arith.constant 7 : index
    %c0_53 = arith.constant 0 : index
    %c0_54 = arith.constant 0 : index
    %70 = vector.load %arg2[%c7, %c0_53, %c0_54] : memref<9x4x8xf32, #tpu.memory_space<vmem>>, vector<1x4x8xf32>
    %71 = vector.shape_cast %70 : vector<1x4x8xf32> to vector<4x8xf32>
    %cst_55 = arith.constant dense<0.000000e+00> : vector<128x8xf32>
    %72 = tpu.matmul %69, %71, %cst_55 {dimension_numbers = #tpu.dot_dimension_numbers<[1], [0], [0], [1], [0, 0, 1, 1], [], []>} : vector<128x4xf32>, vector<4x8xf32>, vector<128x8xf32> -> vector<128x8xf32>
    %73 = arith.addf %67, %72 : vector<128x8xf32>
    %c0_56 = arith.constant 0 : index
    %c34 = arith.constant 34 : index
    %c0_57 = arith.constant 0 : index
    %74 = vector.load %arg7[%c0_56, %c34, %c0_57] : memref<2x168x4xf32, #tpu.memory_space<vmem>>, vector<1x128x4xf32>
    %75 = vector.shape_cast %74 : vector<1x128x4xf32> to vector<128x4xf32>
    %c8 = arith.constant 8 : index
    %c0_58 = arith.constant 0 : index
    %c0_59 = arith.constant 0 : index
    %76 = vector.load %arg2[%c8, %c0_58, %c0_59] : memref<9x4x8xf32, #tpu.memory_space<vmem>>, vector<1x4x8xf32>
    %77 = vector.shape_cast %76 : vector<1x4x8xf32> to vector<4x8xf32>
    %cst_60 = arith.constant dense<0.000000e+00> : vector<128x8xf32>
    %78 = tpu.matmul %75, %77, %cst_60 {dimension_numbers = #tpu.dot_dimension_numbers<[1], [0], [0], [1], [0, 0, 1, 1], [], []>} : vector<128x4xf32>, vector<4x8xf32>, vector<128x8xf32> -> vector<128x8xf32>
    %79 = arith.addf %73, %78 : vector<128x8xf32>
    %80 = vector.shape_cast %79 : vector<128x8xf32> to vector<8x16x8xf32>
    %cst_61 = arith.constant 0.000000e+00 : f32
    %81 = vector.shape_cast %11 : vector<8x16x1xi1> to vector<8x16x1xi1>
    %82 = vector.broadcast %81 : vector<8x16x1xi1> to vector<8x16x8xi1>
    %83 = vector.broadcast %cst_61 : f32 to vector<8x16x8xf32>
    %84 = arith.select %82, %80, %83 : vector<8x16x8xi1>, vector<8x16x8xf32>
    %85 = vector.shape_cast %84 : vector<8x16x8xf32> to vector<128x8xf32>
    %cst_62 = arith.constant dense<0.000000e+00> : vector<8x8xf32>
    %86 = tpu.matmul %12, %85, %cst_62 {dimension_numbers = #tpu.dot_dimension_numbers<[1], [0], [0], [1], [0, 0, 1, 1], [], []>} : vector<8x128xf32>, vector<128x8xf32>, vector<8x8xf32> -> vector<8x8xf32>
    %87 = arith.addf %21, %86 : vector<8x8xf32>
    %88 = arith.mulf %85, %85 : vector<128x8xf32>
    %cst_63 = arith.constant dense<0.000000e+00> : vector<8x8xf32>
    %89 = tpu.matmul %12, %88, %cst_63 {dimension_numbers = #tpu.dot_dimension_numbers<[1], [0], [0], [1], [0, 0, 1, 1], [], []>} : vector<8x128xf32>, vector<128x8xf32>, vector<8x8xf32> -> vector<8x8xf32>
    %90 = arith.addf %22, %89 : vector<8x8xf32>
    %cst_64 = arith.constant 0.000000e+00 : f32
    %91 = vector.broadcast %cst_64 : f32 to vector<24x8xf32>
    %c0_65 = arith.constant 0 : index
    %c0_66 = arith.constant 0 : index
    %c0_67 = arith.constant 0 : index
    %92 = vector.load %arg8[%c0_65, %c0_66, %c0_67] : memref<2x176x8xf32, #tpu.memory_space<vmem>>, vector<1x24x8xf32>
    %93 = vector.shape_cast %92 : vector<1x24x8xf32> to vector<24x8xf32>
    %94 = vector.shape_cast %91 : vector<24x8xf32> to vector<1x24x8xf32>
    tpu.vector_store %arg8[%c0_65, %c0_66, %c0_67], %94 {strides = array<i32>} : memref<2x176x8xf32, #tpu.memory_space<vmem>>, vector<1x24x8xf32>,
    %cst_68 = arith.constant 0.000000e+00 : f32
    %95 = vector.broadcast %cst_68 : f32 to vector<24x8xf32>
    %c0_69 = arith.constant 0 : index
    %c152 = arith.constant 152 : index
    %c0_70 = arith.constant 0 : index
    %96 = vector.load %arg8[%c0_69, %c152, %c0_70] : memref<2x176x8xf32, #tpu.memory_space<vmem>>, vector<1x24x8xf32>
    %97 = vector.shape_cast %96 : vector<1x24x8xf32> to vector<24x8xf32>
    %98 = vector.shape_cast %95 : vector<24x8xf32> to vector<1x24x8xf32>
    tpu.vector_store %arg8[%c0_69, %c152, %c0_70], %98 {strides = array<i32>} : memref<2x176x8xf32, #tpu.memory_space<vmem>>, vector<1x24x8xf32>,
    %c0_71 = arith.constant 0 : index
    %c24 = arith.constant 24 : index
    %c0_72 = arith.constant 0 : index
    %99 = vector.load %arg8[%c0_71, %c24, %c0_72] : memref<2x176x8xf32, #tpu.memory_space<vmem>>, vector<1x128x8xf32>
    %100 = vector.shape_cast %99 : vector<1x128x8xf32> to vector<128x8xf32>
    %101 = vector.shape_cast %85 : vector<128x8xf32> to vector<1x128x8xf32>
    tpu.vector_store %arg8[%c0_71, %c24, %c0_72], %101 {strides = array<i32>} : memref<2x176x8xf32, #tpu.memory_space<vmem>>, vector<1x128x8xf32>,
    %cst_73 = arith.constant 0.000000e+00 : f32
    %102 = vector.broadcast %cst_73 : f32 to vector<128x8xf32>
    %103 = vector.broadcast %15 : vector<1x8xf32> to vector<128x8xf32>
    %104 = arith.addf %102, %103 : vector<128x8xf32>
    %c1_74 = arith.constant 1 : index
    %c0_75 = arith.constant 0 : index
    %c0_76 = arith.constant 0 : index
    %105 = vector.load %arg7[%c1_74, %c0_75, %c0_76] : memref<2x168x4xf32, #tpu.memory_space<vmem>>, vector<1x128x4xf32>
    %106 = vector.shape_cast %105 : vector<1x128x4xf32> to vector<128x4xf32>
    %c0_77 = arith.constant 0 : index
    %c0_78 = arith.constant 0 : index
    %c0_79 = arith.constant 0 : index
    %107 = vector.load %arg2[%c0_77, %c0_78, %c0_79] : memref<9x4x8xf32, #tpu.memory_space<vmem>>, vector<1x4x8xf32>
    %108 = vector.shape_cast %107 : vector<1x4x8xf32> to vector<4x8xf32>
    %cst_80 = arith.constant dense<0.000000e+00> : vector<128x8xf32>
    %109 = tpu.matmul %106, %108, %cst_80 {dimension_numbers = #tpu.dot_dimension_numbers<[1], [0], [0], [1], [0, 0, 1, 1], [], []>} : vector<128x4xf32>, vector<4x8xf32>, vector<128x8xf32> -> vector<128x8xf32>
    %110 = arith.addf %104, %109 : vector<128x8xf32>
    %c1_81 = arith.constant 1 : index
    %c1_82 = arith.constant 1 : index
    %c0_83 = arith.constant 0 : index
    %111 = vector.load %arg7[%c1_81, %c1_82, %c0_83] : memref<2x168x4xf32, #tpu.memory_space<vmem>>, vector<1x128x4xf32>
    %112 = vector.shape_cast %111 : vector<1x128x4xf32> to vector<128x4xf32>
    %c1_84 = arith.constant 1 : index
    %c0_85 = arith.constant 0 : index
    %c0_86 = arith.constant 0 : index
    %113 = vector.load %arg2[%c1_84, %c0_85, %c0_86] : memref<9x4x8xf32, #tpu.memory_space<vmem>>, vector<1x4x8xf32>
    %114 = vector.shape_cast %113 : vector<1x4x8xf32> to vector<4x8xf32>
    %cst_87 = arith.constant dense<0.000000e+00> : vector<128x8xf32>
    %115 = tpu.matmul %112, %114, %cst_87 {dimension_numbers = #tpu.dot_dimension_numbers<[1], [0], [0], [1], [0, 0, 1, 1], [], []>} : vector<128x4xf32>, vector<4x8xf32>, vector<128x8xf32> -> vector<128x8xf32>
    %116 = arith.addf %110, %115 : vector<128x8xf32>
    %c1_88 = arith.constant 1 : index
    %c2_89 = arith.constant 2 : index
    %c0_90 = arith.constant 0 : index
    %117 = vector.load %arg7[%c1_88, %c2_89, %c0_90] : memref<2x168x4xf32, #tpu.memory_space<vmem>>, vector<1x128x4xf32>
    %118 = vector.shape_cast %117 : vector<1x128x4xf32> to vector<128x4xf32>
    %c2_91 = arith.constant 2 : index
    %c0_92 = arith.constant 0 : index
    %c0_93 = arith.constant 0 : index
    %119 = vector.load %arg2[%c2_91, %c0_92, %c0_93] : memref<9x4x8xf32, #tpu.memory_space<vmem>>, vector<1x4x8xf32>
    %120 = vector.shape_cast %119 : vector<1x4x8xf32> to vector<4x8xf32>
    %cst_94 = arith.constant dense<0.000000e+00> : vector<128x8xf32>
    %121 = tpu.matmul %118, %120, %cst_94 {dimension_numbers = #tpu.dot_dimension_numbers<[1], [0], [0], [1], [0, 0, 1, 1], [], []>} : vector<128x4xf32>, vector<4x8xf32>, vector<128x8xf32> -> vector<128x8xf32>
    %122 = arith.addf %116, %121 : vector<128x8xf32>
    %c1_95 = arith.constant 1 : index
    %c16_96 = arith.constant 16 : index
    %c0_97 = arith.constant 0 : index
    %123 = vector.load %arg7[%c1_95, %c16_96, %c0_97] : memref<2x168x4xf32, #tpu.memory_space<vmem>>, vector<1x128x4xf32>
    %124 = vector.shape_cast %123 : vector<1x128x4xf32> to vector<128x4xf32>
    %c3_98 = arith.constant 3 : index
    %c0_99 = arith.constant 0 : index
    %c0_100 = arith.constant 0 : index
    %125 = vector.load %arg2[%c3_98, %c0_99, %c0_100] : memref<9x4x8xf32, #tpu.memory_space<vmem>>, vector<1x4x8xf32>
    %126 = vector.shape_cast %125 : vector<1x4x8xf32> to vector<4x8xf32>
    %cst_101 = arith.constant dense<0.000000e+00> : vector<128x8xf32>
    %127 = tpu.matmul %124, %126, %cst_101 {dimension_numbers = #tpu.dot_dimension_numbers<[1], [0], [0], [1], [0, 0, 1, 1], [], []>} : vector<128x4xf32>, vector<4x8xf32>, vector<128x8xf32> -> vector<128x8xf32>
    %128 = arith.addf %122, %127 : vector<128x8xf32>
    %c1_102 = arith.constant 1 : index
    %c17_103 = arith.constant 17 : index
    %c0_104 = arith.constant 0 : index
    %129 = vector.load %arg7[%c1_102, %c17_103, %c0_104] : memref<2x168x4xf32, #tpu.memory_space<vmem>>, vector<1x128x4xf32>
    %130 = vector.shape_cast %129 : vector<1x128x4xf32> to vector<128x4xf32>
    %c4_105 = arith.constant 4 : index
    %c0_106 = arith.constant 0 : index
    %c0_107 = arith.constant 0 : index
    %131 = vector.load %arg2[%c4_105, %c0_106, %c0_107] : memref<9x4x8xf32, #tpu.memory_space<vmem>>, vector<1x4x8xf32>
    %132 = vector.shape_cast %131 : vector<1x4x8xf32> to vector<4x8xf32>
    %cst_108 = arith.constant dense<0.000000e+00> : vector<128x8xf32>
    %133 = tpu.matmul %130, %132, %cst_108 {dimension_numbers = #tpu.dot_dimension_numbers<[1], [0], [0], [1], [0, 0, 1, 1], [], []>} : vector<128x4xf32>, vector<4x8xf32>, vector<128x8xf32> -> vector<128x8xf32>
    %134 = arith.addf %128, %133 : vector<128x8xf32>
    %c1_109 = arith.constant 1 : index
    %c18_110 = arith.constant 18 : index
    %c0_111 = arith.constant 0 : index
    %135 = vector.load %arg7[%c1_109, %c18_110, %c0_111] : memref<2x168x4xf32, #tpu.memory_space<vmem>>, vector<1x128x4xf32>
    %136 = vector.shape_cast %135 : vector<1x128x4xf32> to vector<128x4xf32>
    %c5_112 = arith.constant 5 : index
    %c0_113 = arith.constant 0 : index
    %c0_114 = arith.constant 0 : index
    %137 = vector.load %arg2[%c5_112, %c0_113, %c0_114] : memref<9x4x8xf32, #tpu.memory_space<vmem>>, vector<1x4x8xf32>
    %138 = vector.shape_cast %137 : vector<1x4x8xf32> to vector<4x8xf32>
    %cst_115 = arith.constant dense<0.000000e+00> : vector<128x8xf32>
    %139 = tpu.matmul %136, %138, %cst_115 {dimension_numbers = #tpu.dot_dimension_numbers<[1], [0], [0], [1], [0, 0, 1, 1], [], []>} : vector<128x4xf32>, vector<4x8xf32>, vector<128x8xf32> -> vector<128x8xf32>
    %140 = arith.addf %134, %139 : vector<128x8xf32>
    %c1_116 = arith.constant 1 : index
    %c32_117 = arith.constant 32 : index
    %c0_118 = arith.constant 0 : index
    %141 = vector.load %arg7[%c1_116, %c32_117, %c0_118] : memref<2x168x4xf32, #tpu.memory_space<vmem>>, vector<1x128x4xf32>
    %142 = vector.shape_cast %141 : vector<1x128x4xf32> to vector<128x4xf32>
    %c6_119 = arith.constant 6 : index
    %c0_120 = arith.constant 0 : index
    %c0_121 = arith.constant 0 : index
    %143 = vector.load %arg2[%c6_119, %c0_120, %c0_121] : memref<9x4x8xf32, #tpu.memory_space<vmem>>, vector<1x4x8xf32>
    %144 = vector.shape_cast %143 : vector<1x4x8xf32> to vector<4x8xf32>
    %cst_122 = arith.constant dense<0.000000e+00> : vector<128x8xf32>
    %145 = tpu.matmul %142, %144, %cst_122 {dimension_numbers = #tpu.dot_dimension_numbers<[1], [0], [0], [1], [0, 0, 1, 1], [], []>} : vector<128x4xf32>, vector<4x8xf32>, vector<128x8xf32> -> vector<128x8xf32>
    %146 = arith.addf %140, %145 : vector<128x8xf32>
    %c1_123 = arith.constant 1 : index
    %c33_124 = arith.constant 33 : index
    %c0_125 = arith.constant 0 : index
    %147 = vector.load %arg7[%c1_123, %c33_124, %c0_125] : memref<2x168x4xf32, #tpu.memory_space<vmem>>, vector<1x128x4xf32>
    %148 = vector.shape_cast %147 : vector<1x128x4xf32> to vector<128x4xf32>
    %c7_126 = arith.constant 7 : index
    %c0_127 = arith.constant 0 : index
    %c0_128 = arith.constant 0 : index
    %149 = vector.load %arg2[%c7_126, %c0_127, %c0_128] : memref<9x4x8xf32, #tpu.memory_space<vmem>>, vector<1x4x8xf32>
    %150 = vector.shape_cast %149 : vector<1x4x8xf32> to vector<4x8xf32>
    %cst_129 = arith.constant dense<0.000000e+00> : vector<128x8xf32>
    %151 = tpu.matmul %148, %150, %cst_129 {dimension_numbers = #tpu.dot_dimension_numbers<[1], [0], [0], [1], [0, 0, 1, 1], [], []>} : vector<128x4xf32>, vector<4x8xf32>, vector<128x8xf32> -> vector<128x8xf32>
    %152 = arith.addf %146, %151 : vector<128x8xf32>
    %c1_130 = arith.constant 1 : index
    %c34_131 = arith.constant 34 : index
    %c0_132 = arith.constant 0 : index
    %153 = vector.load %arg7[%c1_130, %c34_131, %c0_132] : memref<2x168x4xf32, #tpu.memory_space<vmem>>, vector<1x128x4xf32>
    %154 = vector.shape_cast %153 : vector<1x128x4xf32> to vector<128x4xf32>
    %c8_133 = arith.constant 8 : index
    %c0_134 = arith.constant 0 : index
    %c0_135 = arith.constant 0 : index
    %155 = vector.load %arg2[%c8_133, %c0_134, %c0_135] : memref<9x4x8xf32, #tpu.memory_space<vmem>>, vector<1x4x8xf32>
    %156 = vector.shape_cast %155 : vector<1x4x8xf32> to vector<4x8xf32>
    %cst_136 = arith.constant dense<0.000000e+00> : vector<128x8xf32>
    %157 = tpu.matmul %154, %156, %cst_136 {dimension_numbers = #tpu.dot_dimension_numbers<[1], [0], [0], [1], [0, 0, 1, 1], [], []>} : vector<128x4xf32>, vector<4x8xf32>, vector<128x8xf32> -> vector<128x8xf32>
    %158 = arith.addf %152, %157 : vector<128x8xf32>
    %159 = vector.shape_cast %158 : vector<128x8xf32> to vector<8x16x8xf32>
    %cst_137 = arith.constant 0.000000e+00 : f32
    %160 = vector.shape_cast %11 : vector<8x16x1xi1> to vector<8x16x1xi1>
    %161 = vector.broadcast %160 : vector<8x16x1xi1> to vector<8x16x8xi1>
    %162 = vector.broadcast %cst_137 : f32 to vector<8x16x8xf32>
    %163 = arith.select %161, %159, %162 : vector<8x16x8xi1>, vector<8x16x8xf32>
    %164 = vector.shape_cast %163 : vector<8x16x8xf32> to vector<128x8xf32>
    %cst_138 = arith.constant dense<0.000000e+00> : vector<8x8xf32>
    %165 = tpu.matmul %12, %164, %cst_138 {dimension_numbers = #tpu.dot_dimension_numbers<[1], [0], [0], [1], [0, 0, 1, 1], [], []>} : vector<8x128xf32>, vector<128x8xf32>, vector<8x8xf32> -> vector<8x8xf32>
    %166 = arith.addf %87, %165 : vector<8x8xf32>
    %167 = arith.mulf %164, %164 : vector<128x8xf32>
    %cst_139 = arith.constant dense<0.000000e+00> : vector<8x8xf32>
    %168 = tpu.matmul %12, %167, %cst_139 {dimension_numbers = #tpu.dot_dimension_numbers<[1], [0], [0], [1], [0, 0, 1, 1], [], []>} : vector<8x128xf32>, vector<128x8xf32>, vector<8x8xf32> -> vector<8x8xf32>
    %169 = arith.addf %90, %168 : vector<8x8xf32>
    %cst_140 = arith.constant 0.000000e+00 : f32
    %170 = vector.broadcast %cst_140 : f32 to vector<24x8xf32>
    %c1_141 = arith.constant 1 : index
    %c0_142 = arith.constant 0 : index
    %c0_143 = arith.constant 0 : index
    %171 = vector.load %arg8[%c1_141, %c0_142, %c0_143] : memref<2x176x8xf32, #tpu.memory_space<vmem>>, vector<1x24x8xf32>
    %172 = vector.shape_cast %171 : vector<1x24x8xf32> to vector<24x8xf32>
    %173 = vector.shape_cast %170 : vector<24x8xf32> to vector<1x24x8xf32>
    tpu.vector_store %arg8[%c1_141, %c0_142, %c0_143], %173 {strides = array<i32>} : memref<2x176x8xf32, #tpu.memory_space<vmem>>, vector<1x24x8xf32>,
    %cst_144 = arith.constant 0.000000e+00 : f32
    %174 = vector.broadcast %cst_144 : f32 to vector<24x8xf32>
    %c1_145 = arith.constant 1 : index
    %c152_146 = arith.constant 152 : index
    %c0_147 = arith.constant 0 : index
    %175 = vector.load %arg8[%c1_145, %c152_146, %c0_147] : memref<2x176x8xf32, #tpu.memory_space<vmem>>, vector<1x24x8xf32>
    %176 = vector.shape_cast %175 : vector<1x24x8xf32> to vector<24x8xf32>
    %177 = vector.shape_cast %174 : vector<24x8xf32> to vector<1x24x8xf32>
    tpu.vector_store %arg8[%c1_145, %c152_146, %c0_147], %177 {strides = array<i32>} : memref<2x176x8xf32, #tpu.memory_space<vmem>>, vector<1x24x8xf32>,
    %c1_148 = arith.constant 1 : index
    %c24_149 = arith.constant 24 : index
    %c0_150 = arith.constant 0 : index
    %178 = vector.load %arg8[%c1_148, %c24_149, %c0_150] : memref<2x176x8xf32, #tpu.memory_space<vmem>>, vector<1x128x8xf32>
    %179 = vector.shape_cast %178 : vector<1x128x8xf32> to vector<128x8xf32>
    %180 = vector.shape_cast %164 : vector<128x8xf32> to vector<1x128x8xf32>
    tpu.vector_store %arg8[%c1_148, %c24_149, %c0_150], %180 {strides = array<i32>} : memref<2x176x8xf32, #tpu.memory_space<vmem>>, vector<1x128x8xf32>,
    %181 = vector.extract_strided_slice %166 {offsets = [0, 0], sizes = [1, 8], strides = [1, 1]} : vector<8x8xf32> to vector<1x8xf32>
    %cst_151 = arith.constant 1.280000e+02 : f32
    %182 = vector.broadcast %cst_151 : f32 to vector<1x8xf32>
    %183 = arith.divf %181, %182 : vector<1x8xf32>
    %184 = vector.extract_strided_slice %169 {offsets = [0, 0], sizes = [1, 8], strides = [1, 1]} : vector<8x8xf32> to vector<1x8xf32>
    %cst_152 = arith.constant 1.280000e+02 : f32
    %185 = vector.broadcast %cst_152 : f32 to vector<1x8xf32>
    %186 = arith.divf %184, %185 : vector<1x8xf32>
    %187 = arith.mulf %183, %183 : vector<1x8xf32>
    %188 = arith.subf %186, %187 : vector<1x8xf32>
    %cst_153 = arith.constant 0.000000e+00 : f32
    %189 = vector.broadcast %cst_153 : f32 to vector<1x8xf32>
    %190 = arith.maximumf %188, %189 : vector<1x8xf32>
    %cst_154 = arith.constant 9.99999974E-6 : f32
    %191 = vector.broadcast %cst_154 : f32 to vector<1x8xf32>
    %192 = arith.addf %190, %191 : vector<1x8xf32>
    %193 = math.rsqrt %192 : vector<1x8xf32>
    %194 = arith.mulf %16, %193 : vector<1x8xf32>
    %195 = arith.mulf %183, %194 : vector<1x8xf32>
    %196 = arith.subf %17, %195 : vector<1x8xf32>
    %c0_155 = arith.constant 0 : index
    %c24_156 = arith.constant 24 : index
    %c0_157 = arith.constant 0 : index
    %197 = vector.load %arg8[%c0_155, %c24_156, %c0_157] : memref<2x176x8xf32, #tpu.memory_space<vmem>>, vector<1x128x8xf32>
    %198 = vector.shape_cast %197 : vector<1x128x8xf32> to vector<128x8xf32>
    %199 = vector.broadcast %194 : vector<1x8xf32> to vector<128x8xf32>
    %200 = arith.mulf %198, %199 : vector<128x8xf32>
    %201 = vector.broadcast %196 : vector<1x8xf32> to vector<128x8xf32>
    %202 = arith.addf %200, %201 : vector<128x8xf32>
    %cst_158 = arith.constant 0.000000e+00 : f32
    %203 = vector.broadcast %cst_158 : f32 to vector<128x8xf32>
    %204 = arith.maximumf %202, %203 : vector<128x8xf32>
    %205 = vector.shape_cast %204 : vector<128x8xf32> to vector<8x16x8xf32>
    %cst_159 = arith.constant 0.000000e+00 : f32
    %206 = vector.shape_cast %11 : vector<8x16x1xi1> to vector<8x16x1xi1>
    %207 = vector.broadcast %206 : vector<8x16x1xi1> to vector<8x16x8xi1>
    %208 = vector.broadcast %cst_159 : f32 to vector<8x16x8xf32>
    %209 = arith.select %207, %205, %208 : vector<8x16x8xi1>, vector<8x16x8xf32>
    %210 = vector.shape_cast %209 : vector<8x16x8xf32> to vector<128x8xf32>
    %c0_160 = arith.constant 0 : index
    %c24_161 = arith.constant 24 : index
    %c0_162 = arith.constant 0 : index
    %211 = vector.load %arg8[%c0_160, %c24_161, %c0_162] : memref<2x176x8xf32, #tpu.memory_space<vmem>>, vector<1x128x8xf32>
    %212 = vector.shape_cast %211 : vector<1x128x8xf32> to vector<128x8xf32>
    %213 = vector.shape_cast %210 : vector<128x8xf32> to vector<1x128x8xf32>
    tpu.vector_store %arg8[%c0_160, %c24_161, %c0_162], %213 {strides = array<i32>} : memref<2x176x8xf32, #tpu.memory_space<vmem>>, vector<1x128x8xf32>,
    %c1_163 = arith.constant 1 : index
    %c24_164 = arith.constant 24 : index
    %c0_165 = arith.constant 0 : index
    %214 = vector.load %arg8[%c1_163, %c24_164, %c0_165] : memref<2x176x8xf32, #tpu.memory_space<vmem>>, vector<1x128x8xf32>
    %215 = vector.shape_cast %214 : vector<1x128x8xf32> to vector<128x8xf32>
    %216 = vector.broadcast %194 : vector<1x8xf32> to vector<128x8xf32>
    %217 = arith.mulf %215, %216 : vector<128x8xf32>
    %218 = vector.broadcast %196 : vector<1x8xf32> to vector<128x8xf32>
    %219 = arith.addf %217, %218 : vector<128x8xf32>
    %cst_166 = arith.constant 0.000000e+00 : f32
    %220 = vector.broadcast %cst_166 : f32 to vector<128x8xf32>
    %221 = arith.maximumf %219, %220 : vector<128x8xf32>
    %222 = vector.shape_cast %221 : vector<128x8xf32> to vector<8x16x8xf32>
    %cst_167 = arith.constant 0.000000e+00 : f32
    %223 = vector.shape_cast %11 : vector<8x16x1xi1> to vector<8x16x1xi1>
    %224 = vector.broadcast %223 : vector<8x16x1xi1> to vector<8x16x8xi1>
    %225 = vector.broadcast %cst_167 : f32 to vector<8x16x8xf32>
    %226 = arith.select %224, %222, %225 : vector<8x16x8xi1>, vector<8x16x8xf32>
    %227 = vector.shape_cast %226 : vector<8x16x8xf32> to vector<128x8xf32>
    %c1_168 = arith.constant 1 : index
    %c24_169 = arith.constant 24 : index
    %c0_170 = arith.constant 0 : index
    %228 = vector.load %arg8[%c1_168, %c24_169, %c0_170] : memref<2x176x8xf32, #tpu.memory_space<vmem>>, vector<1x128x8xf32>
    %229 = vector.shape_cast %228 : vector<1x128x8xf32> to vector<128x8xf32>
    %230 = vector.shape_cast %227 : vector<128x8xf32> to vector<1x128x8xf32>
    tpu.vector_store %arg8[%c1_168, %c24_169, %c0_170], %230 {strides = array<i32>} : memref<2x176x8xf32, #tpu.memory_space<vmem>>, vector<1x128x8xf32>,
    %cst_171 = arith.constant 0.000000e+00 : f32
    %231 = vector.broadcast %cst_171 : f32 to vector<8x8xf32>
    %cst_172 = arith.constant 0.000000e+00 : f32
    %232 = vector.broadcast %cst_172 : f32 to vector<8x8xf32>
    %cst_173 = arith.constant 0.000000e+00 : f32
    %233 = vector.broadcast %cst_173 : f32 to vector<128x8xf32>
    %234 = vector.broadcast %18 : vector<1x8xf32> to vector<128x8xf32>
    %235 = arith.addf %233, %234 : vector<128x8xf32>
    %c0_174 = arith.constant 0 : index
    %c7_175 = arith.constant 7 : index
    %c0_176 = arith.constant 0 : index
    %236 = vector.load %arg8[%c0_174, %c7_175, %c0_176] : memref<2x176x8xf32, #tpu.memory_space<vmem>>, vector<1x128x8xf32>
    %237 = vector.shape_cast %236 : vector<1x128x8xf32> to vector<128x8xf32>
    %c0_177 = arith.constant 0 : index
    %c0_178 = arith.constant 0 : index
    %c0_179 = arith.constant 0 : index
    %238 = vector.load %arg4[%c0_177, %c0_178, %c0_179] : memref<9x8x8xf32, #tpu.memory_space<vmem>>, vector<1x8x8xf32>
    %239 = vector.shape_cast %238 : vector<1x8x8xf32> to vector<8x8xf32>
    %cst_180 = arith.constant dense<0.000000e+00> : vector<128x8xf32>
    %240 = tpu.matmul %237, %239, %cst_180 {dimension_numbers = #tpu.dot_dimension_numbers<[1], [0], [0], [1], [0, 0, 1, 1], [], []>} : vector<128x8xf32>, vector<8x8xf32>, vector<128x8xf32> -> vector<128x8xf32>
    %241 = arith.addf %235, %240 : vector<128x8xf32>
    %c0_181 = arith.constant 0 : index
    %c8_182 = arith.constant 8 : index
    %c0_183 = arith.constant 0 : index
    %242 = vector.load %arg8[%c0_181, %c8_182, %c0_183] : memref<2x176x8xf32, #tpu.memory_space<vmem>>, vector<1x128x8xf32>
    %243 = vector.shape_cast %242 : vector<1x128x8xf32> to vector<128x8xf32>
    %c1_184 = arith.constant 1 : index
    %c0_185 = arith.constant 0 : index
    %c0_186 = arith.constant 0 : index
    %244 = vector.load %arg4[%c1_184, %c0_185, %c0_186] : memref<9x8x8xf32, #tpu.memory_space<vmem>>, vector<1x8x8xf32>
    %245 = vector.shape_cast %244 : vector<1x8x8xf32> to vector<8x8xf32>
    %cst_187 = arith.constant dense<0.000000e+00> : vector<128x8xf32>
    %246 = tpu.matmul %243, %245, %cst_187 {dimension_numbers = #tpu.dot_dimension_numbers<[1], [0], [0], [1], [0, 0, 1, 1], [], []>} : vector<128x8xf32>, vector<8x8xf32>, vector<128x8xf32> -> vector<128x8xf32>
    %247 = arith.addf %241, %246 : vector<128x8xf32>
    %c0_188 = arith.constant 0 : index
    %c9 = arith.constant 9 : index
    %c0_189 = arith.constant 0 : index
    %248 = vector.load %arg8[%c0_188, %c9, %c0_189] : memref<2x176x8xf32, #tpu.memory_space<vmem>>, vector<1x128x8xf32>
    %249 = vector.shape_cast %248 : vector<1x128x8xf32> to vector<128x8xf32>
    %c2_190 = arith.constant 2 : index
    %c0_191 = arith.constant 0 : index
    %c0_192 = arith.constant 0 : index
    %250 = vector.load %arg4[%c2_190, %c0_191, %c0_192] : memref<9x8x8xf32, #tpu.memory_space<vmem>>, vector<1x8x8xf32>
    %251 = vector.shape_cast %250 : vector<1x8x8xf32> to vector<8x8xf32>
    %cst_193 = arith.constant dense<0.000000e+00> : vector<128x8xf32>
    %252 = tpu.matmul %249, %251, %cst_193 {dimension_numbers = #tpu.dot_dimension_numbers<[1], [0], [0], [1], [0, 0, 1, 1], [], []>} : vector<128x8xf32>, vector<8x8xf32>, vector<128x8xf32> -> vector<128x8xf32>
    %253 = arith.addf %247, %252 : vector<128x8xf32>
    %c0_194 = arith.constant 0 : index
    %c23 = arith.constant 23 : index
    %c0_195 = arith.constant 0 : index
    %254 = vector.load %arg8[%c0_194, %c23, %c0_195] : memref<2x176x8xf32, #tpu.memory_space<vmem>>, vector<1x128x8xf32>
    %255 = vector.shape_cast %254 : vector<1x128x8xf32> to vector<128x8xf32>
    %c3_196 = arith.constant 3 : index
    %c0_197 = arith.constant 0 : index
    %c0_198 = arith.constant 0 : index
    %256 = vector.load %arg4[%c3_196, %c0_197, %c0_198] : memref<9x8x8xf32, #tpu.memory_space<vmem>>, vector<1x8x8xf32>
    %257 = vector.shape_cast %256 : vector<1x8x8xf32> to vector<8x8xf32>
    %cst_199 = arith.constant dense<0.000000e+00> : vector<128x8xf32>
    %258 = tpu.matmul %255, %257, %cst_199 {dimension_numbers = #tpu.dot_dimension_numbers<[1], [0], [0], [1], [0, 0, 1, 1], [], []>} : vector<128x8xf32>, vector<8x8xf32>, vector<128x8xf32> -> vector<128x8xf32>
    %259 = arith.addf %253, %258 : vector<128x8xf32>
    %c0_200 = arith.constant 0 : index
    %c24_201 = arith.constant 24 : index
    %c0_202 = arith.constant 0 : index
    %260 = vector.load %arg8[%c0_200, %c24_201, %c0_202] : memref<2x176x8xf32, #tpu.memory_space<vmem>>, vector<1x128x8xf32>
    %261 = vector.shape_cast %260 : vector<1x128x8xf32> to vector<128x8xf32>
    %c4_203 = arith.constant 4 : index
    %c0_204 = arith.constant 0 : index
    %c0_205 = arith.constant 0 : index
    %262 = vector.load %arg4[%c4_203, %c0_204, %c0_205] : memref<9x8x8xf32, #tpu.memory_space<vmem>>, vector<1x8x8xf32>
    %263 = vector.shape_cast %262 : vector<1x8x8xf32> to vector<8x8xf32>
    %cst_206 = arith.constant dense<0.000000e+00> : vector<128x8xf32>
    %264 = tpu.matmul %261, %263, %cst_206 {dimension_numbers = #tpu.dot_dimension_numbers<[1], [0], [0], [1], [0, 0, 1, 1], [], []>} : vector<128x8xf32>, vector<8x8xf32>, vector<128x8xf32> -> vector<128x8xf32>
    %265 = arith.addf %259, %264 : vector<128x8xf32>
    %c0_207 = arith.constant 0 : index
    %c25 = arith.constant 25 : index
    %c0_208 = arith.constant 0 : index
    %266 = vector.load %arg8[%c0_207, %c25, %c0_208] : memref<2x176x8xf32, #tpu.memory_space<vmem>>, vector<1x128x8xf32>
    %267 = vector.shape_cast %266 : vector<1x128x8xf32> to vector<128x8xf32>
    %c5_209 = arith.constant 5 : index
    %c0_210 = arith.constant 0 : index
    %c0_211 = arith.constant 0 : index
    %268 = vector.load %arg4[%c5_209, %c0_210, %c0_211] : memref<9x8x8xf32, #tpu.memory_space<vmem>>, vector<1x8x8xf32>
    %269 = vector.shape_cast %268 : vector<1x8x8xf32> to vector<8x8xf32>
    %cst_212 = arith.constant dense<0.000000e+00> : vector<128x8xf32>
    %270 = tpu.matmul %267, %269, %cst_212 {dimension_numbers = #tpu.dot_dimension_numbers<[1], [0], [0], [1], [0, 0, 1, 1], [], []>} : vector<128x8xf32>, vector<8x8xf32>, vector<128x8xf32> -> vector<128x8xf32>
    %271 = arith.addf %265, %270 : vector<128x8xf32>
    %c0_213 = arith.constant 0 : index
    %c39 = arith.constant 39 : index
    %c0_214 = arith.constant 0 : index
    %272 = vector.load %arg8[%c0_213, %c39, %c0_214] : memref<2x176x8xf32, #tpu.memory_space<vmem>>, vector<1x128x8xf32>
    %273 = vector.shape_cast %272 : vector<1x128x8xf32> to vector<128x8xf32>
    %c6_215 = arith.constant 6 : index
    %c0_216 = arith.constant 0 : index
    %c0_217 = arith.constant 0 : index
    %274 = vector.load %arg4[%c6_215, %c0_216, %c0_217] : memref<9x8x8xf32, #tpu.memory_space<vmem>>, vector<1x8x8xf32>
    %275 = vector.shape_cast %274 : vector<1x8x8xf32> to vector<8x8xf32>
    %cst_218 = arith.constant dense<0.000000e+00> : vector<128x8xf32>
    %276 = tpu.matmul %273, %275, %cst_218 {dimension_numbers = #tpu.dot_dimension_numbers<[1], [0], [0], [1], [0, 0, 1, 1], [], []>} : vector<128x8xf32>, vector<8x8xf32>, vector<128x8xf32> -> vector<128x8xf32>
    %277 = arith.addf %271, %276 : vector<128x8xf32>
    %c0_219 = arith.constant 0 : index
    %c40 = arith.constant 40 : index
    %c0_220 = arith.constant 0 : index
    %278 = vector.load %arg8[%c0_219, %c40, %c0_220] : memref<2x176x8xf32, #tpu.memory_space<vmem>>, vector<1x128x8xf32>
    %279 = vector.shape_cast %278 : vector<1x128x8xf32> to vector<128x8xf32>
    %c7_221 = arith.constant 7 : index
    %c0_222 = arith.constant 0 : index
    %c0_223 = arith.constant 0 : index
    %280 = vector.load %arg4[%c7_221, %c0_222, %c0_223] : memref<9x8x8xf32, #tpu.memory_space<vmem>>, vector<1x8x8xf32>
    %281 = vector.shape_cast %280 : vector<1x8x8xf32> to vector<8x8xf32>
    %cst_224 = arith.constant dense<0.000000e+00> : vector<128x8xf32>
    %282 = tpu.matmul %279, %281, %cst_224 {dimension_numbers = #tpu.dot_dimension_numbers<[1], [0], [0], [1], [0, 0, 1, 1], [], []>} : vector<128x8xf32>, vector<8x8xf32>, vector<128x8xf32> -> vector<128x8xf32>
    %283 = arith.addf %277, %282 : vector<128x8xf32>
    %c0_225 = arith.constant 0 : index
    %c41 = arith.constant 41 : index
    %c0_226 = arith.constant 0 : index
    %284 = vector.load %arg8[%c0_225, %c41, %c0_226] : memref<2x176x8xf32, #tpu.memory_space<vmem>>, vector<1x128x8xf32>
    %285 = vector.shape_cast %284 : vector<1x128x8xf32> to vector<128x8xf32>
    %c8_227 = arith.constant 8 : index
    %c0_228 = arith.constant 0 : index
    %c0_229 = arith.constant 0 : index
    %286 = vector.load %arg4[%c8_227, %c0_228, %c0_229] : memref<9x8x8xf32, #tpu.memory_space<vmem>>, vector<1x8x8xf32>
    %287 = vector.shape_cast %286 : vector<1x8x8xf32> to vector<8x8xf32>
    %cst_230 = arith.constant dense<0.000000e+00> : vector<128x8xf32>
    %288 = tpu.matmul %285, %287, %cst_230 {dimension_numbers = #tpu.dot_dimension_numbers<[1], [0], [0], [1], [0, 0, 1, 1], [], []>} : vector<128x8xf32>, vector<8x8xf32>, vector<128x8xf32> -> vector<128x8xf32>
    %289 = arith.addf %283, %288 : vector<128x8xf32>
    %290 = vector.shape_cast %289 : vector<128x8xf32> to vector<8x16x8xf32>
    %cst_231 = arith.constant 0.000000e+00 : f32
    %291 = vector.shape_cast %11 : vector<8x16x1xi1> to vector<8x16x1xi1>
    %292 = vector.broadcast %291 : vector<8x16x1xi1> to vector<8x16x8xi1>
    %293 = vector.broadcast %cst_231 : f32 to vector<8x16x8xf32>
    %294 = arith.select %292, %290, %293 : vector<8x16x8xi1>, vector<8x16x8xf32>
    %295 = vector.shape_cast %294 : vector<8x16x8xf32> to vector<128x8xf32>
    %cst_232 = arith.constant dense<0.000000e+00> : vector<8x8xf32>
    %296 = tpu.matmul %12, %295, %cst_232 {dimension_numbers = #tpu.dot_dimension_numbers<[1], [0], [0], [1], [0, 0, 1, 1], [], []>} : vector<8x128xf32>, vector<128x8xf32>, vector<8x8xf32> -> vector<8x8xf32>
    %297 = arith.addf %231, %296 : vector<8x8xf32>
    %298 = arith.mulf %295, %295 : vector<128x8xf32>
    %cst_233 = arith.constant dense<0.000000e+00> : vector<8x8xf32>
    %299 = tpu.matmul %12, %298, %cst_233 {dimension_numbers = #tpu.dot_dimension_numbers<[1], [0], [0], [1], [0, 0, 1, 1], [], []>} : vector<8x128xf32>, vector<128x8xf32>, vector<8x8xf32> -> vector<8x8xf32>
    %300 = arith.addf %232, %299 : vector<8x8xf32>
    %c0_234 = arith.constant 0 : index
    %c0_235 = arith.constant 0 : index
    %c0_236 = arith.constant 0 : index
    %301 = vector.load %arg6[%c0_234, %c0_235, %c0_236] : memref<2x128x8xf32, #tpu.memory_space<vmem>>, vector<1x128x8xf32>
    %302 = vector.shape_cast %301 : vector<1x128x8xf32> to vector<128x8xf32>
    %303 = vector.shape_cast %289 : vector<128x8xf32> to vector<1x128x8xf32>
    tpu.vector_store %arg6[%c0_234, %c0_235, %c0_236], %303 {strides = array<i32>} : memref<2x128x8xf32, #tpu.memory_space<vmem>>, vector<1x128x8xf32>,
    %cst_237 = arith.constant 0.000000e+00 : f32
    %304 = vector.broadcast %cst_237 : f32 to vector<128x8xf32>
    %305 = vector.broadcast %18 : vector<1x8xf32> to vector<128x8xf32>
    %306 = arith.addf %304, %305 : vector<128x8xf32>
    %c1_238 = arith.constant 1 : index
    %c7_239 = arith.constant 7 : index
    %c0_240 = arith.constant 0 : index
    %307 = vector.load %arg8[%c1_238, %c7_239, %c0_240] : memref<2x176x8xf32, #tpu.memory_space<vmem>>, vector<1x128x8xf32>
    %308 = vector.shape_cast %307 : vector<1x128x8xf32> to vector<128x8xf32>
    %c0_241 = arith.constant 0 : index
    %c0_242 = arith.constant 0 : index
    %c0_243 = arith.constant 0 : index
    %309 = vector.load %arg4[%c0_241, %c0_242, %c0_243] : memref<9x8x8xf32, #tpu.memory_space<vmem>>, vector<1x8x8xf32>
    %310 = vector.shape_cast %309 : vector<1x8x8xf32> to vector<8x8xf32>
    %cst_244 = arith.constant dense<0.000000e+00> : vector<128x8xf32>
    %311 = tpu.matmul %308, %310, %cst_244 {dimension_numbers = #tpu.dot_dimension_numbers<[1], [0], [0], [1], [0, 0, 1, 1], [], []>} : vector<128x8xf32>, vector<8x8xf32>, vector<128x8xf32> -> vector<128x8xf32>
    %312 = arith.addf %306, %311 : vector<128x8xf32>
    %c1_245 = arith.constant 1 : index
    %c8_246 = arith.constant 8 : index
    %c0_247 = arith.constant 0 : index
    %313 = vector.load %arg8[%c1_245, %c8_246, %c0_247] : memref<2x176x8xf32, #tpu.memory_space<vmem>>, vector<1x128x8xf32>
    %314 = vector.shape_cast %313 : vector<1x128x8xf32> to vector<128x8xf32>
    %c1_248 = arith.constant 1 : index
    %c0_249 = arith.constant 0 : index
    %c0_250 = arith.constant 0 : index
    %315 = vector.load %arg4[%c1_248, %c0_249, %c0_250] : memref<9x8x8xf32, #tpu.memory_space<vmem>>, vector<1x8x8xf32>
    %316 = vector.shape_cast %315 : vector<1x8x8xf32> to vector<8x8xf32>
    %cst_251 = arith.constant dense<0.000000e+00> : vector<128x8xf32>
    %317 = tpu.matmul %314, %316, %cst_251 {dimension_numbers = #tpu.dot_dimension_numbers<[1], [0], [0], [1], [0, 0, 1, 1], [], []>} : vector<128x8xf32>, vector<8x8xf32>, vector<128x8xf32> -> vector<128x8xf32>
    %318 = arith.addf %312, %317 : vector<128x8xf32>
    %c1_252 = arith.constant 1 : index
    %c9_253 = arith.constant 9 : index
    %c0_254 = arith.constant 0 : index
    %319 = vector.load %arg8[%c1_252, %c9_253, %c0_254] : memref<2x176x8xf32, #tpu.memory_space<vmem>>, vector<1x128x8xf32>
    %320 = vector.shape_cast %319 : vector<1x128x8xf32> to vector<128x8xf32>
    %c2_255 = arith.constant 2 : index
    %c0_256 = arith.constant 0 : index
    %c0_257 = arith.constant 0 : index
    %321 = vector.load %arg4[%c2_255, %c0_256, %c0_257] : memref<9x8x8xf32, #tpu.memory_space<vmem>>, vector<1x8x8xf32>
    %322 = vector.shape_cast %321 : vector<1x8x8xf32> to vector<8x8xf32>
    %cst_258 = arith.constant dense<0.000000e+00> : vector<128x8xf32>
    %323 = tpu.matmul %320, %322, %cst_258 {dimension_numbers = #tpu.dot_dimension_numbers<[1], [0], [0], [1], [0, 0, 1, 1], [], []>} : vector<128x8xf32>, vector<8x8xf32>, vector<128x8xf32> -> vector<128x8xf32>
    %324 = arith.addf %318, %323 : vector<128x8xf32>
    %c1_259 = arith.constant 1 : index
    %c23_260 = arith.constant 23 : index
    %c0_261 = arith.constant 0 : index
    %325 = vector.load %arg8[%c1_259, %c23_260, %c0_261] : memref<2x176x8xf32, #tpu.memory_space<vmem>>, vector<1x128x8xf32>
    %326 = vector.shape_cast %325 : vector<1x128x8xf32> to vector<128x8xf32>
    %c3_262 = arith.constant 3 : index
    %c0_263 = arith.constant 0 : index
    %c0_264 = arith.constant 0 : index
    %327 = vector.load %arg4[%c3_262, %c0_263, %c0_264] : memref<9x8x8xf32, #tpu.memory_space<vmem>>, vector<1x8x8xf32>
    %328 = vector.shape_cast %327 : vector<1x8x8xf32> to vector<8x8xf32>
    %cst_265 = arith.constant dense<0.000000e+00> : vector<128x8xf32>
    %329 = tpu.matmul %326, %328, %cst_265 {dimension_numbers = #tpu.dot_dimension_numbers<[1], [0], [0], [1], [0, 0, 1, 1], [], []>} : vector<128x8xf32>, vector<8x8xf32>, vector<128x8xf32> -> vector<128x8xf32>
    %330 = arith.addf %324, %329 : vector<128x8xf32>
    %c1_266 = arith.constant 1 : index
    %c24_267 = arith.constant 24 : index
    %c0_268 = arith.constant 0 : index
    %331 = vector.load %arg8[%c1_266, %c24_267, %c0_268] : memref<2x176x8xf32, #tpu.memory_space<vmem>>, vector<1x128x8xf32>
    %332 = vector.shape_cast %331 : vector<1x128x8xf32> to vector<128x8xf32>
    %c4_269 = arith.constant 4 : index
    %c0_270 = arith.constant 0 : index
    %c0_271 = arith.constant 0 : index
    %333 = vector.load %arg4[%c4_269, %c0_270, %c0_271] : memref<9x8x8xf32, #tpu.memory_space<vmem>>, vector<1x8x8xf32>
    %334 = vector.shape_cast %333 : vector<1x8x8xf32> to vector<8x8xf32>
    %cst_272 = arith.constant dense<0.000000e+00> : vector<128x8xf32>
    %335 = tpu.matmul %332, %334, %cst_272 {dimension_numbers = #tpu.dot_dimension_numbers<[1], [0], [0], [1], [0, 0, 1, 1], [], []>} : vector<128x8xf32>, vector<8x8xf32>, vector<128x8xf32> -> vector<128x8xf32>
    %336 = arith.addf %330, %335 : vector<128x8xf32>
    %c1_273 = arith.constant 1 : index
    %c25_274 = arith.constant 25 : index
    %c0_275 = arith.constant 0 : index
    %337 = vector.load %arg8[%c1_273, %c25_274, %c0_275] : memref<2x176x8xf32, #tpu.memory_space<vmem>>, vector<1x128x8xf32>
    %338 = vector.shape_cast %337 : vector<1x128x8xf32> to vector<128x8xf32>
    %c5_276 = arith.constant 5 : index
    %c0_277 = arith.constant 0 : index
    %c0_278 = arith.constant 0 : index
    %339 = vector.load %arg4[%c5_276, %c0_277, %c0_278] : memref<9x8x8xf32, #tpu.memory_space<vmem>>, vector<1x8x8xf32>
    %340 = vector.shape_cast %339 : vector<1x8x8xf32> to vector<8x8xf32>
    %cst_279 = arith.constant dense<0.000000e+00> : vector<128x8xf32>
    %341 = tpu.matmul %338, %340, %cst_279 {dimension_numbers = #tpu.dot_dimension_numbers<[1], [0], [0], [1], [0, 0, 1, 1], [], []>} : vector<128x8xf32>, vector<8x8xf32>, vector<128x8xf32> -> vector<128x8xf32>
    %342 = arith.addf %336, %341 : vector<128x8xf32>
    %c1_280 = arith.constant 1 : index
    %c39_281 = arith.constant 39 : index
    %c0_282 = arith.constant 0 : index
    %343 = vector.load %arg8[%c1_280, %c39_281, %c0_282] : memref<2x176x8xf32, #tpu.memory_space<vmem>>, vector<1x128x8xf32>
    %344 = vector.shape_cast %343 : vector<1x128x8xf32> to vector<128x8xf32>
    %c6_283 = arith.constant 6 : index
    %c0_284 = arith.constant 0 : index
    %c0_285 = arith.constant 0 : index
    %345 = vector.load %arg4[%c6_283, %c0_284, %c0_285] : memref<9x8x8xf32, #tpu.memory_space<vmem>>, vector<1x8x8xf32>
    %346 = vector.shape_cast %345 : vector<1x8x8xf32> to vector<8x8xf32>
    %cst_286 = arith.constant dense<0.000000e+00> : vector<128x8xf32>
    %347 = tpu.matmul %344, %346, %cst_286 {dimension_numbers = #tpu.dot_dimension_numbers<[1], [0], [0], [1], [0, 0, 1, 1], [], []>} : vector<128x8xf32>, vector<8x8xf32>, vector<128x8xf32> -> vector<128x8xf32>
    %348 = arith.addf %342, %347 : vector<128x8xf32>
    %c1_287 = arith.constant 1 : index
    %c40_288 = arith.constant 40 : index
    %c0_289 = arith.constant 0 : index
    %349 = vector.load %arg8[%c1_287, %c40_288, %c0_289] : memref<2x176x8xf32, #tpu.memory_space<vmem>>, vector<1x128x8xf32>
    %350 = vector.shape_cast %349 : vector<1x128x8xf32> to vector<128x8xf32>
    %c7_290 = arith.constant 7 : index
    %c0_291 = arith.constant 0 : index
    %c0_292 = arith.constant 0 : index
    %351 = vector.load %arg4[%c7_290, %c0_291, %c0_292] : memref<9x8x8xf32, #tpu.memory_space<vmem>>, vector<1x8x8xf32>
    %352 = vector.shape_cast %351 : vector<1x8x8xf32> to vector<8x8xf32>
    %cst_293 = arith.constant dense<0.000000e+00> : vector<128x8xf32>
    %353 = tpu.matmul %350, %352, %cst_293 {dimension_numbers = #tpu.dot_dimension_numbers<[1], [0], [0], [1], [0, 0, 1, 1], [], []>} : vector<128x8xf32>, vector<8x8xf32>, vector<128x8xf32> -> vector<128x8xf32>
    %354 = arith.addf %348, %353 : vector<128x8xf32>
    %c1_294 = arith.constant 1 : index
    %c41_295 = arith.constant 41 : index
    %c0_296 = arith.constant 0 : index
    %355 = vector.load %arg8[%c1_294, %c41_295, %c0_296] : memref<2x176x8xf32, #tpu.memory_space<vmem>>, vector<1x128x8xf32>
    %356 = vector.shape_cast %355 : vector<1x128x8xf32> to vector<128x8xf32>
    %c8_297 = arith.constant 8 : index
    %c0_298 = arith.constant 0 : index
    %c0_299 = arith.constant 0 : index
    %357 = vector.load %arg4[%c8_297, %c0_298, %c0_299] : memref<9x8x8xf32, #tpu.memory_space<vmem>>, vector<1x8x8xf32>
    %358 = vector.shape_cast %357 : vector<1x8x8xf32> to vector<8x8xf32>
    %cst_300 = arith.constant dense<0.000000e+00> : vector<128x8xf32>
    %359 = tpu.matmul %356, %358, %cst_300 {dimension_numbers = #tpu.dot_dimension_numbers<[1], [0], [0], [1], [0, 0, 1, 1], [], []>} : vector<128x8xf32>, vector<8x8xf32>, vector<128x8xf32> -> vector<128x8xf32>
    %360 = arith.addf %354, %359 : vector<128x8xf32>
    %361 = vector.shape_cast %360 : vector<128x8xf32> to vector<8x16x8xf32>
    %cst_301 = arith.constant 0.000000e+00 : f32
    %362 = vector.shape_cast %11 : vector<8x16x1xi1> to vector<8x16x1xi1>
    %363 = vector.broadcast %362 : vector<8x16x1xi1> to vector<8x16x8xi1>
    %364 = vector.broadcast %cst_301 : f32 to vector<8x16x8xf32>
    %365 = arith.select %363, %361, %364 : vector<8x16x8xi1>, vector<8x16x8xf32>
    %366 = vector.shape_cast %365 : vector<8x16x8xf32> to vector<128x8xf32>
    %cst_302 = arith.constant dense<0.000000e+00> : vector<8x8xf32>
    %367 = tpu.matmul %12, %366, %cst_302 {dimension_numbers = #tpu.dot_dimension_numbers<[1], [0], [0], [1], [0, 0, 1, 1], [], []>} : vector<8x128xf32>, vector<128x8xf32>, vector<8x8xf32> -> vector<8x8xf32>
    %368 = arith.addf %297, %367 : vector<8x8xf32>
    %369 = arith.mulf %366, %366 : vector<128x8xf32>
    %cst_303 = arith.constant dense<0.000000e+00> : vector<8x8xf32>
    %370 = tpu.matmul %12, %369, %cst_303 {dimension_numbers = #tpu.dot_dimension_numbers<[1], [0], [0], [1], [0, 0, 1, 1], [], []>} : vector<8x128xf32>, vector<128x8xf32>, vector<8x8xf32> -> vector<8x8xf32>
    %371 = arith.addf %300, %370 : vector<8x8xf32>
    %c1_304 = arith.constant 1 : index
    %c0_305 = arith.constant 0 : index
    %c0_306 = arith.constant 0 : index
    %372 = vector.load %arg6[%c1_304, %c0_305, %c0_306] : memref<2x128x8xf32, #tpu.memory_space<vmem>>, vector<1x128x8xf32>
    %373 = vector.shape_cast %372 : vector<1x128x8xf32> to vector<128x8xf32>
    %374 = vector.shape_cast %360 : vector<128x8xf32> to vector<1x128x8xf32>
    tpu.vector_store %arg6[%c1_304, %c0_305, %c0_306], %374 {strides = array<i32>} : memref<2x128x8xf32, #tpu.memory_space<vmem>>, vector<1x128x8xf32>,
    %375 = vector.extract_strided_slice %368 {offsets = [0, 0], sizes = [1, 8], strides = [1, 1]} : vector<8x8xf32> to vector<1x8xf32>
    %cst_307 = arith.constant 1.280000e+02 : f32
    %376 = vector.broadcast %cst_307 : f32 to vector<1x8xf32>
    %377 = arith.divf %375, %376 : vector<1x8xf32>
    %378 = vector.extract_strided_slice %371 {offsets = [0, 0], sizes = [1, 8], strides = [1, 1]} : vector<8x8xf32> to vector<1x8xf32>
    %cst_308 = arith.constant 1.280000e+02 : f32
    %379 = vector.broadcast %cst_308 : f32 to vector<1x8xf32>
    %380 = arith.divf %378, %379 : vector<1x8xf32>
    %381 = arith.mulf %377, %377 : vector<1x8xf32>
    %382 = arith.subf %380, %381 : vector<1x8xf32>
    %cst_309 = arith.constant 0.000000e+00 : f32
    %383 = vector.broadcast %cst_309 : f32 to vector<1x8xf32>
    %384 = arith.maximumf %382, %383 : vector<1x8xf32>
    %cst_310 = arith.constant 9.99999974E-6 : f32
    %385 = vector.broadcast %cst_310 : f32 to vector<1x8xf32>
    %386 = arith.addf %384, %385 : vector<1x8xf32>
    %387 = math.rsqrt %386 : vector<1x8xf32>
    %388 = arith.mulf %19, %387 : vector<1x8xf32>
    %389 = arith.mulf %377, %388 : vector<1x8xf32>
    %390 = arith.subf %20, %389 : vector<1x8xf32>
    %c0_311 = arith.constant 0 : index
    %c0_312 = arith.constant 0 : index
    %c0_313 = arith.constant 0 : index
    %391 = vector.load %arg6[%c0_311, %c0_312, %c0_313] : memref<2x128x8xf32, #tpu.memory_space<vmem>>, vector<1x128x8xf32>
    %392 = vector.shape_cast %391 : vector<1x128x8xf32> to vector<128x8xf32>
    %393 = vector.broadcast %388 : vector<1x8xf32> to vector<128x8xf32>
    %394 = arith.mulf %392, %393 : vector<128x8xf32>
    %395 = vector.broadcast %390 : vector<1x8xf32> to vector<128x8xf32>
    %396 = arith.addf %394, %395 : vector<128x8xf32>
    %cst_314 = arith.constant 0.000000e+00 : f32
    %397 = vector.broadcast %cst_314 : f32 to vector<128x8xf32>
    %398 = arith.maximumf %396, %397 : vector<128x8xf32>
    %c0_315 = arith.constant 0 : index
    %c0_316 = arith.constant 0 : index
    %c0_317 = arith.constant 0 : index
    %399 = vector.load %arg6[%c0_315, %c0_316, %c0_317] : memref<2x128x8xf32, #tpu.memory_space<vmem>>, vector<1x128x8xf32>
    %400 = vector.shape_cast %399 : vector<1x128x8xf32> to vector<128x8xf32>
    %401 = vector.shape_cast %398 : vector<128x8xf32> to vector<1x128x8xf32>
    tpu.vector_store %arg6[%c0_315, %c0_316, %c0_317], %401 {strides = array<i32>} : memref<2x128x8xf32, #tpu.memory_space<vmem>>, vector<1x128x8xf32>,
    %c1_318 = arith.constant 1 : index
    %c0_319 = arith.constant 0 : index
    %c0_320 = arith.constant 0 : index
    %402 = vector.load %arg6[%c1_318, %c0_319, %c0_320] : memref<2x128x8xf32, #tpu.memory_space<vmem>>, vector<1x128x8xf32>
    %403 = vector.shape_cast %402 : vector<1x128x8xf32> to vector<128x8xf32>
    %404 = vector.broadcast %388 : vector<1x8xf32> to vector<128x8xf32>
    %405 = arith.mulf %403, %404 : vector<128x8xf32>
    %406 = vector.broadcast %390 : vector<1x8xf32> to vector<128x8xf32>
    %407 = arith.addf %405, %406 : vector<128x8xf32>
    %cst_321 = arith.constant 0.000000e+00 : f32
    %408 = vector.broadcast %cst_321 : f32 to vector<128x8xf32>
    %409 = arith.maximumf %407, %408 : vector<128x8xf32>
    %c1_322 = arith.constant 1 : index
    %c0_323 = arith.constant 0 : index
    %c0_324 = arith.constant 0 : index
    %410 = vector.load %arg6[%c1_322, %c0_323, %c0_324] : memref<2x128x8xf32, #tpu.memory_space<vmem>>, vector<1x128x8xf32>
    %411 = vector.shape_cast %410 : vector<1x128x8xf32> to vector<128x8xf32>
    %412 = vector.shape_cast %409 : vector<128x8xf32> to vector<1x128x8xf32>
    tpu.vector_store %arg6[%c1_322, %c0_323, %c0_324], %412 {strides = array<i32>} : memref<2x128x8xf32, #tpu.memory_space<vmem>>, vector<1x128x8xf32>,
    return
  }
  func.func @transform_0(%arg0: i32) -> (i32, i32, i32) {
    %c0_i32 = arith.constant 0 : i32
    %c0_i32_0 = arith.constant 0 : i32
    %c0_i32_1 = arith.constant 0 : i32
    %c0_i32_2 = arith.constant 0 : i32
    return %c0_i32, %c0_i32_0, %c0_i32_1 : i32, i32, i32
  }
  func.func @transform_1(%arg0: i32) -> (i32, i32, i32) {
    %c0_i32 = arith.constant 0 : i32
    %c0_i32_0 = arith.constant 0 : i32
    %c0_i32_1 = arith.constant 0 : i32
    %c0_i32_2 = arith.constant 0 : i32
    return %c0_i32, %c0_i32_0, %c0_i32_1 : i32, i32, i32
  }
  func.func @transform_2(%arg0: i32) -> (i32, i32) {
    %c0_i32 = arith.constant 0 : i32
    %c0_i32_0 = arith.constant 0 : i32
    %c0_i32_1 = arith.constant 0 : i32
    return %c0_i32, %c0_i32_0 : i32, i32
  }
  func.func @transform_3(%arg0: i32) -> (i32, i32, i32) {
    %c0_i32 = arith.constant 0 : i32
    %c0_i32_0 = arith.constant 0 : i32
    %c0_i32_1 = arith.constant 0 : i32
    %c0_i32_2 = arith.constant 0 : i32
    return %c0_i32, %c0_i32_0, %c0_i32_1 : i32, i32, i32
  }
  func.func @transform_4(%arg0: i32) -> (i32, i32) {
    %c0_i32 = arith.constant 0 : i32
    %c0_i32_0 = arith.constant 0 : i32
    %c0_i32_1 = arith.constant 0 : i32
    return %c0_i32, %c0_i32_0 : i32, i32
  }
  func.func @transform_5(%arg0: i32) -> (i32, i32, i32) {
    %c0_i32 = arith.constant 0 : i32
    %c0_i32_0 = arith.constant 0 : i32
    %c0_i32_1 = arith.constant 0 : i32
    %c0_i32_2 = arith.constant 0 : i32
    return %c0_i32, %c0_i32_0, %c0_i32_1 : i32, i32, i32
  }
}

</mosaic_0001>

<bundles_post_ra>
// kernel: down_forward.1
= control target key start
LH: loop header
LB: loop body
LE: loop exit
PB: predicated region body
PF: predicated region fallthrough
CT: control target
= control target key end

     0   :  { %s13419_s20 = smov 120   ;;  %s13420_s21 = smov 124   ;;  %vm728_vm0 = vcmask 1043456   ;;  %vm608_vm1 = vcmask 31744   ;;  %vm2769_vm2 = vcmask 64512   ;;  %vm13424_vm3 = vmmov 0   ;;  %s16488_s0 = inlined_call_operand.vmem [shape: f32[2,168,16], index: 0, kind: input, shape index: {}]   ;;  %s16489_s1 = inlined_call_operand.vmem [shape: f32[9,4,8], index: 1, kind: input, shape index: {}]   ;;  %s16490_s2 = inlined_call_operand.vmem [shape: f32[3,8], index: 2, kind: input, shape index: {}]   ;;  %s16491_s3 = inlined_call_operand.vmem [shape: f32[9,8,8], index: 3, kind: input, shape index: {}]   ;;  %s16492_s4 = inlined_call_operand.vmem [shape: f32[3,8], index: 4, kind: input, shape index: {}]   ;;  %s16493_s5 = inlined_call_operand.vmem [shape: f32[2,128,8], index: 5, kind: output, shape index: {}]  }
   0x1   :  { %v13459_v0 = vld [vmem:[%s16488_s0 + $0xa8] sm:$0xff]  ;;  %v13468_v1 = vld [vmem:[%s16488_s0 + $0xb0] sm:$0xff]  ;;  %v13477_v2 = vld [vmem:[%s16488_s0 + $0xb8] sm:$0xff]  ;;  %s13421_s28 = smov 116  }
   0x2   :  { %314 = vrot.lane.b32.xlu1 %v13459_v0, %s13419_s20  ;;  %146 = vrot.lane.b32.xlu0 %v13459_v0, %s13420_s21  ;;  %v2809_v3 = vld [vmem:[%s16489_s1] sm:$0xf]  ;;  %v13504_v5 = vld [vmem:[%s16488_s0 + $0xc8] sm:$0xff] }
   0x3   :  { %v13489_v4 = vld [vmem:[%s16488_s0 + $0xc0] sm:$0xff]  ;;  %11706 = vmatprep.subr.msk.mxu1 %vm728_vm0, %v2809_v3  ;;  %v13513_v6 = vld [vmem:[%s16488_s0 + $0xd0] sm:$0xff]  ;;  %v13526_v7 = vld [vmem:[%s16488_s0 + $0xd8] sm:$0xff] }
   0x4   :  { %11707 = vmatpush3.msk.msra.mxu1 %vm728_vm0, %v2809_v3  ;;  %v13535_v8 = vld [vmem:[%s16488_s0 + $0xe0] sm:$0xff]  ;;  %v13548_v9 = vld [vmem:[%s16488_s0 + $0xe8] sm:$0xff]  ;;  %v13557_v10 = vld [vmem:[%s16488_s0 + $0xf0] sm:$0xff] }
   0x5   :  { %v13570_v11 = vld [vmem:[%s16488_s0 + $0xf8] sm:$0xff]  ;;  %v13579_v12 = vld [vmem:[%s16488_s0 + $0x100] sm:$0xff]  ;;  %v13592_v13 = vld [vmem:[%s16488_s0 + $0x108] sm:$0xff] }
   0x6   :  { %316 = vrot.lane.b32.xlu1 %v13468_v1, %s13419_s20  ;;  %148 = vrot.lane.b32.xlu0 %v13468_v1, %s13420_s21  ;;  %v13601_v14 = vld [vmem:[%s16488_s0 + $0x110] sm:$0xff]  ;;  %v13614_v15 = vld [vmem:[%s16488_s0 + $0x118] sm:$0xff] }
   0x7   :  { %v13623_v16 = vld [vmem:[%s16488_s0 + $0x120] sm:$0xff]  ;;  %v13641_v18 = vld [vmem:[%s16488_s0 + $0x8] sm:$0xff]  ;;  %v13665_v20 = vld [vmem:[%s16488_s0 + $0x10] sm:$0xff] }
   0x8   :  { %v13632_v17 = vld [vmem:[%s16488_s0] sm:$0xff]  ;;  %v13678_v22 = vld [vmem:[%s16488_s0 + $0x18] sm:$0xff]  ;;  %v13702_v27 = vld [vmem:[%s16488_s0 + $0x28] sm:$0xff] }
   0x9   :  { %v13654_v19 = vld [vmem:[%s16489_s1 + $0x4] sm:$0xf]  ;;  %v679_v21 = vld [vmem:[%s16489_s1] sm:$0xf]  ;;  %v13717_v36 = vld [vmem:[%s16488_s0 + $0x30] sm:$0xff] }
   0xa   :  { %482 = vrot.lane.b32.xlu1 %v13459_v0, %s13421_s28  ;;  %150 = vrot.lane.b32.xlu0 %v13477_v2, %s13420_s21  ;;  %v13692_v23 = vld [vmem:[%s16488_s0 + $0x20] sm:$0xff]  ;;  %v13727_v40 = vld [vmem:[%s16488_s0 + $0x38] sm:$0xff] }
   0xb   :  { %11732 = vmatprep.subr.msk.mxu1 %vm728_vm0, %v13654_v19  ;;  %11472 = vmatprep.subr.msk.mxu0 %vm728_vm0, %v679_v21  ;;  %v13745_v52 = vld [vmem:[%s16488_s0 + $0x40] sm:$0xff]  ;;  %v13757_v56 = vld [vmem:[%s16488_s0 + $0x48] sm:$0xff] }
   0xc   :  { %11473 = vmatpush3.msk.msra.mxu0 %vm728_vm0, %v679_v21  ;;  %v13791_v21 = vld [vmem:[%s16488_s0 + $0x58] sm:$0xff] }
   0xe   :  { %484 = vrot.lane.b32.xlu1 %v13468_v1, %s13421_s28  ;;  %152 = vrot.lane.b32.xlu0 %v13489_v4, %s13420_s21 }
  0x12   :  { %320 = vrot.lane.b32.xlu1 %v13489_v4, %s13419_s20  ;;  %318 = vrot.lane.b32.xlu0 %v13477_v2, %s13419_s20 }
  0x16   :  { %486 = vrot.lane.b32.xlu1 %v13477_v2, %s13421_s28  ;;  %154 = vrot.lane.b32.xlu0 %v13504_v5, %s13420_s21 }
  0x1a   :  { %488 = vrot.lane.b32.xlu1 %v13489_v4, %s13421_s28  ;;  %156 = vrot.lane.b32.xlu0 %v13513_v6, %s13420_s21 }
  0x1e   :  { %324 = vrot.lane.b32.xlu1 %v13513_v6, %s13419_s20  ;;  %322 = vrot.lane.b32.xlu0 %v13504_v5, %s13419_s20 }
  0x22   :  { %490 = vrot.lane.b32.xlu1 %v13504_v5, %s13421_s28  ;;  %158 = vrot.lane.b32.xlu0 %v13526_v7, %s13420_s21 }
  0x26   :  { %492 = vrot.lane.b32.xlu1 %v13513_v6, %s13421_s28  ;;  %160 = vrot.lane.b32.xlu0 %v13535_v8, %s13420_s21 }
  0x2a   :  { %328 = vrot.lane.b32.xlu1 %v13535_v8, %s13419_s20  ;;  %326 = vrot.lane.b32.xlu0 %v13526_v7, %s13419_s20 }
  0x2e   :  { %494 = vrot.lane.b32.xlu1 %v13526_v7, %s13421_s28  ;;  %162 = vrot.lane.b32.xlu0 %v13548_v9, %s13420_s21 }
  0x32   :  { %496 = vrot.lane.b32.xlu1 %v13535_v8, %s13421_s28  ;;  %164 = vrot.lane.b32.xlu0 %v13557_v10, %s13420_s21 }
  0x36   :  { %332 = vrot.lane.b32.xlu1 %v13557_v10, %s13419_s20  ;;  %330 = vrot.lane.b32.xlu0 %v13548_v9, %s13419_s20 }
  0x3a   :  { %498 = vrot.lane.b32.xlu1 %v13548_v9, %s13421_s28  ;;  %166 = vrot.lane.b32.xlu0 %v13570_v11, %s13420_s21 }
  0x3e   :  { %500 = vrot.lane.b32.xlu1 %v13557_v10, %s13421_s28  ;;  %168 = vrot.lane.b32.xlu0 %v13579_v12, %s13420_s21 }
  0x42   :  { %336 = vrot.lane.b32.xlu1 %v13579_v12, %s13419_s20  ;;  %334 = vrot.lane.b32.xlu0 %v13570_v11, %s13419_s20 }
  0x46   :  { %502 = vrot.lane.b32.xlu1 %v13570_v11, %s13421_s28  ;;  %170 = vrot.lane.b32.xlu0 %v13592_v13, %s13420_s21 }
  0x4a   :  { %504 = vrot.lane.b32.xlu1 %v13579_v12, %s13421_s28  ;;  %172 = vrot.lane.b32.xlu0 %v13601_v14, %s13420_s21 }
  0x4e   :  { %340 = vrot.lane.b32.xlu1 %v13601_v14, %s13419_s20  ;;  %338 = vrot.lane.b32.xlu0 %v13592_v13, %s13419_s20 }
  0x52   :  { %506 = vrot.lane.b32.xlu1 %v13592_v13, %s13421_s28  ;;  %174 = vrot.lane.b32.xlu0 %v13614_v15, %s13420_s21 }
  0x56   :  { %508 = vrot.lane.b32.xlu1 %v13601_v14, %s13421_s28  ;;  %176 = vrot.lane.b32.xlu0 %v13623_v16, %s13420_s21 }
  0x5a   :  { %342 = vrot.lane.b32.xlu1 %v13614_v15, %s13419_s20  ;;  %104 = vrot.lane.b32.xlu0 %v13632_v17, %s13420_s21 }
  0x5e   :  { %344 = vrot.lane.b32.xlu1 %v13623_v16, %s13419_s20  ;;  %106 = vrot.lane.b32.xlu0 %v13641_v18, %s13420_s21 }
  0x62   :  { %510 = vrot.lane.b32.xlu1 %v13614_v15, %s13421_s28  ;;  %272 = vrot.lane.b32.xlu0 %v13632_v17, %s13419_s20 }
  0x66   :  { %512 = vrot.lane.b32.xlu1 %v13623_v16, %s13421_s28  ;;  %274 = vrot.lane.b32.xlu0 %v13641_v18, %s13419_s20 }
  0x6a   :  { %440 = vrot.lane.b32.xlu1 %v13632_v17, %s13421_s28  ;;  %108 = vrot.lane.b32.xlu0 %v13665_v20, %s13420_s21 }
  0x6e   :  { %442 = vrot.lane.b32.xlu1 %v13641_v18, %s13421_s28  ;;  %110 = vrot.lane.b32.xlu0 %v13678_v22, %s13420_s21 }
  0x72   :  { %278 = vrot.lane.b32.xlu1 %v13678_v22, %s13419_s20  ;;  %276 = vrot.lane.b32.xlu0 %v13665_v20, %s13419_s20 }
  0x74   :  { %v315_v24 = vpop.permute.xlu1 %314  ;;  %v147_v25 = vpop.permute.xlu0 %146 }
  0x75   :  { %v251_v26 = vmax.f32 %v13459_v0, %v147_v25 }
  0x76   :  { %444 = vrot.lane.b32.xlu1 %v13665_v20, %s13421_s28  ;;  %112 = vrot.lane.b32.xlu0 %v13692_v23, %s13420_s21 }
  0x77   :  { %v419_v31 = vmax.f32 %v251_v26, %v315_v24 }
  0x78   :  { %v317_v28 = vpop.permute.xlu1 %316  ;;  %v149_v29 = vpop.permute.xlu0 %148 }
  0x79   :  { %v252_v30 = vmax.f32 %v13468_v1, %v149_v29 }
  0x7a   :  { %446 = vrot.lane.b32.xlu1 %v13678_v22, %s13421_s28  ;;  %114 = vrot.lane.b32.xlu0 %v13702_v27, %s13420_s21 }
  0x7b   :  { %v420_v35 = vmax.f32 %v252_v30, %v317_v28 }
  0x7c   :  { %v483_v32 = vpop.permute.xlu1 %482  ;;  %v151_v33 = vpop.permute.xlu0 %150 }
  0x7d   :  { %v587_v34 = vmax.f32 %v419_v31, %v483_v32  ;;  %v253_v43 = vmax.f32 %v13477_v2, %v151_v33 }
  0x7e   :  { %282 = vrot.lane.b32.xlu1 %v13702_v27, %s13419_s20  ;;  %280 = vrot.lane.b32.xlu0 %v13692_v23, %s13419_s20 }
  0x7f   :  { %630 = vst.msk [vmem:[#allocation2 + $0xa8] sm:$0xff] %vm608_vm1, %v587_v34 }
  0x80   :  { %v485_v37 = vpop.permute.xlu1 %484  ;;  %v153_v38 = vpop.permute.xlu0 %152 }
  0x81   :  { %v588_v39 = vmax.f32 %v420_v35, %v485_v37  ;;  %v254_v48 = vmax.f32 %v13489_v4, %v153_v38  ;;  %v13781_v4 = vld [vmem:[%s16488_s0 + $0x50] sm:$0xff]  ;;  %v13815_v35 = vld [vmem:[%s16488_s0 + $0x60] sm:$0xff] }
  0x82   :  { %448 = vrot.lane.b32.xlu1 %v13692_v23, %s13421_s28  ;;  %116 = vrot.lane.b32.xlu0 %v13717_v36, %s13420_s21 }
  0x83   :  { %631 = vst.msk [vmem:[#allocation2 + $0xb0] sm:$0xff] %vm608_vm1, %v588_v39  ;;  %v13825_v39 = vld [vmem:[%s16488_s0 + $0x68] sm:$0xff] }
  0x84   :  { %v321_v41 = vpop.permute.xlu1 %320  ;;  %v319_v42 = vpop.permute.xlu0 %318 }
  0x85   :  { %v421_v45 = vmax.f32 %v253_v43, %v319_v42  ;;  %v422_v51 = vmax.f32 %v254_v48, %v321_v41  ;;  %v13830_v41 = vld [vmem:[%s16489_s1 + $0x4] sm:$0xf]  ;;  %v13835_v42 = vld [vmem:[%s16489_s1 + $0x8] sm:$0xf] }
  0x86   :  { %450 = vrot.lane.b32.xlu1 %v13702_v27, %s13421_s28  ;;  %118 = vrot.lane.b32.xlu0 %v13727_v40, %s13420_s21  ;;  %v2793_v44 = vld [vmem:[#allocation2 + $0xa8] sm:$0xff] }
  0x87   :  { %11708 = vmatprep.mubr.msk.f32.mxu1 %vm608_vm1, %v2793_v44  ;;  %11498 = vmatprep.subr.msk.mxu0 %vm728_vm0, %v13830_v41 }
  0x88   :  { %v487_v46 = vpop.permute.xlu1 %486  ;;  %v155_v47 = vpop.permute.xlu0 %154 }
  0x89   :  { %v589_v49 = vmax.f32 %v421_v45, %v487_v46  ;;  %v255_v59 = vmax.f32 %v13504_v5, %v155_v47 }
  0x8a   :  { %286 = vrot.lane.b32.xlu1 %v13727_v40, %s13419_s20  ;;  %284 = vrot.lane.b32.xlu0 %v13717_v36, %s13419_s20  ;;  %v2794_v50 = vld [vmem:[#allocation2 + $0xb0] sm:$0xff] }
  0x8b   :  { %632 = vst.msk [vmem:[#allocation2 + $0xb8] sm:$0xff] %vm608_vm1, %v589_v49  ;;  %11709 = vmatmul.mubr.msk.f32.vlgmr.msra.gmra.mrb[0].mxu1 %vm608_vm1, %v2794_v50 }
  0x8c   :  { %v489_v53 = vpop.permute.xlu1 %488  ;;  %v157_v54 = vpop.permute.xlu0 %156  ;;  %11733 = vmatpush3.msk.msra.mxu1 %vm728_vm0, %v13654_v19 }
  0x8d   :  { %v590_v55 = vmax.f32 %v422_v51, %v489_v53  ;;  %v256_v0 = vmax.f32 %v13513_v6, %v157_v54  ;;  %11758 = vmatprep.subr.msk.mxu1 %vm728_vm0, %v13835_v42  ;;  %v13863_v54 = vld [vmem:[%s16488_s0 + $0x70] sm:$0xff] }
  0x8e   :  { %452 = vrot.lane.b32.xlu1 %v13717_v36, %s13421_s28  ;;  %120 = vrot.lane.b32.xlu0 %v13745_v52, %s13420_s21 }
  0x8f   :  { %633 = vst.msk [vmem:[#allocation2 + $0xc0] sm:$0xff] %vm608_vm1, %v590_v55 }
  0x90   :  { %v325_v57 = vpop.permute.xlu1 %324  ;;  %v323_v58 = vpop.permute.xlu0 %322 }
  0x91   :  { %v423_v61 = vmax.f32 %v255_v59, %v323_v58  ;;  %v424_v3 = vmax.f32 %v256_v0, %v325_v57  ;;  %v13873_v58 = vld [vmem:[%s16488_s0 + $0x78] sm:$0xff] }
  0x92   :  { %454 = vrot.lane.b32.xlu1 %v13727_v40, %s13421_s28  ;;  %122 = vrot.lane.b32.xlu0 %v13757_v56, %s13420_s21  ;;  %v13764_v60 = vld [vmem:[#allocation2 + $0xb8] sm:$0xff] }
  0x93   :  { %11711 = vmatprep.mubr.msk.f32.mxu1 %vm608_vm1, %v13764_v60 }
  0x94   :  { %v491_v62 = vpop.permute.xlu1 %490  ;;  %v159_v63 = vpop.permute.xlu0 %158 }
  0x95   :  { %v591_v1 = vmax.f32 %v423_v61, %v491_v62  ;;  %v257_v26 = vmax.f32 %v13526_v7, %v159_v63 }
  0x96   :  { %290 = vrot.lane.b32.xlu1 %v13757_v56, %s13419_s20  ;;  %288 = vrot.lane.b32.xlu0 %v13745_v52, %s13419_s20  ;;  %v13773_v2 = vld [vmem:[#allocation2 + $0xc0] sm:$0xff] }
  0x97   :  { %634 = vst.msk [vmem:[#allocation2 + $0xc8] sm:$0xff] %vm608_vm1, %v591_v1  ;;  %11712 = vmatmul.mubr.msk.f32.gmra.mrb[2].mxu1 %vm608_vm1, %v13773_v2  ;;  %v13887_v1 = vld [vmem:[%s16488_s0 + $0x128] sm:$0xff] }
  0x98   :  { %v493_v5 = vpop.permute.xlu1 %492  ;;  %v161_v6 = vpop.permute.xlu0 %160 }
  0x99   :  { %v592_v19 = vmax.f32 %v424_v3, %v493_v5  ;;  %v258_v32 = vmax.f32 %v13535_v8, %v161_v6 }
  0x9a   :  { %456 = vrot.lane.b32.xlu1 %v13745_v52, %s13421_s28  ;;  %124 = vrot.lane.b32.xlu0 %v13781_v4, %s13420_s21 }
  0x9b   :  { %635 = vst.msk [vmem:[#allocation2 + $0xd0] sm:$0xff] %vm608_vm1, %v592_v19 }
  0x9c   :  { %v329_v24 = vpop.permute.xlu1 %328  ;;  %v327_v25 = vpop.permute.xlu0 %326 }
  0x9d   :  { %v425_v29 = vmax.f32 %v257_v26, %v327_v25  ;;  %v426_v34 = vmax.f32 %v258_v32, %v329_v24 }
  0x9e   :  { %458 = vrot.lane.b32.xlu1 %v13757_v56, %s13421_s28  ;;  %126 = vrot.lane.b32.xlu0 %v13791_v21, %s13420_s21  ;;  %v13798_v28 = vld [vmem:[#allocation2 + $0xc8] sm:$0xff] }
  0x9f   :  { %11714 = vmatprep.mubr.msk.f32.mxu1 %vm608_vm1, %v13798_v28 }
  0xa0   :  { %v495_v30 = vpop.permute.xlu1 %494  ;;  %v163_v31 = vpop.permute.xlu0 %162 }
  0xa1   :  { %v593_v33 = vmax.f32 %v425_v29, %v495_v30  ;;  %v259_v45 = vmax.f32 %v13548_v9, %v163_v31 }
  0xa2   :  { %294 = vrot.lane.b32.xlu1 %v13791_v21, %s13419_s20  ;;  %292 = vrot.lane.b32.xlu0 %v13781_v4, %s13419_s20  ;;  %v13807_v7 = vld [vmem:[#allocation2 + $0xd0] sm:$0xff] }
  0xa3   :  { %636 = vst.msk [vmem:[#allocation2 + $0xd8] sm:$0xff] %vm608_vm1, %v593_v33  ;;  %11715 = vmatmul.mubr.msk.f32.gmra.mrb[4].mxu1 %vm608_vm1, %v13807_v7 }
  0xa4   :  { %v497_v8 = vpop.permute.xlu1 %496  ;;  %v165_v37 = vpop.permute.xlu0 %164 }
  0xa5   :  { %v594_v38 = vmax.f32 %v426_v34, %v497_v8  ;;  %v260_v50 = vmax.f32 %v13557_v10, %v165_v37  ;;  %v13916_v34 = vld [vmem:[%s16488_s0 + $0x80] sm:$0xff] }
  0xa6   :  { %460 = vrot.lane.b32.xlu1 %v13781_v4, %s13421_s28  ;;  %128 = vrot.lane.b32.xlu0 %v13815_v35, %s13420_s21 }
  0xa7   :  { %637 = vst.msk [vmem:[#allocation2 + $0xe0] sm:$0xff] %vm608_vm1, %v594_v38 }
  0xa8   :  { %v333_v43 = vpop.permute.xlu1 %332  ;;  %v331_v44 = vpop.permute.xlu0 %330 }
  0xa9   :  { %v427_v47 = vmax.f32 %v259_v45, %v331_v44  ;;  %v428_v53 = vmax.f32 %v260_v50, %v333_v43 }
  0xaa   :  { %462 = vrot.lane.b32.xlu1 %v13791_v21, %s13421_s28  ;;  %130 = vrot.lane.b32.xlu0 %v13825_v39, %s13420_s21  ;;  %v13846_v46 = vld [vmem:[#allocation2 + $0xd8] sm:$0xff] }
  0xab   :  { %11717 = vmatprep.mubr.msk.f32.mxu1 %vm608_vm1, %v13846_v46 }
  0xac   :  { %v499_v48 = vpop.permute.xlu1 %498  ;;  %v167_v49 = vpop.permute.xlu0 %166 }
  0xad   :  { %v595_v51 = vmax.f32 %v427_v47, %v499_v48  ;;  %v261_v62 = vmax.f32 %v13570_v11, %v167_v49 }
  0xae   :  { %298 = vrot.lane.b32.xlu1 %v13825_v39, %s13419_s20  ;;  %296 = vrot.lane.b32.xlu0 %v13815_v35, %s13419_s20  ;;  %v13855_v9 = vld [vmem:[#allocation2 + $0xe0] sm:$0xff] }
  0xaf   :  { %638 = vst.msk [vmem:[#allocation2 + $0xe8] sm:$0xff] %vm608_vm1, %v595_v51  ;;  %11718 = vmatmul.mubr.msk.f32.gmra.mrb[6].mxu1 %vm608_vm1, %v13855_v9 }
  0xb0   :  { %v501_v10 = vpop.permute.xlu1 %500  ;;  %v169_v55 = vpop.permute.xlu0 %168 }
  0xb1   :  { %v596_v57 = vmax.f32 %v428_v53, %v501_v10  ;;  %v262_v11 = vmax.f32 %v13579_v12, %v169_v55  ;;  %v13949_v53 = vld [vmem:[%s16488_s0 + $0x88] sm:$0xff] }
  0xb2   :  { %464 = vrot.lane.b32.xlu1 %v13815_v35, %s13421_s28  ;;  %132 = vrot.lane.b32.xlu0 %v13863_v54, %s13420_s21 }
  0xb3   :  { %639 = vst.msk [vmem:[#allocation2 + $0xf0] sm:$0xff] %vm608_vm1, %v596_v57 }
  0xb4   :  { %v337_v59 = vpop.permute.xlu1 %336  ;;  %v335_v61 = vpop.permute.xlu0 %334 }
  0xb5   :  { %v429_v0 = vmax.f32 %v261_v62, %v335_v61  ;;  %v430_v24 = vmax.f32 %v262_v11, %v337_v59  ;;  %v13963_v62 = vld [vmem:[%s16488_s0 + $0x138] sm:$0xff] }
  0xb6   :  { %466 = vrot.lane.b32.xlu1 %v13825_v39, %s13421_s28  ;;  %134 = vrot.lane.b32.xlu0 %v13873_v58, %s13420_s21  ;;  %v13880_v63 = vld [vmem:[#allocation2 + $0xe8] sm:$0xff] }
  0xb7   :  { %11720 = vmatprep.mubr.msk.f32.mxu1 %vm608_vm1, %v13880_v63 }
  0xb8   :  { %v503_v3 = vpop.permute.xlu1 %502  ;;  %v171_v5 = vpop.permute.xlu0 %170 }
  0xb9   :  { %v597_v6 = vmax.f32 %v429_v0, %v503_v3  ;;  %v263_v31 = vmax.f32 %v13592_v13, %v171_v5 }
  0xba   :  { %178 = vrot.lane.b32.xlu1 %v13887_v1, %s13420_s21  ;;  %300 = vrot.lane.b32.xlu0 %v13863_v54, %s13419_s20  ;;  %v13894_v19 = vld [vmem:[#allocation2 + $0xf0] sm:$0xff] }
  0xbb   :  { %640 = vst.msk [vmem:[#allocation2 + $0xf8] sm:$0xff] %vm608_vm1, %v597_v6  ;;  %11721 = vmatmul.mubr.msk.f32.gmra.mrb[8].mxu1 %vm608_vm1, %v13894_v19 }
  0xbc   :  { %v505_v25 = vpop.permute.xlu1 %504  ;;  %v173_v26 = vpop.permute.xlu0 %172 }
  0xbd   :  { %v598_v29 = vmax.f32 %v430_v24, %v505_v25  ;;  %v264_v13 = vmax.f32 %v13601_v14, %v173_v26  ;;  %v13936_v14 = vld [vmem:[%s16488_s0 + $0x130] sm:$0xff] }
  0xbe   :  { %468 = vrot.lane.b32.xlu1 %v13863_v54, %s13421_s28  ;;  %302 = vrot.lane.b32.xlu0 %v13873_v58, %s13419_s20 }
  0xbf   :  { %641 = vst.msk [vmem:[#allocation2 + $0x100] sm:$0xff] %vm608_vm1, %v598_v29  ;;  %v13980_v29 = vld [vmem:[%s16488_s0 + $0x90] sm:$0xff] }
  0xc0   :  { %v341_v12 = vpop.permute.xlu1 %340  ;;  %v339_v30 = vpop.permute.xlu0 %338 }
  0xc1   :  { %v431_v33 = vmax.f32 %v263_v31, %v339_v30  ;;  %v432_v44 = vmax.f32 %v264_v13, %v341_v12 }
  0xc2   :  { %470 = vrot.lane.b32.xlu1 %v13873_v58, %s13421_s28  ;;  %346 = vrot.lane.b32.xlu0 %v13887_v1, %s13419_s20  ;;  %v13909_v32 = vld [vmem:[#allocation2 + $0xf8] sm:$0xff] }
  0xc3   :  { %11723 = vmatprep.mubr.msk.f32.mxu1 %vm608_vm1, %v13909_v32 }
  0xc4   :  { %v507_v8 = vpop.permute.xlu1 %506  ;;  %v175_v37 = vpop.permute.xlu0 %174 }
  0xc5   :  { %v599_v38 = vmax.f32 %v431_v33, %v507_v8  ;;  %v265_v57 = vmax.f32 %v13614_v15, %v175_v37 }
  0xc6   :  { %514 = vrot.lane.b32.xlu0 %v13887_v1, %s13421_s28  ;;  %v13921_v43 = vld [vmem:[#allocation2 + $0x100] sm:$0xff]  ;;  %136 = vrot.lane.b32.xlu1 %v13916_v34, %s13420_s21 }
  0xc7   :  { %642 = vst.msk [vmem:[#allocation2 + $0x108] sm:$0xff] %vm608_vm1, %v599_v38  ;;  %11724 = vmatmul.mubr.msk.f32.gmra.mrb[10].mxu1 %vm608_vm1, %v13921_v43 }
  0xc8   :  { %v509_v45 = vpop.permute.xlu1 %508  ;;  %v177_v47 = vpop.permute.xlu0 %176 }
  0xc9   :  { %v600_v48 = vmax.f32 %v432_v44, %v509_v45  ;;  %v266_v15 = vmax.f32 %v13623_v16, %v177_v47  ;;  %v14004_v45 = vld [vmem:[%s16488_s0 + $0x140] sm:$0xff] }
  0xca   :  { %304 = vrot.lane.b32.xlu0 %v13916_v34, %s13419_s20  ;;  %472 = vrot.lane.b32.xlu1 %v13916_v34, %s13421_s28 }
  0xcb   :  { %643 = vst.msk [vmem:[#allocation2 + $0x110] sm:$0xff] %vm608_vm1, %v600_v48 }
  0xcc   :  { %v343_v49 = vpop.permute.xlu1 %342  ;;  %v105_v50 = vpop.permute.xlu0 %104 }
  0xcd   :  { %v433_v61 = vmax.f32 %v265_v57, %v343_v49  ;;  %v230_v25 = vmax.f32 %v13632_v17, %v105_v50 }
  0xce   :  { %180 = vrot.lane.b32.xlu0 %v13936_v14, %s13420_s21  ;;  %v13940_v51 = vld [vmem:[#allocation2 + $0x108] sm:$0xff]  ;;  %348 = vrot.lane.b32.xlu1 %v13936_v14, %s13419_s20 }
  0xcf   :  { %11726 = vmatprep.mubr.msk.f32.mxu1 %vm608_vm1, %v13940_v51 }
  0xd0   :  { %v345_v10 = vpop.permute.xlu1 %344  ;;  %v107_v55 = vpop.permute.xlu0 %106 }
  0xd1   :  { %v434_v11 = vmax.f32 %v266_v15, %v345_v10  ;;  %v231_v31 = vmax.f32 %v13641_v18, %v107_v55  ;;  %v3022_v18 = vld [vmem:[#allocation2 + $0xa9] sm:$0xff]  ;;  %v3023_v10 = vld [vmem:[#allocation2 + $0xb1] sm:$0xff] }
  0xd2   :  { %516 = vrot.lane.b32.xlu0 %v13936_v14, %s13421_s28  ;;  %v13954_v59 = vld [vmem:[#allocation2 + $0x110] sm:$0xff]  ;;  %138 = vrot.lane.b32.xlu1 %v13949_v53, %s13420_s21  ;;  %v14015_v55 = vld [vmem:[%s16489_s1 + $0xc] sm:$0xf] }
  0xd3   :  { %11727 = vmatmul.mubr.msk.f32.gmra.mrb[12].mxu1 %vm608_vm1, %v13954_v59 }
  0xd4   :  { %v511_v0 = vpop.permute.xlu1 %510  ;;  %v273_v3 = vpop.permute.xlu0 %272 }
  0xd5   :  { %v601_v5 = vmax.f32 %v433_v61, %v511_v0  ;;  %v398_v16 = vmax.f32 %v230_v25, %v273_v3  ;;  %v14019_v61 = vld [vmem:[#allocation2 + $0xb9] sm:$0xff]  ;;  %v14053_v25 = vld [vmem:[%s16488_s0 + $0x148] sm:$0xff] }
  0xd6   :  { %306 = vrot.lane.b32.xlu1 %v13949_v53, %s13419_s20  ;;  %182 = vrot.lane.b32.xlu0 %v13963_v62, %s13420_s21 }
  0xd7   :  { %644 = vst.msk [vmem:[#allocation2 + $0x118] sm:$0xff] %vm608_vm1, %v601_v5 }
  0xd8   :  { %v513_v6 = vpop.permute.xlu1 %512  ;;  %v275_v24 = vpop.permute.xlu0 %274 }
  0xd9   :  { %v602_v26 = vmax.f32 %v434_v11, %v513_v6  ;;  %v399_v8 = vmax.f32 %v231_v31, %v275_v24  ;;  %v14033_v6 = vld [vmem:[#allocation2 + $0xc1] sm:$0xff]  ;;  %v14070_v31 = vld [vmem:[#allocation2 + $0xd9] sm:$0xff] }
  0xda   :  { %474 = vrot.lane.b32.xlu1 %v13949_v53, %s13421_s28  ;;  %350 = vrot.lane.b32.xlu0 %v13963_v62, %s13419_s20  ;;  %v14042_v24 = vld [vmem:[%s16489_s1 + $0x8] sm:$0xf] }
  0xdb   :  { %645 = vst.msk [vmem:[#allocation2 + $0x120] sm:$0xff] %vm608_vm1, %v602_v26 }
  0xdc   :  { %v441_v12 = vpop.permute.xlu1 %440  ;;  %v109_v30 = vpop.permute.xlu0 %108 }
  0xdd   :  { %v566_v17 = vmax.f32 %v398_v16, %v441_v12  ;;  %v232_v49 = vmax.f32 %v13665_v20, %v109_v30  ;;  %v14024_v20 = vld [vmem:[%s16488_s0 + $0x98] sm:$0xff] }
  0xde   :  { %v13983_v33 = vld [vmem:[#allocation2 + $0x118] sm:$0xff]  ;;  %518 = vrot.lane.b32.xlu0 %v13963_v62, %s13421_s28  ;;  %140 = vrot.lane.b32.xlu1 %v13980_v29, %s13420_s21 }
  0xdf   :  { %609 = vst.msk [vmem:[#allocation2] sm:$0xff] %vm608_vm1, %v566_v17  ;;  %11729 = vmatprep.mubr.msk.f32.mxu1 %vm608_vm1, %v13983_v33  ;;  %v14061_v30 = vld [vmem:[#allocation2 + $0xd1] sm:$0xff] }
  0xe0   :  { %v443_v37 = vpop.permute.xlu1 %442  ;;  %v111_v13 = vpop.permute.xlu0 %110 }
  0xe1   :  { %v567_v38 = vmax.f32 %v399_v8, %v443_v37  ;;  %v233_v15 = vmax.f32 %v13678_v22, %v111_v13  ;;  %v14048_v22 = vld [vmem:[#allocation2 + $0xc9] sm:$0xff]  ;;  %v14077_v13 = vld [vmem:[#allocation2 + $0xe1] sm:$0xff] }
  0xe2   :  { %v13992_v44 = vld [vmem:[#allocation2 + $0x120] sm:$0xff]  ;;  %308 = vrot.lane.b32.xlu0 %v13980_v29, %s13419_s20  ;;  %476 = vrot.lane.b32.xlu1 %v13980_v29, %s13421_s28 }
  0xe3   :  { %610 = vst.msk [vmem:[#allocation2 + $0x8] sm:$0xff] %vm608_vm1, %v567_v38  ;;  %11730 = vmatmul.mubr.msk.f32.gmra.mrb[14].mxu1 %vm608_vm1, %v13992_v44 }
  0xe4   :  { %11734 = vmatprep.mubr.msk.f32.mxu1 %vm608_vm1, %v3022_v18  ;;  %v279_v47 = vpop.permute.xlu1 %278  ;;  %v277_v48 = vpop.permute.xlu0 %276  ;;  %v14087_v18 = vld [vmem:[#allocation2 + $0xe9] sm:$0xff] }
  0xe5   :  { %v400_v57 = vmax.f32 %v232_v49, %v277_v48 }
  0xe6   :  { %v663_v50 = vld [vmem:[#allocation2] sm:$0xff]  ;;  %184 = vrot.lane.b32.xlu0 %v14004_v45, %s13420_s21  ;;  %352 = vrot.lane.b32.xlu1 %v14004_v45, %s13419_s20 }
  0xe7   :  { %11474 = vmatprep.mubr.msk.f32.mxu0 %vm608_vm1, %v663_v50  ;;  %11735 = vmatmul.mubr.msk.f32.vlgmr.msra.gmra.mrb[0].mxu1 %vm608_vm1, %v3023_v10  ;;  %v14094_v10 = vld [vmem:[#allocation2 + $0xf1] sm:$0xff] }
  0xe8   :  { %11737 = vmatprep.mubr.msk.f32.mxu1 %vm608_vm1, %v14019_v61  ;;  %v445_v0 = vpop.permute.xlu1 %444  ;;  %v113_v3 = vpop.permute.xlu0 %112  ;;  %11759 = vmatpush3.msk.msra.mxu1 %vm728_vm0, %v13835_v42  ;;  %v401_v42 = vmax.f32 %v233_v15, %v279_v47 }
  0xe9   :  { %v568_v5 = vmax.f32 %v400_v57, %v445_v0  ;;  %11784 = vmatprep.subr.msk.mxu1 %vm728_vm0, %v14015_v55  ;;  %v234_v8 = vmax.f32 %v13692_v23, %v113_v3  ;;  %v14103_v0 = vld [vmem:[#allocation2 + $0xf9] sm:$0xff] }
  0xea   :  { %v664_v11 = vld [vmem:[#allocation2 + $0x8] sm:$0xff]  ;;  %520 = vrot.lane.b32.xlu0 %v14004_v45, %s13421_s28  ;;  %142 = vrot.lane.b32.xlu1 %v14024_v20, %s13420_s21 }
  0xeb   :  { %611 = vst.msk [vmem:[#allocation2 + $0x10] sm:$0xff] %vm608_vm1, %v568_v5  ;;  %11475 = vmatmul.mubr.msk.f32.vlgmr.msra.gmra.mrb[0].mxu0 %vm608_vm1, %v664_v11  ;;  %11738 = vmatmul.mubr.msk.f32.gmra.mrb[2].mxu1 %vm608_vm1, %v14033_v6  ;;  %v14107_v5 = vld [vmem:[#allocation2 + $0x101] sm:$0xff]  ;;  %v14112_v11 = vld [vmem:[#allocation2 + $0x109] sm:$0xff] }
  0xec   :  { %11740 = vmatprep.mubr.msk.f32.mxu1 %vm608_vm1, %v14048_v22  ;;  %v447_v26 = vpop.permute.xlu1 %446  ;;  %v115_v16 = vpop.permute.xlu0 %114  ;;  %11499 = vmatpush3.msk.msra.mxu0 %vm728_vm0, %v13830_v41  ;;  %16592 = vst [vmem:[#allocation4_spill] sm:$0xff] %v14112_v11 }
  0xed   :  { %v569_v12 = vmax.f32 %v401_v42, %v447_v26  ;;  %11524 = vmatprep.subr.msk.mxu0 %vm728_vm0, %v14042_v24  ;;  %v235_v48 = vmax.f32 %v13702_v27, %v115_v16  ;;  %v14117_v42 = vld [vmem:[%s16488_s0 + $0xa0] sm:$0xff] }
  0xee   :  { %310 = vrot.lane.b32.xlu1 %v14024_v20, %s13419_s20  ;;  %186 = vrot.lane.b32.xlu0 %v14053_v25, %s13420_s21 }
  0xef   :  { %612 = vst.msk [vmem:[#allocation2 + $0x18] sm:$0xff] %vm608_vm1, %v569_v12  ;;  %11741 = vmatmul.mubr.msk.f32.gmra.mrb[4].mxu1 %vm608_vm1, %v14061_v30 }
  0xf0   :  { %11743 = vmatprep.mubr.msk.f32.mxu1 %vm608_vm1, %v14070_v31  ;;  %v283_v41 = vpop.permute.xlu1 %282  ;;  %v281_v17 = vpop.permute.xlu0 %280 }
  0xf1   :  { %v402_v38 = vmax.f32 %v234_v8, %v281_v17  ;;  %v403_v57 = vmax.f32 %v235_v48, %v283_v41  ;;  %v14128_v17 = vld [vmem:[#allocation2 + $0x111] sm:$0xff] }
  0xf2   :  { %v14075_v37 = vld [vmem:[#allocation2 + $0x10] sm:$0xff]  ;;  %478 = vrot.lane.b32.xlu1 %v14024_v20, %s13421_s28  ;;  %354 = vrot.lane.b32.xlu0 %v14053_v25, %s13419_s20  ;;  %16593 = vst [vmem:[#allocation5_spill] sm:$0xff] %v14128_v17 }
  0xf3   :  { %11477 = vmatprep.mubr.msk.f32.mxu0 %vm608_vm1, %v14075_v37  ;;  %11744 = vmatmul.mubr.msk.f32.gmra.mrb[6].mxu1 %vm608_vm1, %v14077_v13 }
  0xf4   :  { %11746 = vmatprep.mubr.msk.f32.mxu1 %vm608_vm1, %v14087_v18  ;;  %v449_v23 = vpop.permute.xlu1 %448  ;;  %v117_v47 = vpop.permute.xlu0 %116 }
  0xf5   :  { %v570_v49 = vmax.f32 %v402_v38, %v449_v23  ;;  %v236_v12 = vmax.f32 %v13717_v36, %v117_v47  ;;  %v14134_v38 = vld [vmem:[#allocation2 + $0x119] sm:$0xff] }
  0xf6   :  { %v14092_v50 = vld [vmem:[#allocation2 + $0x18] sm:$0xff]  ;;  %522 = vrot.lane.b32.xlu0 %v14053_v25, %s13421_s28  ;;  %144 = vrot.lane.b32.xlu1 %v14117_v42, %s13420_s21  ;;  %16594 = vst [vmem:[#allocation6_spill] sm:$0xff] %v14134_v38 }
  0xf7   :  { %613 = vst.msk [vmem:[#allocation2 + $0x20] sm:$0xff] %vm608_vm1, %v570_v49  ;;  %11478 = vmatmul.mubr.msk.f32.gmra.mrb[2].mxu0 %vm608_vm1, %v14092_v50  ;;  %11747 = vmatmul.mubr.msk.f32.gmra.mrb[8].mxu1 %vm608_vm1, %v14094_v10 }
  0xf8   :  { %11749 = vmatprep.mubr.msk.f32.mxu1 %vm608_vm1, %v14103_v0  ;;  %v451_v27 = vpop.permute.xlu1 %450  ;;  %v119_v3 = vpop.permute.xlu0 %118 }
  0xf9   :  { %v571_v15 = vmax.f32 %v403_v57, %v451_v27  ;;  %v237_v47 = vmax.f32 %v13727_v40, %v119_v3 }
  0xfa   :  { %312 = vrot.lane.b32.xlu0 %v14117_v42, %s13419_s20  ;;  %480 = vrot.lane.b32.xlu1 %v14117_v42, %s13421_s28 }
  0xfb   :  { %614 = vst.msk [vmem:[#allocation2 + $0x28] sm:$0xff] %vm608_vm1, %v571_v15  ;;  %11750 = vmatmul.mubr.msk.f32.gmra.mrb[10].mxu1 %vm608_vm1, %v14107_v5 }
  0xfc   :  { %11752 = vmatprep.mubr.msk.f32.mxu1 %vm608_vm1, %v14112_v11  ;;  %v287_v26 = vpop.permute.xlu1 %286  ;;  %v285_v16 = vpop.permute.xlu0 %284 }
  0xfd   :  { %v404_v8 = vmax.f32 %v236_v12, %v285_v16  ;;  %v405_v57 = vmax.f32 %v237_v47, %v287_v26 }
  0xfe   :  { %v14126_v41 = vld [vmem:[#allocation2 + $0x20] sm:$0xff] }
  0xff   :  { %11480 = vmatprep.mubr.msk.f32.mxu0 %vm608_vm1, %v14126_v41  ;;  %11753 = vmatmul.mubr.msk.f32.gmra.mrb[12].mxu1 %vm608_vm1, %v14128_v17 }
 0x100   :  { %11755 = vmatprep.mubr.msk.f32.mxu1 %vm608_vm1, %v14134_v38  ;;  %v453_v36 = vpop.permute.xlu1 %452  ;;  %v121_v23 = vpop.permute.xlu0 %120 }
 0x101   :  { %v572_v48 = vmax.f32 %v404_v8, %v453_v36  ;;  %v238_v17 = vmax.f32 %v13745_v52, %v121_v23 }
 0x102   :  { %v14141_v49 = vld [vmem:[#allocation2 + $0x28] sm:$0xff] }
 0x103   :  { %615 = vst.msk [vmem:[#allocation2 + $0x30] sm:$0xff] %vm608_vm1, %v572_v48  ;;  %11481 = vmatmul.mubr.msk.f32.gmra.mrb[4].mxu0 %vm608_vm1, %v14141_v49 }
 0x104   :  { %v455_v27 = vpop.permute.xlu1 %454  ;;  %v123_v15 = vpop.permute.xlu0 %122 }
 0x105   :  { %v573_v16 = vmax.f32 %v405_v57, %v455_v27  ;;  %v239_v8 = vmax.f32 %v13757_v56, %v123_v15 }
 0x107   :  { %616 = vst.msk [vmem:[#allocation2 + $0x38] sm:$0xff] %vm608_vm1, %v573_v16 }
 0x108   :  { %v291_v12 = vpop.permute.xlu1 %290  ;;  %v289_v38 = vpop.permute.xlu0 %288 }
 0x109   :  { %v406_v40 = vmax.f32 %v238_v17, %v289_v38  ;;  %v407_v48 = vmax.f32 %v239_v8, %v291_v12 }
 0x10a   :  { %v14148_v11 = vld [vmem:[#allocation2 + $0x30] sm:$0xff] }
 0x10b   :  { %11483 = vmatprep.mubr.msk.f32.mxu0 %vm608_vm1, %v14148_v11 }
 0x10c   :  { %v457_v3 = vpop.permute.xlu1 %456  ;;  %v125_v26 = vpop.permute.xlu0 %124 }
 0x10d   :  { %v574_v36 = vmax.f32 %v406_v40, %v457_v3  ;;  %v240_v27 = vmax.f32 %v13781_v4, %v125_v26 }
 0x10e   :  { %v14153_v47 = vld [vmem:[#allocation2 + $0x38] sm:$0xff] }
 0x10f   :  { %617 = vst.msk [vmem:[#allocation2 + $0x40] sm:$0xff] %vm608_vm1, %v574_v36  ;;  %11484 = vmatmul.mubr.msk.f32.gmra.mrb[6].mxu0 %vm608_vm1, %v14153_v47 }
 0x110   :  { %v459_v52 = vpop.permute.xlu1 %458  ;;  %v127_v23 = vpop.permute.xlu0 %126 }
 0x111   :  { %v575_v57 = vmax.f32 %v407_v48, %v459_v52  ;;  %v241_v40 = vmax.f32 %v13791_v21, %v127_v23 }
 0x113   :  { %618 = vst.msk [vmem:[#allocation2 + $0x48] sm:$0xff] %vm608_vm1, %v575_v57 }
 0x114   :  { %v295_v17 = vpop.permute.xlu1 %294  ;;  %v293_v38 = vpop.permute.xlu0 %292 }
 0x115   :  { %v408_v56 = vmax.f32 %v240_v27, %v293_v38  ;;  %v409_v36 = vmax.f32 %v241_v40, %v295_v17 }
 0x116   :  { %v14160_v16 = vld [vmem:[#allocation2 + $0x40] sm:$0xff] }
 0x117   :  { %11486 = vmatprep.mubr.msk.f32.mxu0 %vm608_vm1, %v14160_v16 }
 0x118   :  { %v461_v15 = vpop.permute.xlu1 %460  ;;  %v129_v12 = vpop.permute.xlu0 %128 }
 0x119   :  { %v576_v3 = vmax.f32 %v408_v56, %v461_v15  ;;  %v242_v38 = vmax.f32 %v13815_v35, %v129_v12 }
 0x11a   :  { %v14165_v8 = vld [vmem:[#allocation2 + $0x48] sm:$0xff] }
 0x11b   :  { %619 = vst.msk [vmem:[#allocation2 + $0x50] sm:$0xff] %vm608_vm1, %v576_v3  ;;  %11487 = vmatmul.mubr.msk.f32.gmra.mrb[8].mxu0 %vm608_vm1, %v14165_v8 }
 0x11c   :  { %v463_v4 = vpop.permute.xlu1 %462  ;;  %v131_v26 = vpop.permute.xlu0 %130 }
 0x11d   :  { %v577_v48 = vmax.f32 %v409_v36, %v463_v4  ;;  %v243_v56 = vmax.f32 %v13825_v39, %v131_v26 }
 0x11f   :  { %620 = vst.msk [vmem:[#allocation2 + $0x58] sm:$0xff] %vm608_vm1, %v577_v48 }
 0x120   :  { %v299_v52 = vpop.permute.xlu1 %298  ;;  %v297_v57 = vpop.permute.xlu0 %296 }
 0x121   :  { %v410_v21 = vmax.f32 %v242_v38, %v297_v57  ;;  %v411_v3 = vmax.f32 %v243_v56, %v299_v52 }
 0x122   :  { %v14172_v27 = vld [vmem:[#allocation2 + $0x50] sm:$0xff] }
 0x123   :  { %11489 = vmatprep.mubr.msk.f32.mxu0 %vm608_vm1, %v14172_v27 }
 0x124   :  { %v465_v23 = vpop.permute.xlu1 %464  ;;  %v133_v17 = vpop.permute.xlu0 %132 }
 0x125   :  { %v578_v15 = vmax.f32 %v410_v21, %v465_v23  ;;  %v244_v57 = vmax.f32 %v13863_v54, %v133_v17 }
 0x126   :  { %v14177_v40 = vld [vmem:[#allocation2 + $0x58] sm:$0xff] }
 0x127   :  { %621 = vst.msk [vmem:[#allocation2 + $0x60] sm:$0xff] %vm608_vm1, %v578_v15  ;;  %11490 = vmatmul.mubr.msk.f32.gmra.mrb[10].mxu0 %vm608_vm1, %v14177_v40 }
 0x128   :  { %v467_v35 = vpop.permute.xlu1 %466  ;;  %v135_v12 = vpop.permute.xlu0 %134 }
 0x129   :  { %v579_v36 = vmax.f32 %v411_v3, %v467_v35  ;;  %v245_v21 = vmax.f32 %v13873_v58, %v135_v12 }
 0x12b   :  { %622 = vst.msk [vmem:[#allocation2 + $0x68] sm:$0xff] %vm608_vm1, %v579_v36 }
 0x12c   :  { %v179_v4 = vpop.permute.xlu1 %178  ;;  %v301_v48 = vpop.permute.xlu0 %300 }
 0x12d   :  { %v412_v39 = vmax.f32 %v244_v57, %v301_v48  ;;  %v267_v3 = vmax.f32 %v13887_v1, %v179_v4 }
 0x12e   :  { %v14184_v38 = vld [vmem:[#allocation2 + $0x60] sm:$0xff] }
 0x12f   :  { %11492 = vmatprep.mubr.msk.f32.mxu0 %vm608_vm1, %v14184_v38 }
 0x130   :  { %v469_v26 = vpop.permute.xlu1 %468  ;;  %v303_v52 = vpop.permute.xlu0 %302 }
 0x131   :  { %v580_v23 = vmax.f32 %v412_v39, %v469_v26  ;;  %v413_v15 = vmax.f32 %v245_v21, %v303_v52 }
 0x132   :  { %v14189_v56 = vld [vmem:[#allocation2 + $0x68] sm:$0xff] }
 0x133   :  { %623 = vst.msk [vmem:[#allocation2 + $0x70] sm:$0xff] %vm608_vm1, %v580_v23  ;;  %11493 = vmatmul.mubr.msk.f32.gmra.mrb[12].mxu0 %vm608_vm1, %v14189_v56  ;;  %v893_v23 = vld [vmem:[#allocation2 + $0x1] sm:$0xff] }
 0x134   :  { %v471_v54 = vpop.permute.xlu1 %470  ;;  %v347_v17 = vpop.permute.xlu0 %346 }
 0x135   :  { %v581_v35 = vmax.f32 %v413_v15, %v471_v54  ;;  %v435_v36 = vmax.f32 %v267_v3, %v347_v17  ;;  %v894_v17 = vld [vmem:[#allocation2 + $0x9] sm:$0xff] }
 0x137   :  { %624 = vst.msk [vmem:[#allocation2 + $0x78] sm:$0xff] %vm608_vm1, %v581_v35 }
 0x138   :  { %v515_v48 = vpop.permute.xlu0 %514  ;;  %v137_v57 = vpop.permute.xlu1 %136 }
 0x139   :  { %v603_v58 = vmax.f32 %v435_v36, %v515_v48  ;;  %v246_v12 = vmax.f32 %v13916_v34, %v137_v57  ;;  %v14214_v36 = vld [vmem:[#allocation2 + $0x11] sm:$0xff]  ;;  %v14219_v57 = vld [vmem:[%s16489_s1 + $0xc] sm:$0xf] }
 0x13a   :  { %v14197_v39 = vld [vmem:[#allocation2 + $0x70] sm:$0xff] }
 0x13b   :  { %646 = vst.msk [vmem:[#allocation2 + $0x128] sm:$0xff] %vm608_vm1, %v603_v58  ;;  %11495 = vmatprep.mubr.msk.f32.mxu0 %vm608_vm1, %v14197_v39  ;;  %v3251_v48 = vld [vmem:[#allocation2 + $0xaa] sm:$0xff] }
 0x13c   :  { %v305_v26 = vpop.permute.xlu0 %304  ;;  %v473_v52 = vpop.permute.xlu1 %472 }
 0x13d   :  { %v414_v21 = vmax.f32 %v246_v12, %v305_v26 }
 0x13e   :  { %v14202_v1 = vld [vmem:[#allocation2 + $0x78] sm:$0xff] }
 0x13f   :  { %v582_v4 = vmax.f32 %v414_v21, %v473_v52  ;;  %11496 = vmatmul.mubr.msk.f32.gmra.mrb[14].mxu0 %vm608_vm1, %v14202_v1  ;;  %v14227_v52 = vld [vmem:[#allocation2 + $0x19] sm:$0xff] }
 0x140   :  { %11500 = vmatprep.mubr.msk.f32.mxu0 %vm608_vm1, %v893_v23  ;;  %v181_v34 = vpop.permute.xlu0 %180  ;;  %v349_v15 = vpop.permute.xlu1 %348  ;;  %v3252_v21 = vld [vmem:[#allocation2 + $0xb2] sm:$0xff]  ;;  %v14237_v23 = vld [vmem:[#allocation2 + $0xba] sm:$0xff] }
 0x141   :  { %625 = vst.msk [vmem:[#allocation2 + $0x80] sm:$0xff] %vm608_vm1, %v582_v4  ;;  %v268_v54 = vmax.f32 %v13936_v14, %v181_v34  ;;  %v14235_v4 = vld [vmem:[#allocation2 + $0x21] sm:$0xff] }
 0x142   :  { %v14209_v3 = vld [vmem:[#allocation2 + $0x121] sm:$0xff] }
 0x143   :  { %v436_v35 = vmax.f32 %v268_v54, %v349_v15  ;;  %11501 = vmatmul.mubr.msk.f32.vlgmr.msra.gmra.mrb[0].mxu0 %vm608_vm1, %v894_v17  ;;  %11756 = vmatmul.mubr.msk.f32.gmra.mrb[14].mxu1 %vm608_vm1, %v14209_v3  ;;  %v14251_v17 = vld [vmem:[#allocation2 + $0x29] sm:$0xff] }
 0x144   :  { %11503 = vmatprep.mubr.msk.f32.mxu0 %vm608_vm1, %v14214_v36  ;;  %11760 = vmatprep.mubr.msk.f32.mxu1 %vm608_vm1, %v3251_v48  ;;  %v517_v14 = vpop.permute.xlu0 %516  ;;  %v139_v58 = vpop.permute.xlu1 %138  ;;  %v14261_v48 = vld [vmem:[#allocation2 + $0x31] sm:$0xff] }
 0x145   :  { %v604_v12 = vmax.f32 %v436_v35, %v517_v14  ;;  %11525 = vmatpush3.msk.msra.mxu0 %vm728_vm0, %v14042_v24  ;;  %v247_v26 = vmax.f32 %v13949_v53, %v139_v58  ;;  %v14242_v53 = vld [vmem:[%s16489_s1 + $0x10] sm:$0xf]  ;;  %v14253_v35 = vld [vmem:[#allocation2 + $0xc2] sm:$0xff] }
 0x146   :  { %11550 = vmatprep.subr.msk.mxu0 %vm728_vm0, %v14219_v57  ;;  %v14263_v14 = vld [vmem:[#allocation2 + $0xca] sm:$0xff] }
 0x147   :  { %647 = vst.msk [vmem:[#allocation2 + $0x130] sm:$0xff] %vm608_vm1, %v604_v12  ;;  %11504 = vmatmul.mubr.msk.f32.gmra.mrb[2].mxu0 %vm608_vm1, %v14227_v52  ;;  %11761 = vmatmul.mubr.msk.f32.vlgmr.msra.gmra.mrb[0].mxu1 %vm608_vm1, %v3252_v21  ;;  %v14271_v21 = vld [vmem:[#allocation2 + $0xd2] sm:$0xff] }
 0x148   :  { %11506 = vmatprep.mubr.msk.f32.mxu0 %vm608_vm1, %v14235_v4  ;;  %11763 = vmatprep.mubr.msk.f32.mxu1 %vm608_vm1, %v14237_v23  ;;  %v307_v24 = vpop.permute.xlu1 %306  ;;  %v183_v34 = vpop.permute.xlu0 %182  ;;  %16596 = vst [vmem:[#allocation8_spill] sm:$0xff] %v14271_v21 }
 0x149   :  { %11785 = vmatpush3.msk.msra.mxu1 %vm728_vm0, %v14015_v55  ;;  %v415_v15 = vmax.f32 %v247_v26, %v307_v24  ;;  %v269_v54 = vmax.f32 %v13963_v62, %v183_v34  ;;  %v14269_v26 = vld [vmem:[#allocation2 + $0x39] sm:$0xff]  ;;  %v14277_v24 = vld [vmem:[#allocation2 + $0x41] sm:$0xff] }
 0x14a   :  { %11810 = vmatprep.subr.msk.mxu1 %vm728_vm0, %v14242_v53  ;;  %16595 = vst [vmem:[#allocation7_spill] sm:$0xff] %v14269_v26  ;;  %16597 = vst [vmem:[#allocation9_spill] sm:$0xff] %v14277_v24  ;;  %v14279_v34 = vld [vmem:[#allocation2 + $0xda] sm:$0xff] }
 0x14b   :  { %11507 = vmatmul.mubr.msk.f32.gmra.mrb[4].mxu0 %vm608_vm1, %v14251_v17  ;;  %11764 = vmatmul.mubr.msk.f32.gmra.mrb[2].mxu1 %vm608_vm1, %v14253_v35  ;;  %16598 = vst [vmem:[#allocation10_spill] sm:$0xff] %v14279_v34 }
 0x14c   :  { %11509 = vmatprep.mubr.msk.f32.mxu0 %vm608_vm1, %v14261_v48  ;;  %11766 = vmatprep.mubr.msk.f32.mxu1 %vm608_vm1, %v14263_v14  ;;  %v475_v62 = vpop.permute.xlu1 %474  ;;  %v351_v55 = vpop.permute.xlu0 %350 }
 0x14d   :  { %v583_v58 = vmax.f32 %v415_v15, %v475_v62  ;;  %v437_v12 = vmax.f32 %v269_v54, %v351_v55 }
 0x14f   :  { %11510 = vmatmul.mubr.msk.f32.gmra.mrb[6].mxu0 %vm608_vm1, %v14269_v26  ;;  %11767 = vmatmul.mubr.msk.f32.gmra.mrb[4].mxu1 %vm608_vm1, %v14271_v21  ;;  %626 = vst.msk [vmem:[#allocation2 + $0x88] sm:$0xff] %vm608_vm1, %v583_v58  ;;  %v14287_v26 = vld [vmem:[#allocation2 + $0x49] sm:$0xff]  ;;  %v14295_v58 = vld [vmem:[#allocation2 + $0x51] sm:$0xff] }
 0x150   :  { %11512 = vmatprep.mubr.msk.f32.mxu0 %vm608_vm1, %v14277_v24  ;;  %11769 = vmatprep.mubr.msk.f32.mxu1 %vm608_vm1, %v14279_v34  ;;  %v519_v15 = vpop.permute.xlu0 %518  ;;  %v141_v54 = vpop.permute.xlu1 %140  ;;  %16599 = vst [vmem:[#allocation11_spill] sm:$0xff] %v14287_v26  ;;  %v14289_v21 = vld [vmem:[#allocation2 + $0xe2] sm:$0xff]  ;;  %16601 = vst [vmem:[#allocation13_spill] sm:$0xff] %v14295_v58  ;;  %v14297_v24 = vld [vmem:[#allocation2 + $0xea] sm:$0xff] }
 0x151   :  { %v605_v62 = vmax.f32 %v437_v12, %v519_v15  ;;  %v248_v55 = vmax.f32 %v13980_v29, %v141_v54  ;;  %16600 = vst [vmem:[#allocation12_spill] sm:$0xff] %v14289_v21  ;;  %16602 = vst [vmem:[#allocation14_spill] sm:$0xff] %v14297_v24  ;;  %v14304_v54 = vld [vmem:[#allocation2 + $0x59] sm:$0xff] }
 0x152   :  { %16603 = vst [vmem:[#allocation15_spill] sm:$0xff] %v14304_v54  ;;  %v14341_v34 = vld [vmem:[#allocation2 + $0x112] sm:$0xff] }
 0x153   :  { %11513 = vmatmul.mubr.msk.f32.gmra.mrb[8].mxu0 %vm608_vm1, %v14287_v26  ;;  %11770 = vmatmul.mubr.msk.f32.gmra.mrb[6].mxu1 %vm608_vm1, %v14289_v21  ;;  %648 = vst.msk [vmem:[#allocation2 + $0x138] sm:$0xff] %vm608_vm1, %v605_v62  ;;  %v14306_v26 = vld [vmem:[#allocation2 + $0xf2] sm:$0xff]  ;;  %v14312_v62 = vld [vmem:[#allocation2 + $0x61] sm:$0xff]  ;;  %16610 = vst [vmem:[#allocation22_spill] sm:$0xff] %v14341_v34 }
 0x154   :  { %11515 = vmatprep.mubr.msk.f32.mxu0 %vm608_vm1, %v14295_v58  ;;  %11772 = vmatprep.mubr.msk.f32.mxu1 %vm608_vm1, %v14297_v24  ;;  %v309_v29 = vpop.permute.xlu0 %308  ;;  %v477_v12 = vpop.permute.xlu1 %476  ;;  %16604 = vst [vmem:[#allocation16_spill] sm:$0xff] %v14306_v26  ;;  %16605 = vst [vmem:[#allocation17_spill] sm:$0xff] %v14312_v62  ;;  %v14314_v21 = vld [vmem:[#allocation2 + $0xfa] sm:$0xff]  ;;  %v14322_v24 = vld [vmem:[#allocation2 + $0x69] sm:$0xff] }
 0x155   :  { %v416_v15 = vmax.f32 %v248_v55, %v309_v29  ;;  %16606 = vst [vmem:[#allocation18_spill] sm:$0xff] %v14314_v21  ;;  %16607 = vst [vmem:[#allocation19_spill] sm:$0xff] %v14322_v24 }
 0x157   :  { %11516 = vmatmul.mubr.msk.f32.gmra.mrb[10].mxu0 %vm608_vm1, %v14304_v54  ;;  %11773 = vmatmul.mubr.msk.f32.gmra.mrb[8].mxu1 %vm608_vm1, %v14306_v26  ;;  %v584_v58 = vmax.f32 %v416_v15, %v477_v12  ;;  %v14324_v26 = vld [vmem:[#allocation2 + $0x102] sm:$0xff]  ;;  %v14330_v12 = vld [vmem:[#allocation2 + $0x71] sm:$0xff] }
 0x158   :  { %11518 = vmatprep.mubr.msk.f32.mxu0 %vm608_vm1, %v14312_v62  ;;  %11775 = vmatprep.mubr.msk.f32.mxu1 %vm608_vm1, %v14314_v21  ;;  %v185_v55 = vpop.permute.xlu0 %184  ;;  %v353_v29 = vpop.permute.xlu1 %352  ;;  %v14332_v15 = vld [vmem:[#allocation2 + $0x10a] sm:$0xff] }
 0x159   :  { %627 = vst.msk [vmem:[#allocation2 + $0x90] sm:$0xff] %vm608_vm1, %v584_v58  ;;  %v270_v54 = vmax.f32 %v14004_v45, %v185_v55  ;;  %16608 = vst [vmem:[#allocation20_spill] sm:$0xff] %v14332_v15 }
 0x15b   :  { %11519 = vmatmul.mubr.msk.f32.gmra.mrb[12].mxu0 %vm608_vm1, %v14322_v24  ;;  %11776 = vmatmul.mubr.msk.f32.gmra.mrb[10].mxu1 %vm608_vm1, %v14324_v26  ;;  %v438_v21 = vmax.f32 %v270_v54, %v353_v29  ;;  %v14339_v24 = vld [vmem:[#allocation2 + $0x79] sm:$0xff]  ;;  %v1123_v54 = vld [vmem:[#allocation2 + $0x2] sm:$0xff] }
 0x15c   :  { %11521 = vmatprep.mubr.msk.f32.mxu0 %vm608_vm1, %v14330_v12  ;;  %11778 = vmatprep.mubr.msk.f32.mxu1 %vm608_vm1, %v14332_v15  ;;  %v521_v45 = vpop.permute.xlu0 %520  ;;  %v143_v58 = vpop.permute.xlu1 %142  ;;  %16609 = vst [vmem:[#allocation21_spill] sm:$0xff] %v14339_v24  ;;  %v14347_v29 = vld [vmem:[#allocation2 + $0x11a] sm:$0xff]  ;;  %v1124_v15 = vld [vmem:[#allocation2 + $0xa] sm:$0xff] }
 0x15d   :  { %v606_v55 = vmax.f32 %v438_v21, %v521_v45  ;;  %v249_v62 = vmax.f32 %v14024_v20, %v143_v58 }
 0x15f   :  { %11522 = vmatmul.mubr.msk.f32.gmra.mrb[14].mxu0 %vm608_vm1, %v14339_v24  ;;  %11779 = vmatmul.mubr.msk.f32.gmra.mrb[12].mxu1 %vm608_vm1, %v14341_v34  ;;  %649 = vst.msk [vmem:[#allocation2 + $0x140] sm:$0xff] %vm608_vm1, %v606_v55  ;;  %v14354_v24 = vld [vmem:[#allocation2 + $0x122] sm:$0xff]  ;;  %v14359_v34 = vld [vmem:[#allocation2 + $0x12] sm:$0xff] }
 0x160   :  { %11526 = vmatprep.mubr.msk.f32.mxu0 %vm608_vm1, %v1123_v54  ;;  %11781 = vmatprep.mubr.msk.f32.mxu1 %vm608_vm1, %v14347_v29  ;;  %v311_v20 = vpop.permute.xlu1 %310  ;;  %v187_v21 = vpop.permute.xlu0 %186  ;;  %v14364_v55 = vld [vmem:[%s16489_s1 + $0x10] sm:$0xf] }
 0x161   :  { %v417_v45 = vmax.f32 %v249_v62, %v311_v20  ;;  %v271_v58 = vmax.f32 %v14053_v25, %v187_v21  ;;  %v14372_v20 = vld [vmem:[#allocation2 + $0x1a] sm:$0xff]  ;;  %v14380_v21 = vld [vmem:[#allocation2 + $0x22] sm:$0xff] }
 0x163   :  { %11527 = vmatmul.mubr.msk.f32.vlgmr.msra.gmra.mrb[0].mxu0 %vm608_vm1, %v1124_v15  ;;  %11782 = vmatmul.mubr.msk.f32.gmra.mrb[14].mxu1 %vm608_vm1, %v14354_v24 }
 0x164   :  { %11529 = vmatprep.mubr.msk.f32.mxu0 %vm608_vm1, %v14359_v34  ;;  %11786 = vmatprep.mubr.msk.f32.mxu1 %vm608_vm1, %v13764_v60  ;;  %v479_v25 = vpop.permute.xlu1 %478  ;;  %v355_v62 = vpop.permute.xlu0 %354  ;;  %v14385_v60 = vld [vmem:[%s16489_s1 + $0x14] sm:$0xf] }
 0x165   :  { %11551 = vmatpush3.msk.msra.mxu0 %vm728_vm0, %v14219_v57  ;;  %v585_v15 = vmax.f32 %v417_v45, %v479_v25  ;;  %v439_v54 = vmax.f32 %v271_v58, %v355_v62  ;;  %v14394_v45 = vld [vmem:[#allocation2 + $0x2a] sm:$0xff]  ;;  %v14402_v58 = vld [vmem:[#allocation2 + $0x32] sm:$0xff] }
 0x166   :  { %11576 = vmatprep.subr.msk.mxu0 %vm728_vm0, %v14364_v55 }
 0x167   :  { %11530 = vmatmul.mubr.msk.f32.gmra.mrb[2].mxu0 %vm608_vm1, %v14372_v20  ;;  %11787 = vmatmul.mubr.msk.f32.vlgmr.msra.gmra.mrb[0].mxu1 %vm608_vm1, %v13773_v2  ;;  %628 = vst.msk [vmem:[#allocation2 + $0x98] sm:$0xff] %vm608_vm1, %v585_v15  ;;  %v14422_v15 = vld [vmem:[#allocation2 + $0x4a] sm:$0xff] }
 0x168   :  { %11532 = vmatprep.mubr.msk.f32.mxu0 %vm608_vm1, %v14380_v21  ;;  %11789 = vmatprep.mubr.msk.f32.mxu1 %vm608_vm1, %v13798_v28  ;;  %v523_v57 = vpop.permute.xlu0 %522  ;;  %v14409_v28 = vld [vmem:[#allocation2 + $0x3a] sm:$0xff] }
 0x169   :  { %11811 = vmatpush3.msk.msra.mxu1 %vm728_vm0, %v14242_v53  ;;  %v607_v2 = vmax.f32 %v439_v54, %v523_v57  ;;  %v145_v53 = vpop.permute.xlu1 %144  ;;  %v14447_v57 = vld [vmem:[#allocation2 + $0x6a] sm:$0xff] }
 0x16a   :  { %11836 = vmatprep.subr.msk.mxu1 %vm728_vm0, %v14385_v60  ;;  %v250_v25 = vmax.f32 %v14117_v42, %v145_v53  ;;  %v16627_v53 = vld [vmem:[#allocation20_spill] sm:$0xff] }
 0x16b   :  { %11533 = vmatmul.mubr.msk.f32.gmra.mrb[4].mxu0 %vm608_vm1, %v14394_v45  ;;  %11790 = vmatmul.mubr.msk.f32.gmra.mrb[2].mxu1 %vm608_vm1, %v13807_v7  ;;  %650 = vst.msk [vmem:[#allocation2 + $0x148] sm:$0xff] %vm608_vm1, %v607_v2  ;;  %v14415_v7 = vld [vmem:[#allocation2 + $0x42] sm:$0xff] }
 0x16c   :  { %11535 = vmatprep.mubr.msk.f32.mxu0 %vm608_vm1, %v14402_v58  ;;  %11792 = vmatprep.mubr.msk.f32.mxu1 %vm608_vm1, %v13846_v46  ;;  %v313_v46 = vpop.permute.xlu0 %312  ;;  %v16626_v2 = vld [vmem:[#allocation19_spill] sm:$0xff] }
 0x16d   :  { %v418_v62 = vmax.f32 %v250_v25, %v313_v46  ;;  %v481_v54 = vpop.permute.xlu1 %480  ;;  %v16628_v25 = vld [vmem:[#allocation21_spill] sm:$0xff]  ;;  %v16629_v46 = vld [vmem:[#allocation22_spill] sm:$0xff] }
 0x16f   :  { %11536 = vmatmul.mubr.msk.f32.gmra.mrb[6].mxu0 %vm608_vm1, %v14409_v28  ;;  %11793 = vmatmul.mubr.msk.f32.gmra.mrb[4].mxu1 %vm608_vm1, %v13855_v9  ;;  %v14428_v9 = vld [vmem:[#allocation2 + $0x52] sm:$0xff]  ;;  %v586_v42 = vmax.f32 %v418_v62, %v481_v54  ;;  %v14619_v62 = vld [vmem:[#allocation2 + $0x81] sm:$0xff]  ;;  %v14625_v54 = vld [vmem:[#allocation2 + $0x89] sm:$0xff] }
 0x170   :  { %11538 = vmatprep.mubr.msk.f32.mxu0 %vm608_vm1, %v14415_v7  ;;  %11795 = vmatprep.mubr.msk.f32.mxu1 %vm608_vm1, %v13880_v63  ;;  %v14435_v63 = vld [vmem:[#allocation2 + $0x5a] sm:$0xff] }
 0x171   :  { %629 = vst.msk [vmem:[#allocation2 + $0xa0] sm:$0xff] %vm608_vm1, %v586_v42  ;;  %v14631_v42 = vld [vmem:[#allocation2 + $0x12a] sm:$0xff] }
 0x173   :  { %11539 = vmatmul.mubr.msk.f32.gmra.mrb[8].mxu0 %vm608_vm1, %v14422_v15  ;;  %11796 = vmatmul.mubr.msk.f32.gmra.mrb[6].mxu1 %vm608_vm1, %v13894_v19  ;;  %v14441_v19 = vld [vmem:[#allocation2 + $0x62] sm:$0xff] }
 0x174   :  { %11541 = vmatprep.mubr.msk.f32.mxu0 %vm608_vm1, %v14428_v9  ;;  %11798 = vmatprep.mubr.msk.f32.mxu1 %vm608_vm1, %v13909_v32  ;;  %v14453_v32 = vld [vmem:[#allocation2 + $0x72] sm:$0xff] }
 0x177   :  { %11542 = vmatmul.mubr.msk.f32.gmra.mrb[10].mxu0 %vm608_vm1, %v14435_v63  ;;  %11799 = vmatmul.mubr.msk.f32.gmra.mrb[8].mxu1 %vm608_vm1, %v13921_v43  ;;  %v14459_v43 = vld [vmem:[#allocation2 + $0x7a] sm:$0xff] }
 0x178   :  { %11544 = vmatprep.mubr.msk.f32.mxu0 %vm608_vm1, %v14441_v19  ;;  %11801 = vmatprep.mubr.msk.f32.mxu1 %vm608_vm1, %v13940_v51  ;;  %v14465_v51 = vld [vmem:[#allocation2 + $0x128] sm:$0xff] }
 0x17b   :  { %11545 = vmatmul.mubr.msk.f32.gmra.mrb[12].mxu0 %vm608_vm1, %v14447_v57  ;;  %11802 = vmatmul.mubr.msk.f32.gmra.mrb[10].mxu1 %vm608_vm1, %v13954_v59  ;;  %v14471_v59 = vld [vmem:[#allocation2 + $0x130] sm:$0xff] }
 0x17c   :  { %11547 = vmatprep.mubr.msk.f32.mxu0 %vm608_vm1, %v14453_v32  ;;  %11804 = vmatprep.mubr.msk.f32.mxu1 %vm608_vm1, %v13983_v33  ;;  %v10147_v33 = vld [vmem:[%s16489_s1 + $0x14] sm:$0xf] }
 0x17f   :  { %11548 = vmatmul.mubr.msk.f32.gmra.mrb[14].mxu0 %vm608_vm1, %v14459_v43  ;;  %11805 = vmatmul.mubr.msk.f32.gmra.mrb[12].mxu1 %vm608_vm1, %v13992_v44  ;;  %v10326_v44 = vld [vmem:[%s16489_s1 + $0x18] sm:$0xf] }
 0x180   :  { %11552 = vmatprep.mubr.msk.f32.mxu0 %vm608_vm1, %v14075_v37  ;;  %11807 = vmatprep.mubr.msk.f32.mxu1 %vm608_vm1, %v14465_v51  ;;  %v14549_v37 = vld [vmem:[#allocation2 + $0x129] sm:$0xff] }
 0x183   :  { %11553 = vmatmul.mubr.msk.f32.vlgmr.msra.gmra.mrb[0].mxu0 %vm608_vm1, %v14092_v50  ;;  %11808 = vmatmul.mubr.msk.f32.gmra.mrb[14].mxu1 %vm608_vm1, %v14471_v59  ;;  %v10344_v50 = vld [vmem:[%s16489_s1 + $0x1c] sm:$0xf] }
 0x184   :  { %11555 = vmatprep.mubr.msk.f32.mxu0 %vm608_vm1, %v14126_v41  ;;  %11812 = vmatprep.mubr.msk.f32.mxu1 %vm608_vm1, %v14019_v61  ;;  %v16611_v61 = vld [vmem:[#allocation4_spill] sm:$0xff]  ;;  %v16618_v41 = vld [vmem:[#allocation11_spill] sm:$0xff] }
 0x185   :  { %11577 = vmatpush3.msk.msra.mxu0 %vm728_vm0, %v14364_v55  ;;  %v16624_v55 = vld [vmem:[#allocation17_spill] sm:$0xff] }
 0x186   :  { %11602 = vmatprep.subr.msk.mxu0 %vm728_vm0, %v10147_v33 }
 0x187   :  { %11556 = vmatmul.mubr.msk.f32.gmra.mrb[2].mxu0 %vm608_vm1, %v14141_v49  ;;  %11813 = vmatmul.mubr.msk.f32.vlgmr.msra.gmra.mrb[0].mxu1 %vm608_vm1, %v14033_v6  ;;  %v16612_v6 = vld [vmem:[#allocation5_spill] sm:$0xff]  ;;  %v16619_v49 = vld [vmem:[#allocation12_spill] sm:$0xff] }
 0x188   :  { %11558 = vmatprep.mubr.msk.f32.mxu0 %vm608_vm1, %v14148_v11  ;;  %11815 = vmatprep.mubr.msk.f32.mxu1 %vm608_vm1, %v14048_v22  ;;  %v14537_v22 = vld [vmem:[#allocation2 + $0x80] sm:$0xff] }
 0x189   :  { %11837 = vmatpush3.msk.msra.mxu1 %vm728_vm0, %v14385_v60  ;;  %v16617_v11 = vld [vmem:[#allocation10_spill] sm:$0xff] }
 0x18a   :  { %11862 = vmatprep.subr.msk.mxu1 %vm728_vm0, %v10326_v44  ;;  %v16625_v60 = vld [vmem:[#allocation18_spill] sm:$0xff] }
 0x18b   :  { %11559 = vmatmul.mubr.msk.f32.gmra.mrb[4].mxu0 %vm608_vm1, %v14153_v47  ;;  %11816 = vmatmul.mubr.msk.f32.gmra.mrb[2].mxu1 %vm608_vm1, %v14061_v30  ;;  %v16613_v30 = vld [vmem:[#allocation6_spill] sm:$0xff] }
 0x18c   :  { %11561 = vmatprep.mubr.msk.f32.mxu0 %vm608_vm1, %v14160_v16  ;;  %11818 = vmatprep.mubr.msk.f32.mxu1 %vm608_vm1, %v14070_v31  ;;  %v14543_v31 = vld [vmem:[#allocation2 + $0x88] sm:$0xff] }
 0x18f   :  { %11562 = vmatmul.mubr.msk.f32.gmra.mrb[6].mxu0 %vm608_vm1, %v14165_v8  ;;  %11819 = vmatmul.mubr.msk.f32.gmra.mrb[4].mxu1 %vm608_vm1, %v14077_v13  ;;  %v14555_v13 = vld [vmem:[#allocation2 + $0x131] sm:$0xff] }
 0x190   :  { %11564 = vmatprep.mubr.msk.f32.mxu0 %vm608_vm1, %v14172_v27  ;;  %11821 = vmatprep.mubr.msk.f32.mxu1 %vm608_vm1, %v14087_v18  ;;  %v10165_v18 = vld [vmem:[%s16489_s1 + $0x18] sm:$0xf] }
 0x193   :  { %11565 = vmatmul.mubr.msk.f32.gmra.mrb[8].mxu0 %vm608_vm1, %v14177_v40  ;;  %11822 = vmatmul.mubr.msk.f32.gmra.mrb[6].mxu1 %vm608_vm1, %v14094_v10  ;;  %v16614_v10 = vld [vmem:[#allocation7_spill] sm:$0xff] }
 0x194   :  { %11567 = vmatprep.mubr.msk.f32.mxu0 %vm608_vm1, %v14184_v38  ;;  %11824 = vmatprep.mubr.msk.f32.mxu1 %vm608_vm1, %v14103_v0  ;;  %v16615_v0 = vld [vmem:[#allocation8_spill] sm:$0xff] }
 0x197   :  { %11568 = vmatmul.mubr.msk.f32.gmra.mrb[10].mxu0 %vm608_vm1, %v14189_v56  ;;  %11825 = vmatmul.mubr.msk.f32.gmra.mrb[8].mxu1 %vm608_vm1, %v14107_v5  ;;  %v16616_v5 = vld [vmem:[#allocation9_spill] sm:$0xff] }
 0x198   :  { %11570 = vmatprep.mubr.msk.f32.mxu0 %vm608_vm1, %v14197_v39  ;;  %11827 = vmatprep.mubr.msk.f32.mxu1 %vm608_vm1, %v16611_v61  ;;  %v10183_v61 = vld [vmem:[%s16489_s1 + $0x1c] sm:$0xf] }
 0x19b   :  { %11571 = vmatmul.mubr.msk.f32.gmra.mrb[12].mxu0 %vm608_vm1, %v14202_v1  ;;  %11828 = vmatmul.mubr.msk.f32.gmra.mrb[10].mxu1 %vm608_vm1, %v16612_v6  ;;  %v10362_v6 = vld [vmem:[%s16489_s1 + $0x20] sm:$0xf] }
 0x19c   :  { %11573 = vmatprep.mubr.msk.f32.mxu0 %vm608_vm1, %v14537_v22  ;;  %11830 = vmatprep.mubr.msk.f32.mxu1 %vm608_vm1, %v16613_v30  ;;  %v4170_v30 = vld [vmem:[#allocation2 + $0xe0] sm:$0xff] }
 0x19f   :  { %11574 = vmatmul.mubr.msk.f32.gmra.mrb[14].mxu0 %vm608_vm1, %v14543_v31  ;;  %11831 = vmatmul.mubr.msk.f32.gmra.mrb[12].mxu1 %vm608_vm1, %v14209_v3 }
 0x1a0   :  { %11578 = vmatprep.mubr.msk.f32.mxu0 %vm608_vm1, %v14214_v36  ;;  %11833 = vmatprep.mubr.msk.f32.mxu1 %vm608_vm1, %v14549_v37  ;;  %v16620_v36 = vld [vmem:[#allocation13_spill] sm:$0xff] }
 0x1a3   :  { %11579 = vmatmul.mubr.msk.f32.vlgmr.msra.gmra.mrb[0].mxu0 %vm608_vm1, %v14227_v52  ;;  %11834 = vmatmul.mubr.msk.f32.gmra.mrb[14].mxu1 %vm608_vm1, %v14555_v13  ;;  %v16621_v52 = vld [vmem:[#allocation14_spill] sm:$0xff] }
 0x1a4   :  { %11581 = vmatprep.mubr.msk.f32.mxu0 %vm608_vm1, %v14235_v4  ;;  %11838 = vmatprep.mubr.msk.f32.mxu1 %vm608_vm1, %v14237_v23  ;;  %v16622_v23 = vld [vmem:[#allocation15_spill] sm:$0xff] }
 0x1a5   :  { %11603 = vmatpush3.msk.msra.mxu0 %vm728_vm0, %v10147_v33  ;;  %v14637_v33 = vld [vmem:[#allocation2 + $0x132] sm:$0xff] }
 0x1a6   :  { %11628 = vmatprep.subr.msk.mxu0 %vm728_vm0, %v10165_v18 }
 0x1a7   :  { %11582 = vmatmul.mubr.msk.f32.gmra.mrb[2].mxu0 %vm608_vm1, %v14251_v17  ;;  %11839 = vmatmul.mubr.msk.f32.vlgmr.msra.gmra.mrb[0].mxu1 %vm608_vm1, %v14253_v35  ;;  %v16623_v35 = vld [vmem:[#allocation16_spill] sm:$0xff] }
 0x1a8   :  { %11584 = vmatprep.mubr.msk.f32.mxu0 %vm608_vm1, %v14261_v48  ;;  %11841 = vmatprep.mubr.msk.f32.mxu1 %vm608_vm1, %v14263_v14 }
 0x1a9   :  { %11863 = vmatpush3.msk.msra.mxu1 %vm728_vm0, %v10326_v44  ;;  %v4167_v44 = vld [vmem:[#allocation2 + $0xc8] sm:$0xff] }
 0x1aa   :  { %11888 = vmatprep.subr.msk.mxu1 %vm728_vm0, %v10344_v50 }
 0x1ab   :  { %11585 = vmatmul.mubr.msk.f32.gmra.mrb[4].mxu0 %vm608_vm1, %v16614_v10  ;;  %11842 = vmatmul.mubr.msk.f32.gmra.mrb[2].mxu1 %vm608_vm1, %v16615_v0 }
 0x1ac   :  { %11587 = vmatprep.mubr.msk.f32.mxu0 %vm608_vm1, %v16616_v5  ;;  %11844 = vmatprep.mubr.msk.f32.mxu1 %vm608_vm1, %v16617_v11 }
 0x1af   :  { %11588 = vmatmul.mubr.msk.f32.gmra.mrb[6].mxu0 %vm608_vm1, %v16618_v41  ;;  %11845 = vmatmul.mubr.msk.f32.gmra.mrb[4].mxu1 %vm608_vm1, %v16619_v49 }
 0x1b0   :  { %11590 = vmatprep.mubr.msk.f32.mxu0 %vm608_vm1, %v16620_v36  ;;  %11847 = vmatprep.mubr.msk.f32.mxu1 %vm608_vm1, %v16621_v52 }
 0x1b3   :  { %11591 = vmatmul.mubr.msk.f32.gmra.mrb[8].mxu0 %vm608_vm1, %v16622_v23  ;;  %11848 = vmatmul.mubr.msk.f32.gmra.mrb[6].mxu1 %vm608_vm1, %v16623_v35 }
 0x1b4   :  { %11593 = vmatprep.mubr.msk.f32.mxu0 %vm608_vm1, %v16624_v55  ;;  %11850 = vmatprep.mubr.msk.f32.mxu1 %vm608_vm1, %v16625_v60 }
 0x1b7   :  { %11594 = vmatmul.mubr.msk.f32.gmra.mrb[10].mxu0 %vm608_vm1, %v16626_v2  ;;  %11851 = vmatmul.mubr.msk.f32.gmra.mrb[8].mxu1 %vm608_vm1, %v14324_v26 }
 0x1b8   :  { %11596 = vmatprep.mubr.msk.f32.mxu0 %vm608_vm1, %v14330_v12  ;;  %11853 = vmatprep.mubr.msk.f32.mxu1 %vm608_vm1, %v16627_v53 }
 0x1bb   :  { %11597 = vmatmul.mubr.msk.f32.gmra.mrb[12].mxu0 %vm608_vm1, %v16628_v25  ;;  %11854 = vmatmul.mubr.msk.f32.gmra.mrb[10].mxu1 %vm608_vm1, %v16629_v46 }
 0x1bc   :  { %11599 = vmatprep.mubr.msk.f32.mxu0 %vm608_vm1, %v14619_v62  ;;  %11856 = vmatprep.mubr.msk.f32.mxu1 %vm608_vm1, %v14347_v29 }
 0x1bf   :  { %11600 = vmatmul.mubr.msk.f32.gmra.mrb[14].mxu0 %vm608_vm1, %v14625_v54  ;;  %11857 = vmatmul.mubr.msk.f32.gmra.mrb[12].mxu1 %vm608_vm1, %v14354_v24 }
 0x1c0   :  { %11604 = vmatprep.mubr.msk.f32.mxu0 %vm608_vm1, %v14359_v34  ;;  %11859 = vmatprep.mubr.msk.f32.mxu1 %vm608_vm1, %v14631_v42  ;;  %v4168_v34 = vld [vmem:[#allocation2 + $0xd0] sm:$0xff] }
 0x1c3   :  { %11605 = vmatmul.mubr.msk.f32.vlgmr.msra.gmra.mrb[0].mxu0 %vm608_vm1, %v14372_v20  ;;  %11860 = vmatmul.mubr.msk.f32.gmra.mrb[14].mxu1 %vm608_vm1, %v14637_v33  ;;  %v4169_v20 = vld [vmem:[#allocation2 + $0xd8] sm:$0xff] }
 0x1c4   :  { %11607 = vmatprep.mubr.msk.f32.mxu0 %vm608_vm1, %v14380_v21  ;;  %11864 = vmatprep.mubr.msk.f32.mxu1 %vm608_vm1, %v4167_v44  ;;  %v4172_v44 = vld [vmem:[#allocation2 + $0xf0] sm:$0xff] }
 0x1c5   :  { %11629 = vmatpush3.msk.msra.mxu0 %vm728_vm0, %v10165_v18  ;;  %v4171_v18 = vld [vmem:[#allocation2 + $0xe8] sm:$0xff] }
 0x1c6   :  { %11654 = vmatprep.subr.msk.mxu0 %vm728_vm0, %v10183_v61 }
 0x1c7   :  { %11608 = vmatmul.mubr.msk.f32.gmra.mrb[2].mxu0 %vm608_vm1, %v14394_v45  ;;  %11865 = vmatmul.mubr.msk.f32.vlgmr.msra.gmra.mrb[0].mxu1 %vm608_vm1, %v4168_v34  ;;  %v4174_v34 = vld [vmem:[#allocation2 + $0x100] sm:$0xff] }
 0x1c8   :  { %11610 = vmatprep.mubr.msk.f32.mxu0 %vm608_vm1, %v14402_v58  ;;  %11867 = vmatprep.mubr.msk.f32.mxu1 %vm608_vm1, %v4169_v20  ;;  %v4175_v20 = vld [vmem:[#allocation2 + $0x108] sm:$0xff] }
 0x1c9   :  { %11889 = vmatpush3.msk.msra.mxu1 %vm728_vm0, %v10344_v50  ;;  %v4173_v50 = vld [vmem:[#allocation2 + $0xf8] sm:$0xff] }
 0x1ca   :  { %11914 = vmatprep.subr.msk.mxu1 %vm728_vm0, %v10362_v6 }
 0x1cb   :  { %11611 = vmatmul.mubr.msk.f32.gmra.mrb[4].mxu0 %vm608_vm1, %v14409_v28  ;;  %11868 = vmatmul.mubr.msk.f32.gmra.mrb[2].mxu1 %vm608_vm1, %v4170_v30  ;;  %v4176_v30 = vld [vmem:[#allocation2 + $0x110] sm:$0xff] }
 0x1cc   :  { %11613 = vmatprep.mubr.msk.f32.mxu0 %vm608_vm1, %v14415_v7  ;;  %11870 = vmatprep.mubr.msk.f32.mxu1 %vm608_vm1, %v4171_v18  ;;  %v4177_v18 = vld [vmem:[#allocation2 + $0x118] sm:$0xff] }
 0x1cf   :  { %11614 = vmatmul.mubr.msk.f32.gmra.mrb[6].mxu0 %vm608_vm1, %v14422_v15  ;;  %11871 = vmatmul.mubr.msk.f32.gmra.mrb[4].mxu1 %vm608_vm1, %v4172_v44  ;;  %v4178_v44 = vld [vmem:[#allocation2 + $0x120] sm:$0xff] }
 0x1d0   :  { %11616 = vmatprep.mubr.msk.f32.mxu0 %vm608_vm1, %v14428_v9  ;;  %11873 = vmatprep.mubr.msk.f32.mxu1 %vm608_vm1, %v4173_v50  ;;  %v14689_v50 = vld [vmem:[#allocation2 + $0x82] sm:$0xff] }
 0x1d1   :  { %16630 = vst [vmem:[#allocation4_spill] sm:$0xff] %v14689_v50 }
 0x1d3   :  { %11617 = vmatmul.mubr.msk.f32.gmra.mrb[8].mxu0 %vm608_vm1, %v14435_v63  ;;  %11874 = vmatmul.mubr.msk.f32.gmra.mrb[6].mxu1 %vm608_vm1, %v4174_v34  ;;  %v14695_v34 = vld [vmem:[#allocation2 + $0x8a] sm:$0xff] }
 0x1d4   :  { %11619 = vmatprep.mubr.msk.f32.mxu0 %vm608_vm1, %v14441_v19  ;;  %11876 = vmatprep.mubr.msk.f32.mxu1 %vm608_vm1, %v4175_v20  ;;  %16631 = vst [vmem:[#allocation5_spill] sm:$0xff] %v14695_v34  ;;  %v2043_v20 = vld [vmem:[#allocation2 + $0x20] sm:$0xff] }
 0x1d7   :  { %11620 = vmatmul.mubr.msk.f32.gmra.mrb[10].mxu0 %vm608_vm1, %v14447_v57  ;;  %11877 = vmatmul.mubr.msk.f32.gmra.mrb[8].mxu1 %vm608_vm1, %v4176_v30  ;;  %v4181_v30 = vld [vmem:[#allocation2 + $0x138] sm:$0xff] }
 0x1d8   :  { %11622 = vmatprep.mubr.msk.f32.mxu0 %vm608_vm1, %v14453_v32  ;;  %11879 = vmatprep.mubr.msk.f32.mxu1 %vm608_vm1, %v4177_v18  ;;  %v4182_v18 = vld [vmem:[#allocation2 + $0x140] sm:$0xff] }
 0x1db   :  { %11623 = vmatmul.mubr.msk.f32.gmra.mrb[12].mxu0 %vm608_vm1, %v14459_v43  ;;  %11880 = vmatmul.mubr.msk.f32.gmra.mrb[10].mxu1 %vm608_vm1, %v4178_v44  ;;  %v2044_v44 = vld [vmem:[#allocation2 + $0x28] sm:$0xff] }
 0x1dc   :  { %11625 = vmatprep.mubr.msk.f32.mxu0 %vm608_vm1, %v14689_v50  ;;  %11882 = vmatprep.mubr.msk.f32.mxu1 %vm608_vm1, %v14465_v51  ;;  %v2045_v51 = vld [vmem:[#allocation2 + $0x30] sm:$0xff] }
 0x1dd   :  { %v4396_v50 = vld [vmem:[#allocation2 + $0xc9] sm:$0xff] }
 0x1df   :  { %11626 = vmatmul.mubr.msk.f32.gmra.mrb[14].mxu0 %vm608_vm1, %v14695_v34  ;;  %11883 = vmatmul.mubr.msk.f32.gmra.mrb[12].mxu1 %vm608_vm1, %v14471_v59  ;;  %v10201_v34 = vld [vmem:[%s16489_s1 + $0x20] sm:$0xf]  ;;  %v4397_v59 = vld [vmem:[#allocation2 + $0xd1] sm:$0xff] }
 0x1e0   :  { %11630 = vmatprep.mubr.msk.f32.mxu0 %vm608_vm1, %v2043_v20  ;;  %11885 = vmatprep.mubr.msk.f32.mxu1 %vm608_vm1, %v4181_v30  ;;  %v4398_v20 = vld [vmem:[#allocation2 + $0xd9] sm:$0xff]  ;;  %v4399_v30 = vld [vmem:[#allocation2 + $0xe1] sm:$0xff] }
 0x1e3   :  { %11631 = vmatmul.mubr.msk.f32.vlgmr.msra.gmra.mrb[0].mxu0 %vm608_vm1, %v2044_v44  ;;  %11886 = vmatmul.mubr.msk.f32.gmra.mrb[14].mxu1 %vm608_vm1, %v4182_v18 }
 0x1e4   :  { %11633 = vmatprep.mubr.msk.f32.mxu0 %vm608_vm1, %v2045_v51  ;;  %11890 = vmatprep.mubr.msk.f32.mxu1 %vm608_vm1, %v4396_v50 }
 0x1e5   :  { %11655 = vmatpush3.msk.msra.mxu0 %vm728_vm0, %v10183_v61  ;;  %v4400_v61 = vld [vmem:[#allocation2 + $0xe9] sm:$0xff] }
 0x1e6   :  { %11680 = vmatprep.subr.msk.mxu0 %vm728_vm0, %v10201_v34 }
 0x1e7   :  { %11634 = vmatmul.mubr.msk.f32.gmra.mrb[2].mxu0 %vm608_vm1, %v14153_v47  ;;  %11891 = vmatmul.mubr.msk.f32.vlgmr.msra.gmra.mrb[0].mxu1 %vm608_vm1, %v4397_v59  ;;  %v4401_v47 = vld [vmem:[#allocation2 + $0xf1] sm:$0xff] }
 0x1e8   :  { %11636 = vmatprep.mubr.msk.f32.mxu0 %vm608_vm1, %v14160_v16  ;;  %11893 = vmatprep.mubr.msk.f32.mxu1 %vm608_vm1, %v4398_v20  ;;  %v4402_v16 = vld [vmem:[#allocation2 + $0xf9] sm:$0xff] }
 0x1e9   :  { %11915 = vmatpush3.msk.msra.mxu1 %vm728_vm0, %v10362_v6 }
 0x1eb   :  { %11637 = vmatmul.mubr.msk.f32.gmra.mrb[4].mxu0 %vm608_vm1, %v14165_v8  ;;  %11894 = vmatmul.mubr.msk.f32.gmra.mrb[2].mxu1 %vm608_vm1, %v4399_v30  ;;  %v4403_v8 = vld [vmem:[#allocation2 + $0x101] sm:$0xff] }
 0x1ec   :  { %11639 = vmatprep.mubr.msk.f32.mxu0 %vm608_vm1, %v14172_v27  ;;  %11896 = vmatprep.mubr.msk.f32.mxu1 %vm608_vm1, %v4400_v61  ;;  %v4404_v27 = vld [vmem:[#allocation2 + $0x109] sm:$0xff] }
 0x1ef   :  { %11640 = vmatmul.mubr.msk.f32.gmra.mrb[6].mxu0 %vm608_vm1, %v14177_v40  ;;  %11897 = vmatmul.mubr.msk.f32.gmra.mrb[4].mxu1 %vm608_vm1, %v4401_v47  ;;  %v4405_v40 = vld [vmem:[#allocation2 + $0x111] sm:$0xff] }
 0x1f0   :  { %11642 = vmatprep.mubr.msk.f32.mxu0 %vm608_vm1, %v14184_v38  ;;  %11899 = vmatprep.mubr.msk.f32.mxu1 %vm608_vm1, %v4402_v16  ;;  %v4406_v38 = vld [vmem:[#allocation2 + $0x119] sm:$0xff] }
 0x1f3   :  { %11643 = vmatmul.mubr.msk.f32.gmra.mrb[8].mxu0 %vm608_vm1, %v14189_v56  ;;  %11900 = vmatmul.mubr.msk.f32.gmra.mrb[6].mxu1 %vm608_vm1, %v4403_v8  ;;  %v2057_v56 = vld [vmem:[#allocation2 + $0x90] sm:$0xff] }
 0x1f4   :  { %11645 = vmatprep.mubr.msk.f32.mxu0 %vm608_vm1, %v14197_v39  ;;  %11902 = vmatprep.mubr.msk.f32.mxu1 %vm608_vm1, %v4404_v27  ;;  %v2058_v39 = vld [vmem:[#allocation2 + $0x98] sm:$0xff] }
 0x1f7   :  { %11646 = vmatmul.mubr.msk.f32.gmra.mrb[10].mxu0 %vm608_vm1, %v14202_v1  ;;  %11903 = vmatmul.mubr.msk.f32.gmra.mrb[8].mxu1 %vm608_vm1, %v4405_v40  ;;  %v4410_v1 = vld [vmem:[#allocation2 + $0x139] sm:$0xff] }
 0x1f8   :  { %11648 = vmatprep.mubr.msk.f32.mxu0 %vm608_vm1, %v14537_v22  ;;  %11905 = vmatprep.mubr.msk.f32.mxu1 %vm608_vm1, %v4406_v38  ;;  %v4411_v22 = vld [vmem:[#allocation2 + $0x141] sm:$0xff] }
 0x1fb   :  { %11649 = vmatmul.mubr.msk.f32.gmra.mrb[12].mxu0 %vm608_vm1, %v14543_v31  ;;  %11906 = vmatmul.mubr.msk.f32.gmra.mrb[10].mxu1 %vm608_vm1, %v14209_v3  ;;  %v2287_v3 = vld [vmem:[#allocation2 + $0x91] sm:$0xff] }
 0x1fc   :  { %11651 = vmatprep.mubr.msk.f32.mxu0 %vm608_vm1, %v2057_v56  ;;  %11908 = vmatprep.mubr.msk.f32.mxu1 %vm608_vm1, %v14549_v37 }
 0x1ff   :  { %11652 = vmatmul.mubr.msk.f32.gmra.mrb[14].mxu0 %vm608_vm1, %v2058_v39  ;;  %11909 = vmatmul.mubr.msk.f32.gmra.mrb[12].mxu1 %vm608_vm1, %v14555_v13 }
 0x200   :  { %11656 = vmatprep.mubr.msk.f32.mxu0 %vm608_vm1, %v14235_v4  ;;  %11911 = vmatprep.mubr.msk.f32.mxu1 %vm608_vm1, %v4410_v1  ;;  %v2288_v4 = vld [vmem:[#allocation2 + $0x99] sm:$0xff] }
 0x203   :  { %11657 = vmatmul.mubr.msk.f32.vlgmr.msra.gmra.mrb[0].mxu0 %vm608_vm1, %v14251_v17  ;;  %11912 = vmatmul.mubr.msk.f32.gmra.mrb[14].mxu1 %vm608_vm1, %v4411_v22  ;;  %v4639_v17 = vld [vmem:[#allocation2 + $0x13a] sm:$0xff] }
 0x204   :  { %11659 = vmatprep.mubr.msk.f32.mxu0 %vm608_vm1, %v14261_v48  ;;  %11916 = vmatprep.mubr.msk.f32.mxu1 %vm608_vm1, %v14263_v14  ;;  %v4640_v48 = vld [vmem:[#allocation2 + $0x142] sm:$0xff]  ;;  %v16632_v14 = vld [vmem:[#allocation4_spill] sm:$0xff] }
 0x205   :  { %11681 = vmatpush3.msk.msra.mxu0 %vm728_vm0, %v10201_v34 }
 0x207   :  { %11660 = vmatmul.mubr.msk.f32.gmra.mrb[2].mxu0 %vm608_vm1, %v16614_v10  ;;  %11917 = vmatmul.mubr.msk.f32.vlgmr.msra.gmra.mrb[0].mxu1 %vm608_vm1, %v16615_v0 }
 0x208   :  { %11662 = vmatprep.mubr.msk.f32.mxu0 %vm608_vm1, %v16616_v5  ;;  %11919 = vmatprep.mubr.msk.f32.mxu1 %vm608_vm1, %v16617_v11 }
 0x20b   :  { %11663 = vmatmul.mubr.msk.f32.gmra.mrb[4].mxu0 %vm608_vm1, %v16618_v41  ;;  %11920 = vmatmul.mubr.msk.f32.gmra.mrb[2].mxu1 %vm608_vm1, %v16619_v49 }
 0x20c   :  { %11665 = vmatprep.mubr.msk.f32.mxu0 %vm608_vm1, %v16620_v36  ;;  %11922 = vmatprep.mubr.msk.f32.mxu1 %vm608_vm1, %v16621_v52 }
 0x20f   :  { %11666 = vmatmul.mubr.msk.f32.gmra.mrb[6].mxu0 %vm608_vm1, %v16622_v23  ;;  %11923 = vmatmul.mubr.msk.f32.gmra.mrb[4].mxu1 %vm608_vm1, %v16623_v35 }
 0x210   :  { %11668 = vmatprep.mubr.msk.f32.mxu0 %vm608_vm1, %v16624_v55  ;;  %11925 = vmatprep.mubr.msk.f32.mxu1 %vm608_vm1, %v16625_v60 }
 0x213   :  { %11669 = vmatmul.mubr.msk.f32.gmra.mrb[8].mxu0 %vm608_vm1, %v16626_v2  ;;  %11926 = vmatmul.mubr.msk.f32.gmra.mrb[6].mxu1 %vm608_vm1, %v14324_v26  ;;  %v16633_v26 = vld [vmem:[#allocation5_spill] sm:$0xff] }
 0x214   :  { %11671 = vmatprep.mubr.msk.f32.mxu0 %vm608_vm1, %v14330_v12  ;;  %11928 = vmatprep.mubr.msk.f32.mxu1 %vm608_vm1, %v16627_v53  ;;  %v2518_v12 = vld [vmem:[#allocation2 + $0x9a] sm:$0xff] }
 0x217   :  { %11672 = vmatmul.mubr.msk.f32.gmra.mrb[10].mxu0 %vm608_vm1, %v16628_v25  ;;  %11929 = vmatmul.mubr.msk.f32.gmra.mrb[8].mxu1 %vm608_vm1, %v16629_v46 }
 0x218   :  { %11674 = vmatprep.mubr.msk.f32.mxu0 %vm608_vm1, %v14619_v62  ;;  %11931 = vmatprep.mubr.msk.f32.mxu1 %vm608_vm1, %v14347_v29  ;;  %v16536_v29 = vmov 0.0  }
 0x219   :  { %2770 = vst.msk [vmem:[#allocation3] sm:$0xff] %vm2769_vm2, %v16536_v29  ;;  %2771 = vst.msk [vmem:[#allocation3 + $0x8] sm:$0xff] %vm2769_vm2, %v16536_v29 }
 0x21a   :  { %2772 = vst.msk [vmem:[#allocation3 + $0x10] sm:$0xff] %vm2769_vm2, %v16536_v29  ;;  %2773 = vst.msk [vmem:[#allocation3 + $0x98] sm:$0xff] %vm2769_vm2, %v16536_v29 }
 0x21b   :  { %11675 = vmatmul.mubr.msk.f32.gmra.mrb[12].mxu0 %vm608_vm1, %v14625_v54  ;;  %11932 = vmatmul.mubr.msk.f32.gmra.mrb[10].mxu1 %vm608_vm1, %v14354_v24  ;;  %v2517_v24 = vld [vmem:[#allocation2 + $0x92] sm:$0xff]  ;;  %2774 = vst.msk [vmem:[#allocation3 + $0xa0] sm:$0xff] %vm2769_vm2, %v16536_v29  ;;  %2775 = vst.msk [vmem:[#allocation3 + $0xa8] sm:$0xff] %vm2769_vm2, %v16536_v29 }
 0x21c   :  { %11677 = vmatprep.mubr.msk.f32.mxu0 %vm608_vm1, %v2287_v3  ;;  %11934 = vmatprep.mubr.msk.f32.mxu1 %vm608_vm1, %v14631_v42  ;;  %2777 = vst.msk [vmem:[#allocation3 + $0x20] sm:$0xff] %vm2769_vm2, %v16536_v29  ;;  %2779 = vst.msk [vmem:[#allocation3 + $0x30] sm:$0xff] %vm2769_vm2, %v16536_v29 }
 0x21d   :  { %2781 = vst.msk [vmem:[#allocation3 + $0x40] sm:$0xff] %vm2769_vm2, %v16536_v29  ;;  %2783 = vst.msk [vmem:[#allocation3 + $0x50] sm:$0xff] %vm2769_vm2, %v16536_v29 }
 0x21e   :  { %2785 = vst.msk [vmem:[#allocation3 + $0x60] sm:$0xff] %vm2769_vm2, %v16536_v29  ;;  %2787 = vst.msk [vmem:[#allocation3 + $0x70] sm:$0xff] %vm2769_vm2, %v16536_v29 }
 0x21f   :  { %11678 = vmatmul.mubr.msk.f32.gmra.mrb[14].mxu0 %vm608_vm1, %v2288_v4  ;;  %11935 = vmatmul.mubr.msk.f32.gmra.mrb[12].mxu1 %vm608_vm1, %v14637_v33  ;;  %2789 = vst.msk [vmem:[#allocation3 + $0x80] sm:$0xff] %vm2769_vm2, %v16536_v29  ;;  %2791 = vst.msk [vmem:[#allocation3 + $0x90] sm:$0xff] %vm2769_vm2, %v16536_v29 }
 0x220   :  { %11682 = vmatprep.mubr.msk.f32.mxu0 %vm608_vm1, %v14380_v21  ;;  %11937 = vmatprep.mubr.msk.f32.mxu1 %vm608_vm1, %v4639_v17  ;;  %5167 = vst.msk [vmem:[#allocation3 + $0xb0] sm:$0xff] %vm2769_vm2, %v16536_v29  ;;  %5168 = vst.msk [vmem:[#allocation3 + $0xb8] sm:$0xff] %vm2769_vm2, %v16536_v29  ;;  %v16538_v21 = vmov 0.0|0.0  }
 0x221   :  { %5169 = vst.msk [vmem:[#allocation3 + $0xc0] sm:$0xff] %vm2769_vm2, %v16536_v29  ;;  %5170 = vst.msk [vmem:[#allocation3 + $0x148] sm:$0xff] %vm2769_vm2, %v16536_v29  ;;  %12672 = vmatprep.subr.bf16.mxu0 %v16538_v21  ;;  %12714 = vmatprep.subr.bf16.mxu1 %v16538_v21 }
 0x222   :  { %5171 = vst.msk [vmem:[#allocation3 + $0x150] sm:$0xff] %vm2769_vm2, %v16536_v29  ;;  %5172 = vst.msk [vmem:[#allocation3 + $0x158] sm:$0xff] %vm2769_vm2, %v16536_v29 }
 0x223   :  { %11683 = vmatmul.mubr.msk.f32.vlgmr.msra.gmra.mrb[0].mxu0 %vm608_vm1, %v14394_v45  ;;  %11938 = vmatmul.mubr.msk.f32.gmra.mrb[14].mxu1 %vm608_vm1, %v4640_v48  ;;  %5174 = vst.msk [vmem:[#allocation3 + $0xd0] sm:$0xff] %vm2769_vm2, %v16536_v29  ;;  %5176 = vst.msk [vmem:[#allocation3 + $0xe0] sm:$0xff] %vm2769_vm2, %v16536_v29  ;;  %v658_v45 = vlaneseq }
 0x224   :  { %11685 = vmatprep.mubr.msk.f32.mxu0 %vm608_vm1, %v14402_v58  ;;  %5178 = vst.msk [vmem:[#allocation3 + $0xf0] sm:$0xff] %vm2769_vm2, %v16536_v29  ;;  %5180 = vst.msk [vmem:[#allocation3 + $0x100] sm:$0xff] %vm2769_vm2, %v16536_v29  ;;  %12036 = vmatprep.mubr.msk.f32.mxu1 %vm13424_vm3, %v16536_v29 }
 0x225   :  { %5182 = vst.msk [vmem:[#allocation3 + $0x110] sm:$0xff] %vm2769_vm2, %v16536_v29  ;;  %5184 = vst.msk [vmem:[#allocation3 + $0x120] sm:$0xff] %vm2769_vm2, %v16536_v29  ;;  %v14940_v58 = vshrl.u32 %v658_v45, 7 }
 0x226   :  { %5186 = vst.msk [vmem:[#allocation3 + $0x130] sm:$0xff] %vm2769_vm2, %v16536_v29  ;;  %5188 = vst.msk [vmem:[#allocation3 + $0x140] sm:$0xff] %vm2769_vm2, %v16536_v29 }
 0x227   :  { %11686 = vmatmul.mubr.msk.f32.gmra.mrb[2].mxu0 %vm608_vm1, %v14409_v28  ;;  %5298 = vst.msk [vmem:[#allocation3 + $0x20] sm:$0xff] %vm2769_vm2, %v16536_v29  ;;  %5300 = vst.msk [vmem:[#allocation3 + $0x30] sm:$0xff] %vm2769_vm2, %v16536_v29  ;;  %v16535_v28 = vsub.s32 0, %v14940_v58 }
 0x228   :  { %11688 = vmatprep.mubr.msk.f32.mxu0 %vm608_vm1, %v14415_v7  ;;  %5302 = vst.msk [vmem:[#allocation3 + $0x40] sm:$0xff] %vm2769_vm2, %v16536_v29  ;;  %5304 = vst.msk [vmem:[#allocation3 + $0x50] sm:$0xff] %vm2769_vm2, %v16536_v29  ;;  %v14946_v7 = vld [vmem:[%s16490_s2] sm:$0x7] }
 0x229   :  { %5306 = vst.msk [vmem:[#allocation3 + $0x60] sm:$0xff] %vm2769_vm2, %v16536_v29  ;;  %5308 = vst.msk [vmem:[#allocation3 + $0x70] sm:$0xff] %vm2769_vm2, %v16536_v29 }
 0x22a   :  { %5310 = vst.msk [vmem:[#allocation3 + $0x80] sm:$0xff] %vm2769_vm2, %v16536_v29  ;;  %5312 = vst.msk [vmem:[#allocation3 + $0x90] sm:$0xff] %vm2769_vm2, %v16536_v29 }
 0x22b   :  { %11689 = vmatmul.mubr.msk.f32.gmra.mrb[4].mxu0 %vm608_vm1, %v14422_v15  ;;  %5394 = vst.msk [vmem:[#allocation3 + $0xd0] sm:$0xff] %vm2769_vm2, %v16536_v29  ;;  %5396 = vst.msk [vmem:[#allocation3 + $0xe0] sm:$0xff] %vm2769_vm2, %v16536_v29  ;;  %v14951_v15 = vrot.slane %v14946_v7, %v16535_v28 }
 0x22c   :  { %11691 = vmatprep.mubr.msk.f32.mxu0 %vm608_vm1, %v14428_v9  ;;  %5398 = vst.msk [vmem:[#allocation3 + $0xf0] sm:$0xff] %vm2769_vm2, %v16536_v29  ;;  %5400 = vst.msk [vmem:[#allocation3 + $0x100] sm:$0xff] %vm2769_vm2, %v16536_v29 }
 0x22d   :  { %5402 = vst.msk [vmem:[#allocation3 + $0x110] sm:$0xff] %vm2769_vm2, %v16536_v29  ;;  %5404 = vst.msk [vmem:[#allocation3 + $0x120] sm:$0xff] %vm2769_vm2, %v16536_v29 }
 0x22e   :  { %5406 = vst.msk [vmem:[#allocation3 + $0x130] sm:$0xff] %vm2769_vm2, %v16536_v29  ;;  %5408 = vst.msk [vmem:[#allocation3 + $0x140] sm:$0xff] %vm2769_vm2, %v16536_v29 }
 0x22f   :  { %11692 = vmatmul.mubr.msk.f32.gmra.mrb[6].mxu0 %vm608_vm1, %v14435_v63  ;;  %16634 = vst [vmem:[#allocation6_spill] sm:$0xff] %v14940_v58 }
 0x230   :  { %11694 = vmatprep.mubr.msk.f32.mxu0 %vm608_vm1, %v14441_v19 }
 0x233   :  { %11695 = vmatmul.mubr.msk.f32.gmra.mrb[8].mxu0 %vm608_vm1, %v14447_v57 }
 0x234   :  { %11697 = vmatprep.mubr.msk.f32.mxu0 %vm608_vm1, %v14453_v32 }
 0x237   :  { %11698 = vmatmul.mubr.msk.f32.gmra.mrb[10].mxu0 %vm608_vm1, %v14459_v43 }
 0x238   :  { %11700 = vmatprep.mubr.msk.f32.mxu0 %vm608_vm1, %v16632_v14 }
 0x23b   :  { %11701 = vmatmul.mubr.msk.f32.gmra.mrb[12].mxu0 %vm608_vm1, %v16633_v26  ;;  %v16533_v26 = vmov 1.0  }
 0x23c   :  { %11703 = vmatprep.mubr.msk.f32.mxu0 %vm608_vm1, %v2517_v24 }
 0x23f   :  { %11704 = vmatmul.mubr.msk.f32.gmra.mrb[14].mxu0 %vm608_vm1, %v2518_v12 }
 0x240   :  { %11970 = vmatprep.mubr.msk.f32.mxu0 %vm13424_vm3, %v16536_v29 }
 0x2da   :  { %v11918_v9 = vpop.f32.mrb[0].mxu1 }
 0x2db   :  { %v4759_v63 = vpop.f32.mrb[1].mxu1 }
 0x2dc   :  { %v12848_v19 = vadd.f32 %v4759_v63, %v14951_v15 }
 0x2de   :  { %v12673_v57 = vpack.c.bf16 %v16536_v29, %v12848_v19  ;;  %v5010_v32 = vmul.f32 %v12848_v19, %v12848_v19  ;;  %5173 = vst.msk [vmem:[#allocation3 + $0xc8] sm:$0xff] %vm2769_vm2, %v12848_v19  ;;  %v11921_v43 = vpop.f32.mrb[2].mxu1 }
 0x2df   :  { %v4769_v31 = vpop.f32.mrb[3].mxu1 }
 0x2e0   :  { %v12715_v37 = vpack.c.bf16 %v16536_v29, %v5010_v32  ;;  %v12849_v13 = vadd.f32 %v4769_v31, %v14951_v15  ;;  %12674 = vmatpush3.bf16.msra.mxu0 %v12673_v57 }
 0x2e1   :  { %12675 = vmatprep.subr.bf16.mxu0 %v16538_v21 }
 0x2e2   :  { %v12676_v10 = vpack.c.bf16 %v16536_v29, %v12849_v13  ;;  %v5012_v0 = vmul.f32 %v12849_v13, %v12849_v13  ;;  %5175 = vst.msk [vmem:[#allocation3 + $0xd8] sm:$0xff] %vm2769_vm2, %v12849_v13  ;;  %v11924_v5 = vpop.f32.mrb[4].mxu1  ;;  %12716 = vmatpush3.bf16.msra.mxu1 %v12715_v37 }
 0x2e3   :  { %v4779_v11 = vpop.f32.mrb[5].mxu1  ;;  %12717 = vmatprep.subr.bf16.mxu1 %v16538_v21 }
 0x2e4   :  { %v12718_v41 = vpack.c.bf16 %v16536_v29, %v5012_v0  ;;  %v12850_v49 = vadd.f32 %v4779_v11, %v14951_v15  ;;  %12677 = vmatpush3.bf16.msra.mxu0 %v12676_v10 }
 0x2e5   :  { %12678 = vmatprep.subr.bf16.mxu0 %v16538_v21 }
 0x2e6   :  { %v12679_v36 = vpack.c.bf16 %v16536_v29, %v12850_v49  ;;  %v5014_v52 = vmul.f32 %v12850_v49, %v12850_v49  ;;  %5177 = vst.msk [vmem:[#allocation3 + $0xe8] sm:$0xff] %vm2769_vm2, %v12850_v49  ;;  %v11927_v23 = vpop.f32.mrb[6].mxu1  ;;  %12719 = vmatpush3.bf16.msra.mxu1 %v12718_v41 }
 0x2e7   :  { %v4789_v35 = vpop.f32.mrb[7].mxu1  ;;  %12720 = vmatprep.subr.bf16.mxu1 %v16538_v21 }
 0x2e8   :  { %v12721_v55 = vpack.c.bf16 %v16536_v29, %v5014_v52  ;;  %v12851_v60 = vadd.f32 %v4789_v35, %v14951_v15  ;;  %12680 = vmatpush3.bf16.msra.mxu0 %v12679_v36 }
 0x2e9   :  { %12681 = vmatprep.subr.bf16.mxu0 %v16538_v21 }
 0x2ea   :  { %v12682_v2 = vpack.c.bf16 %v16536_v29, %v12851_v60  ;;  %v5016_v53 = vmul.f32 %v12851_v60, %v12851_v60  ;;  %5179 = vst.msk [vmem:[#allocation3 + $0xf8] sm:$0xff] %vm2769_vm2, %v12851_v60  ;;  %v11930_v25 = vpop.f32.mrb[8].mxu1  ;;  %12722 = vmatpush3.bf16.msra.mxu1 %v12721_v55 }
 0x2eb   :  { %v4799_v46 = vpop.f32.mrb[9].mxu1  ;;  %12723 = vmatprep.subr.bf16.mxu1 %v16538_v21 }
 0x2ec   :  { %v12724_v62 = vpack.c.bf16 %v16536_v29, %v5016_v53  ;;  %v12852_v54 = vadd.f32 %v4799_v46, %v14951_v15  ;;  %12683 = vmatpush3.bf16.msra.mxu0 %v12682_v2 }
 0x2ed   :  { %12684 = vmatprep.subr.bf16.mxu0 %v16538_v21 }
 0x2ee   :  { %v12685_v42 = vpack.c.bf16 %v16536_v29, %v12852_v54  ;;  %v5018_v33 = vmul.f32 %v12852_v54, %v12852_v54  ;;  %5181 = vst.msk [vmem:[#allocation3 + $0x108] sm:$0xff] %vm2769_vm2, %v12852_v54  ;;  %v11933_v6 = vpop.f32.mrb[10].mxu1  ;;  %12725 = vmatpush3.bf16.msra.mxu1 %v12724_v62 }
 0x2ef   :  { %v4809_v50 = vpop.f32.mrb[11].mxu1  ;;  %12726 = vmatprep.subr.bf16.mxu1 %v16538_v21 }
 0x2f0   :  { %v12727_v34 = vpack.c.bf16 %v16536_v29, %v5018_v33  ;;  %v12853_v18 = vadd.f32 %v4809_v50, %v14951_v15  ;;  %12686 = vmatpush3.bf16.msra.mxu0 %v12685_v42 }
 0x2f1   :  { %12687 = vmatprep.subr.bf16.mxu0 %v16538_v21 }
 0x2f2   :  { %v12688_v44 = vpack.c.bf16 %v16536_v29, %v12853_v18  ;;  %v5020_v51 = vmul.f32 %v12853_v18, %v12853_v18  ;;  %5183 = vst.msk [vmem:[#allocation3 + $0x118] sm:$0xff] %vm2769_vm2, %v12853_v18  ;;  %v11936_v59 = vpop.f32.mrb[12].mxu1  ;;  %12728 = vmatpush3.bf16.msra.mxu1 %v12727_v34 }
 0x2f3   :  { %v4819_v20 = vpop.f32.mrb[13].mxu1  ;;  %12729 = vmatprep.subr.bf16.mxu1 %v16538_v21  ;;  %v7504_v59 = vld [vmem:[#allocation3 + $0xb7] sm:$0xff] }
 0x2f4   :  { %v12730_v30 = vpack.c.bf16 %v16536_v29, %v5020_v51  ;;  %v12854_v61 = vadd.f32 %v4819_v20, %v14951_v15  ;;  %12689 = vmatpush3.bf16.msra.mxu0 %v12688_v44  ;;  %v7520_v20 = vld [vmem:[%s16491_s3] sm:$0xff] }
 0x2f5   :  { %12690 = vmatprep.subr.bf16.mxu0 %v16538_v21 }
 0x2f6   :  { %v12691_v47 = vpack.c.bf16 %v16536_v29, %v12854_v61  ;;  %v5022_v16 = vmul.f32 %v12854_v61, %v12854_v61  ;;  %5185 = vst.msk [vmem:[#allocation3 + $0x128] sm:$0xff] %vm2769_vm2, %v12854_v61  ;;  %v11684_v8 = vpop.f32.mrb[0].mxu0  ;;  %v11939_v27 = vpop.f32.mrb[14].mxu1  ;;  %12731 = vmatpush3.bf16.msra.mxu1 %v12730_v30  ;;  %v5415_v30 = vld [vmem:[#allocation3 + $0xf] sm:$0xff]  ;;  %v7505_v61 = vld [vmem:[#allocation3 + $0xbf] sm:$0xff] }
 0x2f7   :  { %v2638_v40 = vpop.f32.mrb[1].mxu0  ;;  %v4829_v38 = vpop.f32.mrb[15].mxu1  ;;  %12732 = vmatprep.subr.bf16.mxu1 %v16538_v21 }
 0x2f8   :  { %v12733_v56 = vpack.c.bf16 %v16536_v29, %v5022_v16  ;;  %v12840_v39 = vadd.f32 %v2638_v40, %v14951_v15  ;;  %v12855_v1 = vadd.f32 %v4829_v38, %v14951_v15  ;;  %12692 = vmatpush3.bf16.msra.mxu0 %v12691_v47  ;;  %v10548_v47 = vld [vmem:[%s16491_s3 + $0x8] sm:$0xff]  ;;  %v15064_v16 = vld [vmem:[%s16491_s3 + $0x10] sm:$0xff] }
 0x2f9   :  { %11968 = vmatprep.subr.mxu0 %v16536_v29 }
 0x2fa   :  { %v2753_v22 = vmul.f32 %v12840_v39, %v12840_v39  ;;  %2776 = vst.msk [vmem:[#allocation3 + $0x18] sm:$0xff] %vm2769_vm2, %v12840_v39  ;;  %5187 = vst.msk [vmem:[#allocation3 + $0x138] sm:$0xff] %vm2769_vm2, %v12855_v1  ;;  %v11687_v3 = vpop.f32.mrb[2].mxu0  ;;  %12734 = vmatpush3.bf16.msra.mxu1 %v12733_v56  ;;  %v12694_v17 = vpack.c.bf16 %v16536_v29, %v12840_v39  ;;  %v5024_v48 = vmul.f32 %v12855_v1, %v12855_v1 }
 0x2fb   :  { %v2648_v4 = vpop.f32.mrb[3].mxu0  ;;  %12034 = vmatprep.subr.mxu1 %v16536_v29 }
 0x2fc   :  { %v12841_v14 = vadd.f32 %v2648_v4, %v14951_v15  ;;  %11969 = vmatpush3.msra.mxu0 %v12855_v1  ;;  %v12736_v24 = vpack.c.bf16 %v16536_v29, %v2753_v22 }
 0x2fd   :  { %12693 = vmatprep.subr.bf16.mxu0 %v16538_v21  ;;  %11971 = vmatmul.mubr.f32.vlgmr.msra.gmra.mrb[16].mxu0 %v16533_v26 }
 0x2fe   :  { %v2755_v12 = vmul.f32 %v12841_v14, %v12841_v14  ;;  %2778 = vst.msk [vmem:[#allocation3 + $0x28] sm:$0xff] %vm2769_vm2, %v12841_v14  ;;  %v11690_v45 = vpop.f32.mrb[4].mxu0  ;;  %12695 = vmatpush3.bf16.msra.mxu0 %v12694_v17  ;;  %12035 = vmatpush3.msra.mxu1 %v5024_v48  ;;  %v12697_v63 = vpack.c.bf16 %v16536_v29, %v12841_v14  ;;  %v16532_v14 = vsub.s32 1, %v14940_v58 }
 0x2ff   :  { %v2658_v9 = vpop.f32.mrb[5].mxu0  ;;  %12735 = vmatprep.subr.bf16.mxu1 %v16538_v21  ;;  %12037 = vmatmul.mubr.f32.vlgmr.msra.gmra.mrb[16].mxu1 %v16533_v26 }
 0x300   :  { %v12842_v19 = vadd.f32 %v2658_v9, %v14951_v15  ;;  %12737 = vmatpush3.bf16.msra.mxu1 %v12736_v24  ;;  %12696 = vmatprep.subr.bf16.mxu0 %v16538_v21  ;;  %v12739_v57 = vpack.c.bf16 %v16536_v29, %v2755_v12 }
 0x301   :  { %12738 = vmatprep.subr.bf16.mxu1 %v16538_v21  ;;  %12003 = vmatprep.mubr.msk.f32.mxu0 %vm13424_vm3, %v16536_v29 }
 0x302   :  { %v2757_v32 = vmul.f32 %v12842_v19, %v12842_v19  ;;  %2780 = vst.msk [vmem:[#allocation3 + $0x38] sm:$0xff] %vm2769_vm2, %v12842_v19  ;;  %v11693_v43 = vpop.f32.mrb[6].mxu0  ;;  %12698 = vmatpush3.bf16.msra.mxu0 %v12697_v63  ;;  %12069 = vmatprep.mubr.msk.f32.mxu1 %vm13424_vm3, %v16536_v29  ;;  %v12700_v37 = vpack.c.bf16 %v16536_v29, %v12842_v19  ;;  %v5313_v63 = vld [vmem:[#allocation3 + $0xc8] sm:$0xff]  ;;  %v5315_v19 = vld [vmem:[#allocation3 + $0xd8] sm:$0xff] }
 0x303   :  { %v2668_v31 = vpop.f32.mrb[7].mxu0  ;;  %12699 = vmatprep.subr.bf16.mxu0 %v16538_v21 }
 0x304   :  { %v12843_v13 = vadd.f32 %v2668_v31, %v14951_v15  ;;  %12740 = vmatpush3.bf16.msra.mxu1 %v12739_v57  ;;  %v12742_v10 = vpack.c.bf16 %v16536_v29, %v2757_v32  ;;  %v5317_v57 = vld [vmem:[#allocation3 + $0xe8] sm:$0xff]  ;;  %v5209_v32 = vld [vmem:[#allocation3 + $0x18] sm:$0xff]  ;;  %v16531_v31 = vsub.s32 2, %v14940_v58  ;;  %v15340_v58 = vld [vmem:[%s16491_s3 + $0x20] sm:$0xff] }
 0x305   :  { %12741 = vmatprep.subr.bf16.mxu1 %v16538_v21 }
 0x306   :  { %v2759_v0 = vmul.f32 %v12843_v13, %v12843_v13  ;;  %2782 = vst.msk [vmem:[#allocation3 + $0x48] sm:$0xff] %vm2769_vm2, %v12843_v13  ;;  %v11696_v5 = vpop.f32.mrb[8].mxu0  ;;  %12701 = vmatpush3.bf16.msra.mxu0 %v12700_v37  ;;  %v12703_v41 = vpack.c.bf16 %v16536_v29, %v12843_v13  ;;  %v5319_v37 = vld [vmem:[#allocation3 + $0xf8] sm:$0xff]  ;;  %v5211_v13 = vld [vmem:[#allocation3 + $0x28] sm:$0xff] }
 0x307   :  { %v2678_v11 = vpop.f32.mrb[9].mxu0  ;;  %12702 = vmatprep.subr.bf16.mxu0 %v16538_v21 }
 0x308   :  { %v12844_v49 = vadd.f32 %v2678_v11, %v14951_v15  ;;  %12743 = vmatpush3.bf16.msra.mxu1 %v12742_v10  ;;  %v12745_v36 = vpack.c.bf16 %v16536_v29, %v2759_v0  ;;  %v5321_v11 = vld [vmem:[#allocation3 + $0x108] sm:$0xff] }
 0x309   :  { %12744 = vmatprep.subr.bf16.mxu1 %v16538_v21  ;;  %v5213_v10 = vld [vmem:[#allocation3 + $0x38] sm:$0xff] }
 0x30a   :  { %v2761_v52 = vmul.f32 %v12844_v49, %v12844_v49  ;;  %2784 = vst.msk [vmem:[#allocation3 + $0x58] sm:$0xff] %vm2769_vm2, %v12844_v49  ;;  %v11699_v23 = vpop.f32.mrb[10].mxu0  ;;  %12704 = vmatpush3.bf16.msra.mxu0 %v12703_v41  ;;  %v12706_v55 = vpack.c.bf16 %v16536_v29, %v12844_v49 }
 0x30b   :  { %v2688_v35 = vpop.f32.mrb[11].mxu0  ;;  %12705 = vmatprep.subr.bf16.mxu0 %v16538_v21 }
 0x30c   :  { %v12845_v60 = vadd.f32 %v2688_v35, %v14951_v15  ;;  %12746 = vmatpush3.bf16.msra.mxu1 %v12745_v36  ;;  %v12748_v2 = vpack.c.bf16 %v16536_v29, %v2761_v52 }
 0x30d   :  { %12747 = vmatprep.subr.bf16.mxu1 %v16538_v21  ;;  %v5215_v41 = vld [vmem:[#allocation3 + $0x48] sm:$0xff] }
 0x30e   :  { %v2763_v53 = vmul.f32 %v12845_v60, %v12845_v60  ;;  %2786 = vst.msk [vmem:[#allocation3 + $0x68] sm:$0xff] %vm2769_vm2, %v12845_v60  ;;  %v11702_v25 = vpop.f32.mrb[12].mxu0  ;;  %12707 = vmatpush3.bf16.msra.mxu0 %v12706_v55  ;;  %v12709_v62 = vpack.c.bf16 %v16536_v29, %v12845_v60  ;;  %v5323_v55 = vld [vmem:[#allocation3 + $0x118] sm:$0xff]  ;;  %v5325_v60 = vld [vmem:[#allocation3 + $0x128] sm:$0xff] }
 0x30f   :  { %v2698_v46 = vpop.f32.mrb[13].mxu0  ;;  %12708 = vmatprep.subr.bf16.mxu0 %v16538_v21 }
 0x310   :  { %v12846_v54 = vadd.f32 %v2698_v46, %v14951_v15  ;;  %12749 = vmatpush3.bf16.msra.mxu1 %v12748_v2  ;;  %v12751_v42 = vpack.c.bf16 %v16536_v29, %v2763_v53 }
 0x311   :  { %12750 = vmatprep.subr.bf16.mxu1 %v16538_v21  ;;  %v5217_v49 = vld [vmem:[#allocation3 + $0x58] sm:$0xff] }
 0x312   :  { %v2765_v33 = vmul.f32 %v12846_v54, %v12846_v54  ;;  %2788 = vst.msk [vmem:[#allocation3 + $0x78] sm:$0xff] %vm2769_vm2, %v12846_v54  ;;  %v11705_v6 = vpop.f32.mrb[14].mxu0  ;;  %12710 = vmatpush3.bf16.msra.mxu0 %v12709_v62  ;;  %v12712_v34 = vpack.c.bf16 %v16536_v29, %v12846_v54  ;;  %v5327_v54 = vld [vmem:[#allocation3 + $0x138] sm:$0xff] }
 0x313   :  { %v2708_v50 = vpop.f32.mrb[15].mxu0  ;;  %12711 = vmatprep.subr.bf16.mxu0 %v16538_v21 }
 0x314   :  { %v12847_v18 = vadd.f32 %v2708_v50, %v14951_v15  ;;  %12752 = vmatpush3.bf16.msra.mxu1 %v12751_v42  ;;  %v12754_v44 = vpack.c.bf16 %v16536_v29, %v2765_v33  ;;  %v5414_v15 = vld [vmem:[#allocation3 + $0x7] sm:$0xff] }
 0x315   :  { %12753 = vmatprep.subr.bf16.mxu1 %v16538_v21  ;;  %v5219_v2 = vld [vmem:[#allocation3 + $0x68] sm:$0xff] }
 0x316   :  { %2790 = vst.msk [vmem:[#allocation3 + $0x88] sm:$0xff] %vm2769_vm2, %v12847_v18  ;;  %12713 = vmatpush3.bf16.msra.mxu0 %v12712_v34  ;;  %v2767_v51 = vmul.f32 %v12847_v18, %v12847_v18 }
 0x317   :  { %12001 = vmatprep.subr.mxu0 %v16536_v29 }
 0x318   :  { %12755 = vmatpush3.bf16.msra.mxu1 %v12754_v44 }
 0x319   :  { %12067 = vmatprep.subr.mxu1 %v16536_v29  ;;  %v5221_v42 = vld [vmem:[#allocation3 + $0x78] sm:$0xff] }
 0x31a   :  { %12002 = vmatpush3.msra.mxu0 %v12847_v18 }
 0x31b   :  { %12004 = vmatmul.mubr.f32.vlgmr.msra.gmra.mrb[16].mxu0 %v16533_v26  ;;  %12072 = vmatprep.subr.mxu0 %v7520_v20 }
 0x31c   :  { %12068 = vmatpush3.msra.mxu1 %v2767_v51  ;;  %12074 = vmatprep.mubr.msk.f32.mxu0 %vm2769_vm2, %v5414_v15 }
 0x31d   :  { %12070 = vmatmul.mubr.f32.vlgmr.msra.gmra.mrb[16].mxu1 %v16533_v26  ;;  %12306 = vmatprep.subr.mxu1 %v7520_v20  ;;  %v5223_v33 = vld [vmem:[#allocation3 + $0x88] sm:$0xff] }
 0x31e   :  { %12308 = vmatprep.mubr.msk.f32.mxu1 %vm2769_vm2, %v7504_v59  ;;  %12307 = vmatpush3.msra.mxu1 %v7520_v20 }
 0x31f   :  { %12073 = vmatpush3.msra.mxu0 %v7520_v20  ;;  %12332 = vmatprep.subr.mxu1 %v10548_v47 }
 0x320   :  { %12075 = vmatmul.mubr.msk.f32.vlgmr.msra.gmra.mrb[18].mxu0 %vm2769_vm2, %v5415_v30  ;;  %12098 = vmatprep.subr.mxu0 %v10548_v47 }
 0x321   :  { %12309 = vmatmul.mubr.msk.f32.vlgmr.msra.gmra.mrb[18].mxu1 %vm2769_vm2, %v7505_v61  ;;  %12099 = vmatpush3.msra.mxu0 %v10548_v47 }
 0x322   :  { %12333 = vmatpush3.msra.mxu1 %v10548_v47  ;;  %12124 = vmatprep.subr.mxu0 %v15064_v16 }
 0x323   :  { %12358 = vmatprep.subr.mxu1 %v15064_v16 }
 0x3ee   :  { %v5006_v8 = vpop.f32.mrb[16].mxu0 }
 0x3ef   :  { %v5190_v27 = vmul.f32 0.0078125, %v5006_v8  ;;  %v12005_v40 = vpop.f32.mrb[17].mxu0 }
 0x3f0   :  { %v5162_v38 = vpop.f32.mrb[16].mxu1 }
 0x3f1   :  { %v5192_v56 = vmul.f32 %v5190_v27, %v5190_v27  ;;  %v5191_v39 = vmul.f32 0.0078125, %v5162_v38  ;;  %v12071_v1 = vpop.f32.mrb[17].mxu1 }
 0x3f3   :  { %v5193_v22 = vsub.f32 %v5191_v39, %v5192_v56 }
 0x3f5   :  { %v5194_v3 = vmax.f32 %v5193_v22, 0.0 }
 0x3f7   :  { %v5195_v4 = vadd.f32 1e-05, %v5194_v3 }
 0x3f9   :  { %13415 = vrsqrt.f32 %v5195_v4 }
 0x403   :  { %v13416_v17 = vpop.eup %13415 }
 0x404   :  { %v5198_v48 = vrot.slane %v13416_v17, 7 }
 0x406   :  { %v5200_v24 = vmul.f32 %v5198_v48, %v14946_v7 }
 0x408   :  { %v5202_v12 = vrot.slane %v5200_v24, 1  ;;  %v5228_v45 = vrot.slane %v5200_v24, %v16532_v14  ;;  %v7956_v14 = vld [vmem:[#allocation3 + $0xb9] sm:$0xff] }
 0x40a   :  { %v5204_v9 = vmul.f32 %v5202_v12, %v5190_v27  ;;  %v5229_v0 = vmul.f32 %v5228_v45, %v5209_v32  ;;  %v5329_v5 = vmul.f32 %v5313_v63, %v5228_v45  ;;  %v5231_v52 = vmul.f32 %v5228_v45, %v5211_v13 }
 0x40b   :  { %v5331_v23 = vmul.f32 %v5315_v19, %v5228_v45  ;;  %v5233_v35 = vmul.f32 %v5228_v45, %v5213_v10  ;;  %v5333_v53 = vmul.f32 %v5317_v57, %v5228_v45  ;;  %v5235_v25 = vmul.f32 %v5228_v45, %v5215_v41 }
 0x40c   :  { %v5206_v43 = vrot.slane %v5204_v9, 6  ;;  %v5335_v46 = vmul.f32 %v5319_v37, %v5228_v45  ;;  %v5237_v62 = vmul.f32 %v5228_v45, %v5217_v49  ;;  %v5337_v50 = vmul.f32 %v5321_v11, %v5228_v45 }
 0x40d   :  { %v5239_v34 = vmul.f32 %v5228_v45, %v5219_v2  ;;  %v5339_v18 = vmul.f32 %v5323_v55, %v5228_v45  ;;  %v5341_v44 = vmul.f32 %v5325_v60, %v5228_v45  ;;  %v5243_v51 = vmul.f32 %v5228_v45, %v5223_v33 }
 0x40e   :  { %v5208_v36 = vsub.f32 %v14946_v7, %v5206_v43  ;;  %v5241_v7 = vmul.f32 %v5228_v45, %v5221_v42  ;;  %v5343_v15 = vmul.f32 %v5327_v54, %v5228_v45 }
 0x410   :  { %v5248_v6 = vrot.slane %v5208_v36, %v16531_v31  ;;  %v5867_v31 = vld [vmem:[#allocation3 + $0x9] sm:$0xff] }
 0x412   :  { %v5249_v59 = vadd.f32 %v5248_v6, %v5229_v0  ;;  %v5345_v20 = vadd.f32 %v5329_v5, %v5248_v6  ;;  %v5251_v30 = vadd.f32 %v5248_v6, %v5231_v52  ;;  %v5347_v61 = vadd.f32 %v5331_v23, %v5248_v6 }
 0x413   :  { %v5253_v47 = vadd.f32 %v5248_v6, %v5233_v35  ;;  %v5349_v8 = vadd.f32 %v5333_v53, %v5248_v6  ;;  %v5255_v27 = vadd.f32 %v5248_v6, %v5235_v25  ;;  %v5351_v40 = vadd.f32 %v5335_v46, %v5248_v6 }
 0x414   :  { %v5265_v38 = vmax.f32 %v5249_v59, 0.0  ;;  %v5361_v56 = vmax.f32 %v5345_v20, 0.0  ;;  %v5267_v39 = vmax.f32 %v5251_v30, 0.0  ;;  %v5363_v1 = vmax.f32 %v5347_v61, 0.0  ;;  %v5640_v30 = vld [vmem:[#allocation3 + $0x8] sm:$0xff]  ;;  %v7730_v61 = vld [vmem:[#allocation3 + $0xb8] sm:$0xff] }
 0x415   :  { %v5269_v22 = vmax.f32 %v5253_v47, 0.0  ;;  %v5365_v3 = vmax.f32 %v5349_v8, 0.0  ;;  %v5271_v4 = vmax.f32 %v5255_v27, 0.0  ;;  %v5367_v17 = vmax.f32 %v5351_v40, 0.0  ;;  %v5641_v27 = vld [vmem:[#allocation3 + $0x10] sm:$0xff]  ;;  %v7731_v40 = vld [vmem:[#allocation3 + $0xc0] sm:$0xff] }
 0x416   :  { %5297 = vst.msk [vmem:[#allocation3 + $0x18] sm:$0xff] %vm2769_vm2, %v5265_v38  ;;  %5393 = vst.msk [vmem:[#allocation3 + $0xc8] sm:$0xff] %vm2769_vm2, %v5361_v56  ;;  %v5257_v48 = vadd.f32 %v5248_v6, %v5237_v62  ;;  %v5353_v24 = vadd.f32 %v5337_v50, %v5248_v6  ;;  %v5259_v12 = vadd.f32 %v5248_v6, %v5239_v34 }
 0x417   :  { %5299 = vst.msk [vmem:[#allocation3 + $0x28] sm:$0xff] %vm2769_vm2, %v5267_v39  ;;  %5395 = vst.msk [vmem:[#allocation3 + $0xd8] sm:$0xff] %vm2769_vm2, %v5363_v1  ;;  %v5355_v45 = vadd.f32 %v5339_v18, %v5248_v6  ;;  %v5261_v9 = vadd.f32 %v5248_v6, %v5241_v7  ;;  %v5357_v63 = vadd.f32 %v5341_v44, %v5248_v6  ;;  %v15215_v39 = vld [vmem:[%s16491_s3 + $0x18] sm:$0xff]  ;;  %v15221_v1 = vld [vmem:[#allocation3 + $0x20] sm:$0xff] }
 0x418   :  { %5301 = vst.msk [vmem:[#allocation3 + $0x38] sm:$0xff] %vm2769_vm2, %v5269_v22  ;;  %5397 = vst.msk [vmem:[#allocation3 + $0xe8] sm:$0xff] %vm2769_vm2, %v5365_v3  ;;  %v5263_v19 = vadd.f32 %v5248_v6, %v5243_v51  ;;  %v5359_v57 = vadd.f32 %v5343_v15, %v5248_v6  ;;  %v5273_v32 = vmax.f32 %v5257_v48, 0.0  ;;  %v5369_v43 = vmax.f32 %v5353_v24, 0.0  ;;  %v15223_v22 = vld [vmem:[#allocation3 + $0xd0] sm:$0xff] }
 0x419   :  { %5303 = vst.msk [vmem:[#allocation3 + $0x48] sm:$0xff] %vm2769_vm2, %v5271_v4  ;;  %5399 = vst.msk [vmem:[#allocation3 + $0xf8] sm:$0xff] %vm2769_vm2, %v5367_v17  ;;  %v5275_v37 = vmax.f32 %v5259_v12, 0.0  ;;  %v5371_v13 = vmax.f32 %v5355_v45, 0.0  ;;  %v5277_v10 = vmax.f32 %v5261_v9, 0.0  ;;  %v5373_v0 = vmax.f32 %v5357_v63, 0.0 }
 0x41a   :  { %v5279_v5 = vmax.f32 %v5263_v19, 0.0  ;;  %v5375_v11 = vmax.f32 %v5359_v57, 0.0  ;;  %5305 = vst.msk [vmem:[#allocation3 + $0x58] sm:$0xff] %vm2769_vm2, %v5273_v32  ;;  %5401 = vst.msk [vmem:[#allocation3 + $0x108] sm:$0xff] %vm2769_vm2, %v5369_v43  ;;  %v15243_v17 = vld [vmem:[#allocation3 + $0xe0] sm:$0xff]  ;;  %v15259_v45 = vld [vmem:[#allocation3 + $0xf0] sm:$0xff] }
 0x41b   :  { %5307 = vst.msk [vmem:[#allocation3 + $0x68] sm:$0xff] %vm2769_vm2, %v5275_v37  ;;  %5403 = vst.msk [vmem:[#allocation3 + $0x118] sm:$0xff] %vm2769_vm2, %v5371_v13  ;;  %v15257_v12 = vld [vmem:[#allocation3 + $0x40] sm:$0xff]  ;;  %v15273_v19 = vld [vmem:[#allocation3 + $0x50] sm:$0xff] }
 0x41c   :  { %5309 = vst.msk [vmem:[#allocation3 + $0x78] sm:$0xff] %vm2769_vm2, %v5277_v10  ;;  %5405 = vst.msk [vmem:[#allocation3 + $0x128] sm:$0xff] %vm2769_vm2, %v5373_v0  ;;  %v15275_v57 = vld [vmem:[#allocation3 + $0x100] sm:$0xff]  ;;  %v15291_v13 = vld [vmem:[#allocation3 + $0x110] sm:$0xff] }
 0x41d   :  { %5311 = vst.msk [vmem:[#allocation3 + $0x88] sm:$0xff] %vm2769_vm2, %v5279_v5  ;;  %5407 = vst.msk [vmem:[#allocation3 + $0x138] sm:$0xff] %vm2769_vm2, %v5375_v11  ;;  %v15092_v41 = vld [vmem:[#allocation3 + $0x17] sm:$0xff]  ;;  %v15094_v49 = vld [vmem:[#allocation3 + $0xc7] sm:$0xff] }
 0x41e   :  { %v15096_v36 = vld [vmem:[#allocation3 + $0x1f] sm:$0xff]  ;;  %12077 = vmatprep.mubr.msk.f32.mxu0 %vm2769_vm2, %v15092_v41  ;;  %12311 = vmatprep.mubr.msk.f32.mxu1 %vm2769_vm2, %v15094_v49  ;;  %v15102_v52 = vld [vmem:[#allocation3 + $0xcf] sm:$0xff]  ;;  %v15108_v23 = vld [vmem:[#allocation3 + $0x27] sm:$0xff] }
 0x41f   :  { %12078 = vmatmul.mubr.msk.f32.gmra.mrb[20].mxu0 %vm2769_vm2, %v15096_v36  ;;  %12312 = vmatmul.mubr.msk.f32.gmra.mrb[20].mxu1 %vm2769_vm2, %v15102_v52  ;;  %v15110_v35 = vld [vmem:[#allocation3 + $0xd7] sm:$0xff]  ;;  %v15116_v55 = vld [vmem:[#allocation3 + $0x2f] sm:$0xff]  ;;  %v15118_v60 = vld [vmem:[#allocation3 + $0xdf] sm:$0xff] }
 0x420   :  { %12080 = vmatprep.mubr.msk.f32.mxu0 %vm2769_vm2, %v15108_v23  ;;  %12314 = vmatprep.mubr.msk.f32.mxu1 %vm2769_vm2, %v15110_v35  ;;  %v15124_v2 = vld [vmem:[#allocation3 + $0x37] sm:$0xff]  ;;  %v15126_v53 = vld [vmem:[#allocation3 + $0xe7] sm:$0xff]  ;;  %v15132_v25 = vld [vmem:[#allocation3 + $0x3f] sm:$0xff] }
 0x421   :  { %v15134_v46 = vld [vmem:[#allocation3 + $0xef] sm:$0xff]  ;;  %v15140_v62 = vld [vmem:[#allocation3 + $0x47] sm:$0xff]  ;;  %v15142_v54 = vld [vmem:[#allocation3 + $0xf7] sm:$0xff] }
 0x422   :  { %v15148_v42 = vld [vmem:[#allocation3 + $0x4f] sm:$0xff]  ;;  %v15150_v33 = vld [vmem:[#allocation3 + $0xff] sm:$0xff]  ;;  %v15156_v6 = vld [vmem:[#allocation3 + $0x57] sm:$0xff] }
 0x423   :  { %12081 = vmatmul.mubr.msk.f32.gmra.mrb[22].mxu0 %vm2769_vm2, %v15116_v55  ;;  %12315 = vmatmul.mubr.msk.f32.gmra.mrb[22].mxu1 %vm2769_vm2, %v15118_v60  ;;  %v15158_v50 = vld [vmem:[#allocation3 + $0x107] sm:$0xff]  ;;  %v15164_v34 = vld [vmem:[#allocation3 + $0x5f] sm:$0xff]  ;;  %v15166_v18 = vld [vmem:[#allocation3 + $0x10f] sm:$0xff] }
 0x424   :  { %12083 = vmatprep.mubr.msk.f32.mxu0 %vm2769_vm2, %v15124_v2  ;;  %12317 = vmatprep.mubr.msk.f32.mxu1 %vm2769_vm2, %v15126_v53  ;;  %v15172_v7 = vld [vmem:[#allocation3 + $0x67] sm:$0xff]  ;;  %v15174_v44 = vld [vmem:[#allocation3 + $0x117] sm:$0xff]  ;;  %v15180_v51 = vld [vmem:[#allocation3 + $0x6f] sm:$0xff] }
 0x425   :  { %v15182_v15 = vld [vmem:[#allocation3 + $0x11f] sm:$0xff]  ;;  %v15188_v59 = vld [vmem:[#allocation3 + $0x77] sm:$0xff]  ;;  %v15190_v20 = vld [vmem:[#allocation3 + $0x127] sm:$0xff] }
 0x426   :  { %v15196_v47 = vld [vmem:[#allocation3 + $0x7f] sm:$0xff]  ;;  %v15198_v8 = vld [vmem:[#allocation3 + $0x12f] sm:$0xff] }
 0x427   :  { %12084 = vmatmul.mubr.msk.f32.gmra.mrb[24].mxu0 %vm2769_vm2, %v15132_v25  ;;  %12318 = vmatmul.mubr.msk.f32.gmra.mrb[24].mxu1 %vm2769_vm2, %v15134_v46  ;;  %v15208_v38 = vld [vmem:[#allocation3 + $0x18] sm:$0xff]  ;;  %v15210_v56 = vld [vmem:[#allocation3 + $0xc8] sm:$0xff]  ;;  %v15289_v37 = vld [vmem:[#allocation3 + $0x60] sm:$0xff] }
 0x428   :  { %12086 = vmatprep.mubr.msk.f32.mxu0 %vm2769_vm2, %v15140_v62  ;;  %12320 = vmatprep.mubr.msk.f32.mxu1 %vm2769_vm2, %v15142_v54  ;;  %v15233_v3 = vld [vmem:[#allocation3 + $0x28] sm:$0xff]  ;;  %v15235_v4 = vld [vmem:[#allocation3 + $0xd8] sm:$0xff]  ;;  %v15305_v5 = vld [vmem:[#allocation3 + $0x70] sm:$0xff] }
 0x429   :  { %v15249_v48 = vld [vmem:[#allocation3 + $0x38] sm:$0xff]  ;;  %v15251_v24 = vld [vmem:[#allocation3 + $0xe8] sm:$0xff]  ;;  %v15307_v11 = vld [vmem:[#allocation3 + $0x120] sm:$0xff] }
 0x42a   :  { %v15265_v9 = vld [vmem:[#allocation3 + $0x48] sm:$0xff]  ;;  %v15267_v63 = vld [vmem:[#allocation3 + $0xf8] sm:$0xff] }
 0x42b   :  { %12087 = vmatmul.mubr.msk.f32.gmra.mrb[26].mxu0 %vm2769_vm2, %v15148_v42  ;;  %12321 = vmatmul.mubr.msk.f32.gmra.mrb[26].mxu1 %vm2769_vm2, %v15150_v33  ;;  %v15281_v32 = vld [vmem:[#allocation3 + $0x58] sm:$0xff]  ;;  %v15283_v43 = vld [vmem:[#allocation3 + $0x108] sm:$0xff] }
 0x42c   :  { %12089 = vmatprep.mubr.msk.f32.mxu0 %vm2769_vm2, %v15156_v6  ;;  %12323 = vmatprep.mubr.msk.f32.mxu1 %vm2769_vm2, %v15158_v50  ;;  %v15297_v10 = vld [vmem:[#allocation3 + $0x68] sm:$0xff]  ;;  %v15299_v0 = vld [vmem:[#allocation3 + $0x118] sm:$0xff] }
 0x42d   :  { %v5868_v26 = vld [vmem:[#allocation3 + $0x11] sm:$0xff]  ;;  %v7957_v28 = vld [vmem:[#allocation3 + $0xc1] sm:$0xff]  ;;  %v15333_v29 = vld [vmem:[#allocation3 + $0x19] sm:$0xff] }
 0x42e   :  { %v15335_v21 = vld [vmem:[#allocation3 + $0xc9] sm:$0xff] }
 0x42f   :  { %12090 = vmatmul.mubr.msk.f32.gmra.mrb[28].mxu0 %vm2769_vm2, %v15164_v34  ;;  %12324 = vmatmul.mubr.msk.f32.gmra.mrb[28].mxu1 %vm2769_vm2, %v15166_v18  ;;  %16637 = vst [vmem:[#allocation9_spill] sm:$0xff] %v15335_v21 }
 0x430   :  { %12092 = vmatprep.mubr.msk.f32.mxu0 %vm2769_vm2, %v15172_v7  ;;  %12326 = vmatprep.mubr.msk.f32.mxu1 %vm2769_vm2, %v15174_v44 }
 0x433   :  { %12093 = vmatmul.mubr.msk.f32.gmra.mrb[30].mxu0 %vm2769_vm2, %v15180_v51  ;;  %12327 = vmatmul.mubr.msk.f32.gmra.mrb[30].mxu1 %vm2769_vm2, %v15182_v15 }
 0x434   :  { %12095 = vmatprep.mubr.msk.f32.mxu0 %vm2769_vm2, %v15188_v59  ;;  %12329 = vmatprep.mubr.msk.f32.mxu1 %vm2769_vm2, %v15190_v20 }
 0x437   :  { %12096 = vmatmul.mubr.msk.f32.gmra.mrb[32].mxu0 %vm2769_vm2, %v15196_v47  ;;  %12330 = vmatmul.mubr.msk.f32.gmra.mrb[32].mxu1 %vm2769_vm2, %v15198_v8 }
 0x438   :  { %12100 = vmatprep.mubr.msk.f32.mxu0 %vm2769_vm2, %v5640_v30  ;;  %12334 = vmatprep.mubr.msk.f32.mxu1 %vm2769_vm2, %v7730_v61  ;;  %v15313_v30 = vld [vmem:[#allocation3 + $0x78] sm:$0xff]  ;;  %v15315_v61 = vld [vmem:[#allocation3 + $0x128] sm:$0xff] }
 0x43b   :  { %12101 = vmatmul.mubr.msk.f32.vlgmr.msra.gmra.mrb[18].mxu0 %vm2769_vm2, %v5641_v27  ;;  %12335 = vmatmul.mubr.msk.f32.vlgmr.msra.gmra.mrb[18].mxu1 %vm2769_vm2, %v7731_v40  ;;  %v15321_v27 = vld [vmem:[#allocation3 + $0x80] sm:$0xff]  ;;  %v15323_v40 = vld [vmem:[#allocation3 + $0x130] sm:$0xff] }
 0x43c   :  { %12103 = vmatprep.mubr.msk.f32.mxu0 %vm2769_vm2, %v15208_v38  ;;  %12337 = vmatprep.mubr.msk.f32.mxu1 %vm2769_vm2, %v15210_v56  ;;  %16635 = vst [vmem:[#allocation7_spill] sm:$0xff] %v15321_v27  ;;  %16636 = vst [vmem:[#allocation8_spill] sm:$0xff] %v15323_v40 }
 0x43d   :  { %12359 = vmatpush3.msra.mxu1 %v15064_v16  ;;  %12125 = vmatpush3.msra.mxu0 %v15064_v16  ;;  %v15241_v16 = vld [vmem:[#allocation3 + $0x30] sm:$0xff] }
 0x43e   :  { %12384 = vmatprep.subr.mxu1 %v15215_v39  ;;  %12150 = vmatprep.subr.mxu0 %v15215_v39 }
 0x43f   :  { %12104 = vmatmul.mubr.msk.f32.gmra.mrb[20].mxu0 %vm2769_vm2, %v15221_v1  ;;  %12338 = vmatmul.mubr.msk.f32.gmra.mrb[20].mxu1 %vm2769_vm2, %v15223_v22 }
 0x440   :  { %12106 = vmatprep.mubr.msk.f32.mxu0 %vm2769_vm2, %v15233_v3  ;;  %12340 = vmatprep.mubr.msk.f32.mxu1 %vm2769_vm2, %v15235_v4 }
 0x443   :  { %12107 = vmatmul.mubr.msk.f32.gmra.mrb[22].mxu0 %vm2769_vm2, %v15241_v16  ;;  %12341 = vmatmul.mubr.msk.f32.gmra.mrb[22].mxu1 %vm2769_vm2, %v15243_v17 }
 0x444   :  { %12109 = vmatprep.mubr.msk.f32.mxu0 %vm2769_vm2, %v15249_v48  ;;  %12343 = vmatprep.mubr.msk.f32.mxu1 %vm2769_vm2, %v15251_v24 }
 0x447   :  { %12110 = vmatmul.mubr.msk.f32.gmra.mrb[24].mxu0 %vm2769_vm2, %v15257_v12  ;;  %12344 = vmatmul.mubr.msk.f32.gmra.mrb[24].mxu1 %vm2769_vm2, %v15259_v45 }
 0x448   :  { %12112 = vmatprep.mubr.msk.f32.mxu0 %vm2769_vm2, %v15265_v9  ;;  %12346 = vmatprep.mubr.msk.f32.mxu1 %vm2769_vm2, %v15267_v63 }
 0x44b   :  { %12113 = vmatmul.mubr.msk.f32.gmra.mrb[26].mxu0 %vm2769_vm2, %v15273_v19  ;;  %12347 = vmatmul.mubr.msk.f32.gmra.mrb[26].mxu1 %vm2769_vm2, %v15275_v57 }
 0x44c   :  { %12115 = vmatprep.mubr.msk.f32.mxu0 %vm2769_vm2, %v15281_v32  ;;  %12349 = vmatprep.mubr.msk.f32.mxu1 %vm2769_vm2, %v15283_v43 }
 0x44f   :  { %12116 = vmatmul.mubr.msk.f32.gmra.mrb[28].mxu0 %vm2769_vm2, %v15289_v37  ;;  %12350 = vmatmul.mubr.msk.f32.gmra.mrb[28].mxu1 %vm2769_vm2, %v15291_v13 }
 0x450   :  { %12118 = vmatprep.mubr.msk.f32.mxu0 %vm2769_vm2, %v15297_v10  ;;  %12352 = vmatprep.mubr.msk.f32.mxu1 %vm2769_vm2, %v15299_v0 }
 0x453   :  { %12119 = vmatmul.mubr.msk.f32.gmra.mrb[30].mxu0 %vm2769_vm2, %v15305_v5  ;;  %12353 = vmatmul.mubr.msk.f32.gmra.mrb[30].mxu1 %vm2769_vm2, %v15307_v11 }
 0x454   :  { %12121 = vmatprep.mubr.msk.f32.mxu0 %vm2769_vm2, %v15313_v30  ;;  %12355 = vmatprep.mubr.msk.f32.mxu1 %vm2769_vm2, %v15315_v61 }
 0x457   :  { %12122 = vmatmul.mubr.msk.f32.gmra.mrb[32].mxu0 %vm2769_vm2, %v15321_v27  ;;  %12356 = vmatmul.mubr.msk.f32.gmra.mrb[32].mxu1 %vm2769_vm2, %v15323_v40 }
 0x458   :  { %12126 = vmatprep.mubr.msk.f32.mxu0 %vm2769_vm2, %v5867_v31  ;;  %12360 = vmatprep.mubr.msk.f32.mxu1 %vm2769_vm2, %v7956_v14  ;;  %v15358_v14 = vld [vmem:[#allocation3 + $0x29] sm:$0xff]  ;;  %v15360_v31 = vld [vmem:[#allocation3 + $0xd9] sm:$0xff] }
 0x459   :  { %16640 = vst [vmem:[#allocation12_spill] sm:$0xff] %v15358_v14  ;;  %16641 = vst [vmem:[#allocation13_spill] sm:$0xff] %v15360_v31 }
 0x45b   :  { %12127 = vmatmul.mubr.msk.f32.vlgmr.msra.gmra.mrb[18].mxu0 %vm2769_vm2, %v5868_v26  ;;  %12361 = vmatmul.mubr.msk.f32.vlgmr.msra.gmra.mrb[18].mxu1 %vm2769_vm2, %v7957_v28  ;;  %v15348_v28 = vld [vmem:[#allocation3 + $0x21] sm:$0xff]  ;;  %v15350_v26 = vld [vmem:[#allocation3 + $0xd1] sm:$0xff] }
 0x45c   :  { %12129 = vmatprep.mubr.msk.f32.mxu0 %vm2769_vm2, %v15333_v29  ;;  %12363 = vmatprep.mubr.msk.f32.mxu1 %vm2769_vm2, %v15335_v21  ;;  %16638 = vst [vmem:[#allocation10_spill] sm:$0xff] %v15348_v28  ;;  %16639 = vst [vmem:[#allocation11_spill] sm:$0xff] %v15350_v26  ;;  %v15368_v21 = vld [vmem:[#allocation3 + $0xe1] sm:$0xff] }
 0x45d   :  { %12385 = vmatpush3.msra.mxu1 %v15215_v39  ;;  %12151 = vmatpush3.msra.mxu0 %v15215_v39  ;;  %v15366_v39 = vld [vmem:[#allocation3 + $0x31] sm:$0xff]  ;;  %16643 = vst [vmem:[#allocation15_spill] sm:$0xff] %v15368_v21 }
 0x45e   :  { %12410 = vmatprep.subr.mxu1 %v15340_v58  ;;  %12176 = vmatprep.subr.mxu0 %v15340_v58  ;;  %16642 = vst [vmem:[#allocation14_spill] sm:$0xff] %v15366_v39 }
 0x45f   :  { %12130 = vmatmul.mubr.msk.f32.gmra.mrb[20].mxu0 %vm2769_vm2, %v15348_v28  ;;  %12364 = vmatmul.mubr.msk.f32.gmra.mrb[20].mxu1 %vm2769_vm2, %v15350_v26  ;;  %v15374_v26 = vld [vmem:[#allocation3 + $0x39] sm:$0xff]  ;;  %v15376_v28 = vld [vmem:[#allocation3 + $0xe9] sm:$0xff] }
 0x460   :  { %12132 = vmatprep.mubr.msk.f32.mxu0 %vm2769_vm2, %v15358_v14  ;;  %12366 = vmatprep.mubr.msk.f32.mxu1 %vm2769_vm2, %v15360_v31  ;;  %16644 = vst [vmem:[#allocation16_spill] sm:$0xff] %v15374_v26  ;;  %16645 = vst [vmem:[#allocation17_spill] sm:$0xff] %v15376_v28  ;;  %v15382_v31 = vld [vmem:[#allocation3 + $0x41] sm:$0xff]  ;;  %v15384_v14 = vld [vmem:[#allocation3 + $0xf1] sm:$0xff] }
 0x461   :  { %16646 = vst [vmem:[#allocation18_spill] sm:$0xff] %v15382_v31  ;;  %16647 = vst [vmem:[#allocation19_spill] sm:$0xff] %v15384_v14 }
 0x463   :  { %12133 = vmatmul.mubr.msk.f32.gmra.mrb[22].mxu0 %vm2769_vm2, %v15366_v39  ;;  %12367 = vmatmul.mubr.msk.f32.gmra.mrb[22].mxu1 %vm2769_vm2, %v15368_v21  ;;  %v15390_v21 = vld [vmem:[#allocation3 + $0x49] sm:$0xff]  ;;  %v15392_v39 = vld [vmem:[#allocation3 + $0xf9] sm:$0xff] }
 0x464   :  { %12135 = vmatprep.mubr.msk.f32.mxu0 %vm2769_vm2, %v15374_v26  ;;  %12369 = vmatprep.mubr.msk.f32.mxu1 %vm2769_vm2, %v15376_v28  ;;  %16648 = vst [vmem:[#allocation20_spill] sm:$0xff] %v15390_v21  ;;  %16649 = vst [vmem:[#allocation21_spill] sm:$0xff] %v15392_v39  ;;  %v15398_v28 = vld [vmem:[#allocation3 + $0x51] sm:$0xff]  ;;  %v15400_v26 = vld [vmem:[#allocation3 + $0x101] sm:$0xff] }
 0x465   :  { %16650 = vst [vmem:[#allocation22_spill] sm:$0xff] %v15398_v28  ;;  %16651 = vst [vmem:[#allocation4_spill] sm:$0xff] %v15400_v26 }
 0x467   :  { %12136 = vmatmul.mubr.msk.f32.gmra.mrb[24].mxu0 %vm2769_vm2, %v15382_v31  ;;  %12370 = vmatmul.mubr.msk.f32.gmra.mrb[24].mxu1 %vm2769_vm2, %v15384_v14  ;;  %v15406_v14 = vld [vmem:[#allocation3 + $0x59] sm:$0xff]  ;;  %v15408_v31 = vld [vmem:[#allocation3 + $0x109] sm:$0xff] }
 0x468   :  { %12138 = vmatprep.mubr.msk.f32.mxu0 %vm2769_vm2, %v15390_v21  ;;  %12372 = vmatprep.mubr.msk.f32.mxu1 %vm2769_vm2, %v15392_v39  ;;  %16652 = vst [vmem:[#allocation5_spill] sm:$0xff] %v15406_v14  ;;  %16653 = vst [vmem:[#allocation23_spill] sm:$0xff] %v15408_v31  ;;  %v15414_v39 = vld [vmem:[#allocation3 + $0x61] sm:$0xff]  ;;  %v15416_v21 = vld [vmem:[#allocation3 + $0x111] sm:$0xff] }
 0x469   :  { %16654 = vst [vmem:[#allocation24_spill] sm:$0xff] %v15414_v39  ;;  %16655 = vst [vmem:[#allocation25_spill] sm:$0xff] %v15416_v21 }
 0x46b   :  { %12139 = vmatmul.mubr.msk.f32.gmra.mrb[26].mxu0 %vm2769_vm2, %v15398_v28  ;;  %12373 = vmatmul.mubr.msk.f32.gmra.mrb[26].mxu1 %vm2769_vm2, %v15400_v26  ;;  %v15422_v26 = vld [vmem:[#allocation3 + $0x69] sm:$0xff]  ;;  %v15424_v28 = vld [vmem:[#allocation3 + $0x119] sm:$0xff] }
 0x46c   :  { %12141 = vmatprep.mubr.msk.f32.mxu0 %vm2769_vm2, %v15406_v14  ;;  %12375 = vmatprep.mubr.msk.f32.mxu1 %vm2769_vm2, %v15408_v31  ;;  %16656 = vst [vmem:[#allocation26_spill] sm:$0xff] %v15422_v26  ;;  %16657 = vst [vmem:[#allocation27_spill] sm:$0xff] %v15424_v28  ;;  %v15430_v31 = vld [vmem:[#allocation3 + $0x71] sm:$0xff]  ;;  %v15432_v14 = vld [vmem:[#allocation3 + $0x121] sm:$0xff] }
 0x46d   :  { %16658 = vst [vmem:[#allocation28_spill] sm:$0xff] %v15432_v14 }
 0x46f   :  { %12142 = vmatmul.mubr.msk.f32.gmra.mrb[28].mxu0 %vm2769_vm2, %v15414_v39  ;;  %12376 = vmatmul.mubr.msk.f32.gmra.mrb[28].mxu1 %vm2769_vm2, %v15416_v21  ;;  %v15438_v21 = vld [vmem:[#allocation3 + $0x79] sm:$0xff]  ;;  %v15440_v39 = vld [vmem:[#allocation3 + $0x129] sm:$0xff] }
 0x470   :  { %12144 = vmatprep.mubr.msk.f32.mxu0 %vm2769_vm2, %v15422_v26  ;;  %12378 = vmatprep.mubr.msk.f32.mxu1 %vm2769_vm2, %v15424_v28  ;;  %16659 = vst [vmem:[#allocation29_spill] sm:$0xff] %v15438_v21  ;;  %16660 = vst [vmem:[#allocation30_spill] sm:$0xff] %v15440_v39  ;;  %v15446_v28 = vld [vmem:[#allocation3 + $0x81] sm:$0xff]  ;;  %v15448_v26 = vld [vmem:[#allocation3 + $0x131] sm:$0xff] }
 0x473   :  { %12145 = vmatmul.mubr.msk.f32.gmra.mrb[30].mxu0 %vm2769_vm2, %v15430_v31  ;;  %12379 = vmatmul.mubr.msk.f32.gmra.mrb[30].mxu1 %vm2769_vm2, %v15432_v14 }
 0x474   :  { %12147 = vmatprep.mubr.msk.f32.mxu0 %vm2769_vm2, %v15438_v21  ;;  %12381 = vmatprep.mubr.msk.f32.mxu1 %vm2769_vm2, %v15440_v39  ;;  %v10616_v39 = vld [vmem:[%s16491_s3 + $0x28] sm:$0xff] }
 0x477   :  { %12148 = vmatmul.mubr.msk.f32.gmra.mrb[32].mxu0 %vm2769_vm2, %v15446_v28  ;;  %12382 = vmatmul.mubr.msk.f32.gmra.mrb[32].mxu1 %vm2769_vm2, %v15448_v26 }
 0x478   :  { %12152 = vmatprep.mubr.msk.f32.mxu0 %vm2769_vm2, %v15092_v41  ;;  %12386 = vmatprep.mubr.msk.f32.mxu1 %vm2769_vm2, %v15094_v49  ;;  %v15517_v41 = vld [vmem:[#allocation3 + $0x137] sm:$0xff]  ;;  %v15523_v49 = vld [vmem:[#allocation3 + $0x8f] sm:$0xff] }
 0x47b   :  { %12153 = vmatmul.mubr.msk.f32.vlgmr.msra.gmra.mrb[18].mxu0 %vm2769_vm2, %v15096_v36  ;;  %12387 = vmatmul.mubr.msk.f32.vlgmr.msra.gmra.mrb[18].mxu1 %vm2769_vm2, %v15102_v52  ;;  %v15525_v36 = vld [vmem:[#allocation3 + $0x13f] sm:$0xff] }
 0x47c   :  { %12155 = vmatprep.mubr.msk.f32.mxu0 %vm2769_vm2, %v15108_v23  ;;  %12389 = vmatprep.mubr.msk.f32.mxu1 %vm2769_vm2, %v15110_v35  ;;  %v10633_v52 = vld [vmem:[%s16491_s3 + $0x30] sm:$0xff] }
 0x47d   :  { %12411 = vmatpush3.msra.mxu1 %v15340_v58  ;;  %12177 = vmatpush3.msra.mxu0 %v15340_v58  ;;  %v15515_v58 = vld [vmem:[#allocation3 + $0x87] sm:$0xff] }
 0x47e   :  { %12436 = vmatprep.subr.mxu1 %v10616_v39  ;;  %12202 = vmatprep.subr.mxu0 %v10616_v39 }
 0x47f   :  { %12156 = vmatmul.mubr.msk.f32.gmra.mrb[20].mxu0 %vm2769_vm2, %v15116_v55  ;;  %12390 = vmatmul.mubr.msk.f32.gmra.mrb[20].mxu1 %vm2769_vm2, %v15118_v60 }
 0x480   :  { %12158 = vmatprep.mubr.msk.f32.mxu0 %vm2769_vm2, %v15124_v2  ;;  %12392 = vmatprep.mubr.msk.f32.mxu1 %vm2769_vm2, %v15126_v53 }
 0x483   :  { %12159 = vmatmul.mubr.msk.f32.gmra.mrb[22].mxu0 %vm2769_vm2, %v15132_v25  ;;  %12393 = vmatmul.mubr.msk.f32.gmra.mrb[22].mxu1 %vm2769_vm2, %v15134_v46 }
 0x484   :  { %12161 = vmatprep.mubr.msk.f32.mxu0 %vm2769_vm2, %v15140_v62  ;;  %12395 = vmatprep.mubr.msk.f32.mxu1 %vm2769_vm2, %v15142_v54 }
 0x487   :  { %12162 = vmatmul.mubr.msk.f32.gmra.mrb[24].mxu0 %vm2769_vm2, %v15148_v42  ;;  %12396 = vmatmul.mubr.msk.f32.gmra.mrb[24].mxu1 %vm2769_vm2, %v15150_v33 }
 0x488   :  { %12164 = vmatprep.mubr.msk.f32.mxu0 %vm2769_vm2, %v15156_v6  ;;  %12398 = vmatprep.mubr.msk.f32.mxu1 %vm2769_vm2, %v15158_v50 }
 0x48b   :  { %12165 = vmatmul.mubr.msk.f32.gmra.mrb[26].mxu0 %vm2769_vm2, %v15164_v34  ;;  %12399 = vmatmul.mubr.msk.f32.gmra.mrb[26].mxu1 %vm2769_vm2, %v15166_v18 }
 0x48c   :  { %12167 = vmatprep.mubr.msk.f32.mxu0 %vm2769_vm2, %v15172_v7  ;;  %12401 = vmatprep.mubr.msk.f32.mxu1 %vm2769_vm2, %v15174_v44 }
 0x48f   :  { %12168 = vmatmul.mubr.msk.f32.gmra.mrb[28].mxu0 %vm2769_vm2, %v15180_v51  ;;  %12402 = vmatmul.mubr.msk.f32.gmra.mrb[28].mxu1 %vm2769_vm2, %v15182_v15 }
 0x490   :  { %12170 = vmatprep.mubr.msk.f32.mxu0 %vm2769_vm2, %v15188_v59  ;;  %12404 = vmatprep.mubr.msk.f32.mxu1 %vm2769_vm2, %v15190_v20 }
 0x493   :  { %12171 = vmatmul.mubr.msk.f32.gmra.mrb[30].mxu0 %vm2769_vm2, %v15196_v47  ;;  %12405 = vmatmul.mubr.msk.f32.gmra.mrb[30].mxu1 %vm2769_vm2, %v15198_v8 }
 0x494   :  { %12173 = vmatprep.mubr.msk.f32.mxu0 %vm2769_vm2, %v15515_v58  ;;  %12407 = vmatprep.mubr.msk.f32.mxu1 %vm2769_vm2, %v15517_v41 }
 0x497   :  { %12174 = vmatmul.mubr.msk.f32.gmra.mrb[32].mxu0 %vm2769_vm2, %v15523_v49  ;;  %12408 = vmatmul.mubr.msk.f32.gmra.mrb[32].mxu1 %vm2769_vm2, %v15525_v36 }
 0x498   :  { %12178 = vmatprep.mubr.msk.f32.mxu0 %vm2769_vm2, %v15208_v38  ;;  %12412 = vmatprep.mubr.msk.f32.mxu1 %vm2769_vm2, %v15210_v56  ;;  %v15590_v38 = vld [vmem:[#allocation3 + $0x88] sm:$0xff]  ;;  %v15592_v56 = vld [vmem:[#allocation3 + $0x138] sm:$0xff] }
 0x499   :  { %16661 = vst [vmem:[#allocation31_spill] sm:$0xff] %v15590_v38  ;;  %16662 = vst [vmem:[#allocation32_spill] sm:$0xff] %v15592_v56 }
 0x49b   :  { %12179 = vmatmul.mubr.msk.f32.vlgmr.msra.gmra.mrb[18].mxu0 %vm2769_vm2, %v15221_v1  ;;  %12413 = vmatmul.mubr.msk.f32.vlgmr.msra.gmra.mrb[18].mxu1 %vm2769_vm2, %v15223_v22  ;;  %v15598_v1 = vld [vmem:[#allocation3 + $0x90] sm:$0xff]  ;;  %v15600_v22 = vld [vmem:[#allocation3 + $0x140] sm:$0xff] }
 0x49c   :  { %12181 = vmatprep.mubr.msk.f32.mxu0 %vm2769_vm2, %v15233_v3  ;;  %12415 = vmatprep.mubr.msk.f32.mxu1 %vm2769_vm2, %v15235_v4  ;;  %16663 = vst [vmem:[#allocation33_spill] sm:$0xff] %v15598_v1  ;;  %16664 = vst [vmem:[#allocation34_spill] sm:$0xff] %v15600_v22 }
 0x49d   :  { %12437 = vmatpush3.msra.mxu1 %v10616_v39  ;;  %12203 = vmatpush3.msra.mxu0 %v10616_v39  ;;  %v16665_v39 = vld [vmem:[#allocation9_spill] sm:$0xff] }
 0x49e   :  { %12462 = vmatprep.subr.mxu1 %v10633_v52  ;;  %12228 = vmatprep.subr.mxu0 %v10633_v52 }
 0x49f   :  { %12182 = vmatmul.mubr.msk.f32.gmra.mrb[20].mxu0 %vm2769_vm2, %v15241_v16  ;;  %12416 = vmatmul.mubr.msk.f32.gmra.mrb[20].mxu1 %vm2769_vm2, %v15243_v17 }
 0x4a0   :  { %12184 = vmatprep.mubr.msk.f32.mxu0 %vm2769_vm2, %v15249_v48  ;;  %12418 = vmatprep.mubr.msk.f32.mxu1 %vm2769_vm2, %v15251_v24 }
 0x4a3   :  { %12185 = vmatmul.mubr.msk.f32.gmra.mrb[22].mxu0 %vm2769_vm2, %v15257_v12  ;;  %12419 = vmatmul.mubr.msk.f32.gmra.mrb[22].mxu1 %vm2769_vm2, %v15259_v45 }
 0x4a4   :  { %12187 = vmatprep.mubr.msk.f32.mxu0 %vm2769_vm2, %v15265_v9  ;;  %12421 = vmatprep.mubr.msk.f32.mxu1 %vm2769_vm2, %v15267_v63 }
 0x4a7   :  { %12188 = vmatmul.mubr.msk.f32.gmra.mrb[24].mxu0 %vm2769_vm2, %v15273_v19  ;;  %12422 = vmatmul.mubr.msk.f32.gmra.mrb[24].mxu1 %vm2769_vm2, %v15275_v57 }
 0x4a8   :  { %12190 = vmatprep.mubr.msk.f32.mxu0 %vm2769_vm2, %v15281_v32  ;;  %12424 = vmatprep.mubr.msk.f32.mxu1 %vm2769_vm2, %v15283_v43 }
 0x4ab   :  { %12191 = vmatmul.mubr.msk.f32.gmra.mrb[26].mxu0 %vm2769_vm2, %v15289_v37  ;;  %12425 = vmatmul.mubr.msk.f32.gmra.mrb[26].mxu1 %vm2769_vm2, %v15291_v13 }
 0x4ac   :  { %12193 = vmatprep.mubr.msk.f32.mxu0 %vm2769_vm2, %v15297_v10  ;;  %12427 = vmatprep.mubr.msk.f32.mxu1 %vm2769_vm2, %v15299_v0 }
 0x4af   :  { %12194 = vmatmul.mubr.msk.f32.gmra.mrb[28].mxu0 %vm2769_vm2, %v15305_v5  ;;  %12428 = vmatmul.mubr.msk.f32.gmra.mrb[28].mxu1 %vm2769_vm2, %v15307_v11 }
 0x4b0   :  { %12196 = vmatprep.mubr.msk.f32.mxu0 %vm2769_vm2, %v15313_v30  ;;  %12430 = vmatprep.mubr.msk.f32.mxu1 %vm2769_vm2, %v15315_v61 }
 0x4b3   :  { %12197 = vmatmul.mubr.msk.f32.gmra.mrb[30].mxu0 %vm2769_vm2, %v15321_v27  ;;  %12431 = vmatmul.mubr.msk.f32.gmra.mrb[30].mxu1 %vm2769_vm2, %v15323_v40  ;;  %v10650_v40 = vld [vmem:[%s16491_s3 + $0x38] sm:$0xff] }
 0x4b4   :  { %12199 = vmatprep.mubr.msk.f32.mxu0 %vm2769_vm2, %v15590_v38  ;;  %12433 = vmatprep.mubr.msk.f32.mxu1 %vm2769_vm2, %v15592_v56  ;;  %v16666_v38 = vld [vmem:[#allocation10_spill] sm:$0xff]  ;;  %v16667_v56 = vld [vmem:[#allocation11_spill] sm:$0xff]  ;;  %v16677_v27 = vld [vmem:[#allocation21_spill] sm:$0xff] }
 0x4b7   :  { %12200 = vmatmul.mubr.msk.f32.gmra.mrb[32].mxu0 %vm2769_vm2, %v15598_v1  ;;  %12434 = vmatmul.mubr.msk.f32.gmra.mrb[32].mxu1 %vm2769_vm2, %v15600_v22  ;;  %v16668_v1 = vld [vmem:[#allocation12_spill] sm:$0xff]  ;;  %v16669_v22 = vld [vmem:[#allocation13_spill] sm:$0xff] }
 0x4b8   :  { %12204 = vmatprep.mubr.msk.f32.mxu0 %vm2769_vm2, %v15333_v29  ;;  %12438 = vmatprep.mubr.msk.f32.mxu1 %vm2769_vm2, %v16665_v39  ;;  %v16670_v29 = vld [vmem:[#allocation14_spill] sm:$0xff]  ;;  %v16673_v39 = vld [vmem:[#allocation17_spill] sm:$0xff] }
 0x4bb   :  { %12205 = vmatmul.mubr.msk.f32.vlgmr.msra.gmra.mrb[18].mxu0 %vm2769_vm2, %v16666_v38  ;;  %12439 = vmatmul.mubr.msk.f32.vlgmr.msra.gmra.mrb[18].mxu1 %vm2769_vm2, %v16667_v56  ;;  %v16671_v38 = vld [vmem:[#allocation15_spill] sm:$0xff]  ;;  %v16672_v56 = vld [vmem:[#allocation16_spill] sm:$0xff] }
 0x4bc   :  { %12207 = vmatprep.mubr.msk.f32.mxu0 %vm2769_vm2, %v16668_v1  ;;  %12441 = vmatprep.mubr.msk.f32.mxu1 %vm2769_vm2, %v16669_v22  ;;  %v16674_v1 = vld [vmem:[#allocation18_spill] sm:$0xff]  ;;  %v16675_v22 = vld [vmem:[#allocation19_spill] sm:$0xff] }
 0x4bd   :  { %12463 = vmatpush3.msra.mxu1 %v10633_v52  ;;  %12229 = vmatpush3.msra.mxu0 %v10633_v52  ;;  %v16676_v52 = vld [vmem:[#allocation20_spill] sm:$0xff] }
 0x4be   :  { %12488 = vmatprep.subr.mxu1 %v10650_v40  ;;  %12254 = vmatprep.subr.mxu0 %v10650_v40 }
 0x4bf   :  { %12208 = vmatmul.mubr.msk.f32.gmra.mrb[20].mxu0 %vm2769_vm2, %v16670_v29  ;;  %12442 = vmatmul.mubr.msk.f32.gmra.mrb[20].mxu1 %vm2769_vm2, %v16671_v38  ;;  %v16678_v29 = vld [vmem:[#allocation22_spill] sm:$0xff]  ;;  %v16679_v38 = vld [vmem:[#allocation4_spill] sm:$0xff] }
 0x4c0   :  { %12210 = vmatprep.mubr.msk.f32.mxu0 %vm2769_vm2, %v16672_v56  ;;  %12444 = vmatprep.mubr.msk.f32.mxu1 %vm2769_vm2, %v16673_v39  ;;  %v16680_v56 = vld [vmem:[#allocation5_spill] sm:$0xff]  ;;  %v16681_v39 = vld [vmem:[#allocation23_spill] sm:$0xff] }
 0x4c3   :  { %12211 = vmatmul.mubr.msk.f32.gmra.mrb[22].mxu0 %vm2769_vm2, %v16674_v1  ;;  %12445 = vmatmul.mubr.msk.f32.gmra.mrb[22].mxu1 %vm2769_vm2, %v16675_v22  ;;  %v16682_v1 = vld [vmem:[#allocation24_spill] sm:$0xff]  ;;  %v16683_v22 = vld [vmem:[#allocation25_spill] sm:$0xff] }
 0x4c4   :  { %12213 = vmatprep.mubr.msk.f32.mxu0 %vm2769_vm2, %v16676_v52  ;;  %12447 = vmatprep.mubr.msk.f32.mxu1 %vm2769_vm2, %v16677_v27  ;;  %v16684_v52 = vld [vmem:[#allocation26_spill] sm:$0xff]  ;;  %v16685_v27 = vld [vmem:[#allocation27_spill] sm:$0xff] }
 0x4c7   :  { %12214 = vmatmul.mubr.msk.f32.gmra.mrb[24].mxu0 %vm2769_vm2, %v16678_v29  ;;  %12448 = vmatmul.mubr.msk.f32.gmra.mrb[24].mxu1 %vm2769_vm2, %v16679_v38 }
 0x4c8   :  { %12216 = vmatprep.mubr.msk.f32.mxu0 %vm2769_vm2, %v16680_v56  ;;  %12450 = vmatprep.mubr.msk.f32.mxu1 %vm2769_vm2, %v16681_v39  ;;  %v16686_v39 = vld [vmem:[#allocation30_spill] sm:$0xff] }
 0x4cb   :  { %12217 = vmatmul.mubr.msk.f32.gmra.mrb[26].mxu0 %vm2769_vm2, %v16682_v1  ;;  %12451 = vmatmul.mubr.msk.f32.gmra.mrb[26].mxu1 %vm2769_vm2, %v16683_v22 }
 0x4cc   :  { %12219 = vmatprep.mubr.msk.f32.mxu0 %vm2769_vm2, %v16684_v52  ;;  %12453 = vmatprep.mubr.msk.f32.mxu1 %vm2769_vm2, %v16685_v27  ;;  %v15665_v52 = vld [vmem:[#allocation3 + $0x89] sm:$0xff]  ;;  %v15667_v27 = vld [vmem:[#allocation3 + $0x139] sm:$0xff] }
 0x4cd   :  { %16687 = vst [vmem:[#allocation9_spill] sm:$0xff] %v15667_v27 }
 0x4cf   :  { %12220 = vmatmul.mubr.msk.f32.gmra.mrb[28].mxu0 %vm2769_vm2, %v15430_v31  ;;  %12454 = vmatmul.mubr.msk.f32.gmra.mrb[28].mxu1 %vm2769_vm2, %v15432_v14  ;;  %v15675_v14 = vld [vmem:[#allocation3 + $0x141] sm:$0xff] }
 0x4d0   :  { %12222 = vmatprep.mubr.msk.f32.mxu0 %vm2769_vm2, %v15438_v21  ;;  %12456 = vmatprep.mubr.msk.f32.mxu1 %vm2769_vm2, %v16686_v39  ;;  %v15673_v21 = vld [vmem:[#allocation3 + $0x91] sm:$0xff] }
 0x4d3   :  { %12223 = vmatmul.mubr.msk.f32.gmra.mrb[30].mxu0 %vm2769_vm2, %v15446_v28  ;;  %12457 = vmatmul.mubr.msk.f32.gmra.mrb[30].mxu1 %vm2769_vm2, %v15448_v26 }
 0x4d4   :  { %12225 = vmatprep.mubr.msk.f32.mxu0 %vm2769_vm2, %v15665_v52  ;;  %12459 = vmatprep.mubr.msk.f32.mxu1 %vm2769_vm2, %v15667_v27  ;;  %v10667_v27 = vld [vmem:[%s16491_s3 + $0x40] sm:$0xff] }
 0x4d7   :  { %12226 = vmatmul.mubr.msk.f32.gmra.mrb[32].mxu0 %vm2769_vm2, %v15673_v21  ;;  %12460 = vmatmul.mubr.msk.f32.gmra.mrb[32].mxu1 %vm2769_vm2, %v15675_v14 }
 0x4d8   :  { %12230 = vmatprep.mubr.msk.f32.mxu0 %vm2769_vm2, %v15108_v23  ;;  %12464 = vmatprep.mubr.msk.f32.mxu1 %vm2769_vm2, %v15110_v35  ;;  %v6789_v23 = vld [vmem:[#allocation3 + $0x97] sm:$0xff]  ;;  %v8874_v35 = vld [vmem:[#allocation3 + $0x147] sm:$0xff] }
 0x4db   :  { %12231 = vmatmul.mubr.msk.f32.vlgmr.msra.gmra.mrb[18].mxu0 %vm2769_vm2, %v15116_v55  ;;  %12465 = vmatmul.mubr.msk.f32.vlgmr.msra.gmra.mrb[18].mxu1 %vm2769_vm2, %v15118_v60  ;;  %v6790_v55 = vld [vmem:[#allocation3 + $0x9f] sm:$0xff]  ;;  %v8875_v60 = vld [vmem:[#allocation3 + $0x14f] sm:$0xff] }
 0x4dc   :  { %12233 = vmatprep.mubr.msk.f32.mxu0 %vm2769_vm2, %v15124_v2  ;;  %12467 = vmatprep.mubr.msk.f32.mxu1 %vm2769_vm2, %v15126_v53  ;;  %v16688_v2 = vmov 0.0|0.0   ;;  %v16689_v53 = vld [vmem:[#allocation7_spill] sm:$0xff] }
 0x4dd   :  { %12489 = vmatpush3.msra.mxu1 %v10650_v40  ;;  %12255 = vmatpush3.msra.mxu0 %v10650_v40 }
 0x4de   :  { %12514 = vmatprep.subr.mxu1 %v10667_v27  ;;  %12280 = vmatprep.subr.mxu0 %v10667_v27 }
 0x4df   :  { %12234 = vmatmul.mubr.msk.f32.gmra.mrb[20].mxu0 %vm2769_vm2, %v15132_v25  ;;  %12468 = vmatmul.mubr.msk.f32.gmra.mrb[20].mxu1 %vm2769_vm2, %v15134_v46  ;;  %v16690_v25 = vld [vmem:[#allocation8_spill] sm:$0xff]  ;;  %v16691_v46 = vld [vmem:[#allocation31_spill] sm:$0xff] }
 0x4e0   :  { %12236 = vmatprep.mubr.msk.f32.mxu0 %vm2769_vm2, %v15140_v62  ;;  %12470 = vmatprep.mubr.msk.f32.mxu1 %vm2769_vm2, %v15142_v54  ;;  %v16692_v62 = vld [vmem:[#allocation32_spill] sm:$0xff]  ;;  %v7016_v54 = vld [vmem:[#allocation3 + $0x98] sm:$0xff] }
 0x4e3   :  { %12237 = vmatmul.mubr.msk.f32.gmra.mrb[22].mxu0 %vm2769_vm2, %v15148_v42  ;;  %12471 = vmatmul.mubr.msk.f32.gmra.mrb[22].mxu1 %vm2769_vm2, %v15150_v33  ;;  %v9100_v42 = vld [vmem:[#allocation3 + $0x148] sm:$0xff] }
 0x4e4   :  { %12239 = vmatprep.mubr.msk.f32.mxu0 %vm2769_vm2, %v15156_v6  ;;  %12473 = vmatprep.mubr.msk.f32.mxu1 %vm2769_vm2, %v15158_v50  ;;  %v16693_v33 = vld [vmem:[#allocation33_spill] sm:$0xff]  ;;  %v16694_v6 = vld [vmem:[#allocation34_spill] sm:$0xff]  ;;  %v7017_v50 = vld [vmem:[#allocation3 + $0xa0] sm:$0xff] }
 0x4e7   :  { %12240 = vmatmul.mubr.msk.f32.gmra.mrb[24].mxu0 %vm2769_vm2, %v15164_v34  ;;  %12474 = vmatmul.mubr.msk.f32.gmra.mrb[24].mxu1 %vm2769_vm2, %v15166_v18  ;;  %v9101_v34 = vld [vmem:[#allocation3 + $0x150] sm:$0xff]  ;;  %v16695_v18 = vld [vmem:[#allocation12_spill] sm:$0xff] }
 0x4e8   :  { %12242 = vmatprep.mubr.msk.f32.mxu0 %vm2769_vm2, %v15172_v7  ;;  %12476 = vmatprep.mubr.msk.f32.mxu1 %vm2769_vm2, %v15174_v44  ;;  %v16696_v7 = vld [vmem:[#allocation13_spill] sm:$0xff]  ;;  %v16697_v44 = vld [vmem:[#allocation14_spill] sm:$0xff] }
 0x4eb   :  { %12243 = vmatmul.mubr.msk.f32.gmra.mrb[26].mxu0 %vm2769_vm2, %v15180_v51  ;;  %12477 = vmatmul.mubr.msk.f32.gmra.mrb[26].mxu1 %vm2769_vm2, %v15182_v15  ;;  %v16698_v51 = vld [vmem:[#allocation15_spill] sm:$0xff]  ;;  %v16699_v15 = vld [vmem:[#allocation16_spill] sm:$0xff] }
 0x4ec   :  { %12245 = vmatprep.mubr.msk.f32.mxu0 %vm2769_vm2, %v15188_v59  ;;  %12479 = vmatprep.mubr.msk.f32.mxu1 %vm2769_vm2, %v15190_v20  ;;  %v16700_v59 = vld [vmem:[#allocation17_spill] sm:$0xff]  ;;  %v16701_v20 = vld [vmem:[#allocation18_spill] sm:$0xff] }
 0x4ef   :  { %12246 = vmatmul.mubr.msk.f32.gmra.mrb[28].mxu0 %vm2769_vm2, %v15196_v47  ;;  %12480 = vmatmul.mubr.msk.f32.gmra.mrb[28].mxu1 %vm2769_vm2, %v15198_v8  ;;  %v16702_v47 = vld [vmem:[#allocation19_spill] sm:$0xff]  ;;  %v16703_v8 = vld [vmem:[#allocation20_spill] sm:$0xff] }
 0x4f0   :  { %12248 = vmatprep.mubr.msk.f32.mxu0 %vm2769_vm2, %v15515_v58  ;;  %12482 = vmatprep.mubr.msk.f32.mxu1 %vm2769_vm2, %v15517_v41 }
 0x4f3   :  { %12249 = vmatmul.mubr.msk.f32.gmra.mrb[30].mxu0 %vm2769_vm2, %v15523_v49  ;;  %12483 = vmatmul.mubr.msk.f32.gmra.mrb[30].mxu1 %vm2769_vm2, %v15525_v36 }
 0x4f4   :  { %12251 = vmatprep.mubr.msk.f32.mxu0 %vm2769_vm2, %v6789_v23  ;;  %12485 = vmatprep.mubr.msk.f32.mxu1 %vm2769_vm2, %v8874_v35 }
 0x4f7   :  { %12252 = vmatmul.mubr.msk.f32.gmra.mrb[32].mxu0 %vm2769_vm2, %v6790_v55  ;;  %12486 = vmatmul.mubr.msk.f32.gmra.mrb[32].mxu1 %vm2769_vm2, %v8875_v60 }
 0x4f8   :  { %12256 = vmatprep.mubr.msk.f32.mxu0 %vm2769_vm2, %v15233_v3  ;;  %12490 = vmatprep.mubr.msk.f32.mxu1 %vm2769_vm2, %v15235_v4  ;;  %v16704_v3 = vld [vmem:[#allocation21_spill] sm:$0xff]  ;;  %v16705_v4 = vld [vmem:[#allocation23_spill] sm:$0xff] }
 0x4fb   :  { %12257 = vmatmul.mubr.msk.f32.vlgmr.msra.gmra.mrb[18].mxu0 %vm2769_vm2, %v15241_v16  ;;  %12491 = vmatmul.mubr.msk.f32.vlgmr.msra.gmra.mrb[18].mxu1 %vm2769_vm2, %v15243_v17  ;;  %v16706_v16 = vld [vmem:[#allocation26_spill] sm:$0xff]  ;;  %v16707_v17 = vld [vmem:[#allocation27_spill] sm:$0xff] }
 0x4fc   :  { %12259 = vmatprep.mubr.msk.f32.mxu0 %vm2769_vm2, %v15249_v48  ;;  %12493 = vmatprep.mubr.msk.f32.mxu1 %vm2769_vm2, %v15251_v24  ;;  %v16708_v48 = vld [vmem:[#allocation28_spill] sm:$0xff]  ;;  %v16709_v24 = vld [vmem:[#allocation29_spill] sm:$0xff] }
 0x4fd   :  { %12515 = vmatpush3.msra.mxu1 %v10667_v27  ;;  %12281 = vmatpush3.msra.mxu0 %v10667_v27 }
 0x4fe   :  { %12756 = vmatprep.subr.bf16.mxu0 %v16688_v2  ;;  %12798 = vmatprep.subr.bf16.mxu1 %v16688_v2 }
 0x4ff   :  { %12260 = vmatmul.mubr.msk.f32.gmra.mrb[20].mxu0 %vm2769_vm2, %v15257_v12  ;;  %12494 = vmatmul.mubr.msk.f32.gmra.mrb[20].mxu1 %vm2769_vm2, %v15259_v45  ;;  %v16710_v12 = vld [vmem:[#allocation9_spill] sm:$0xff]  ;;  %v7243_v45 = vld [vmem:[#allocation3 + $0x99] sm:$0xff] }
 0x500   :  { %12262 = vmatprep.mubr.msk.f32.mxu0 %vm2769_vm2, %v15265_v9  ;;  %12496 = vmatprep.mubr.msk.f32.mxu1 %vm2769_vm2, %v15267_v63  ;;  %v9326_v9 = vld [vmem:[#allocation3 + $0x149] sm:$0xff]  ;;  %v7244_v63 = vld [vmem:[#allocation3 + $0xa1] sm:$0xff] }
 0x503   :  { %12263 = vmatmul.mubr.msk.f32.gmra.mrb[22].mxu0 %vm2769_vm2, %v15273_v19  ;;  %12497 = vmatmul.mubr.msk.f32.gmra.mrb[22].mxu1 %vm2769_vm2, %v15275_v57  ;;  %v9327_v19 = vld [vmem:[#allocation3 + $0x151] sm:$0xff]  ;;  %v16711_v57 = vmov 0.0  }
 0x504   :  { %12265 = vmatprep.mubr.msk.f32.mxu0 %vm2769_vm2, %v15281_v32  ;;  %12499 = vmatprep.mubr.msk.f32.mxu1 %vm2769_vm2, %v15283_v43  ;;  %v16712_v32 = vld [vmem:[#allocation6_spill] sm:$0xff] }
 0x505   :  { %v16713_v43 = vsub.s32 0, %v16712_v32 }
 0x507   :  { %12266 = vmatmul.mubr.msk.f32.gmra.mrb[24].mxu0 %vm2769_vm2, %v15289_v37  ;;  %12500 = vmatmul.mubr.msk.f32.gmra.mrb[24].mxu1 %vm2769_vm2, %v15291_v13 }
 0x508   :  { %12268 = vmatprep.mubr.msk.f32.mxu0 %vm2769_vm2, %v15297_v10  ;;  %12502 = vmatprep.mubr.msk.f32.mxu1 %vm2769_vm2, %v15299_v0 }
 0x50b   :  { %12269 = vmatmul.mubr.msk.f32.gmra.mrb[26].mxu0 %vm2769_vm2, %v15305_v5  ;;  %12503 = vmatmul.mubr.msk.f32.gmra.mrb[26].mxu1 %vm2769_vm2, %v15307_v11 }
 0x50c   :  { %12271 = vmatprep.mubr.msk.f32.mxu0 %vm2769_vm2, %v15313_v30  ;;  %12505 = vmatprep.mubr.msk.f32.mxu1 %vm2769_vm2, %v15315_v61 }
 0x50f   :  { %12272 = vmatmul.mubr.msk.f32.gmra.mrb[28].mxu0 %vm2769_vm2, %v16689_v53  ;;  %12506 = vmatmul.mubr.msk.f32.gmra.mrb[28].mxu1 %vm2769_vm2, %v16690_v25 }
 0x510   :  { %12274 = vmatprep.mubr.msk.f32.mxu0 %vm2769_vm2, %v16691_v46  ;;  %12508 = vmatprep.mubr.msk.f32.mxu1 %vm2769_vm2, %v16692_v62 }
 0x513   :  { %12275 = vmatmul.mubr.msk.f32.gmra.mrb[30].mxu0 %vm2769_vm2, %v16693_v33  ;;  %12509 = vmatmul.mubr.msk.f32.gmra.mrb[30].mxu1 %vm2769_vm2, %v16694_v6 }
 0x514   :  { %12277 = vmatprep.mubr.msk.f32.mxu0 %vm2769_vm2, %v7016_v54  ;;  %12511 = vmatprep.mubr.msk.f32.mxu1 %vm2769_vm2, %v9100_v42 }
 0x517   :  { %12278 = vmatmul.mubr.msk.f32.gmra.mrb[32].mxu0 %vm2769_vm2, %v7017_v50  ;;  %12512 = vmatmul.mubr.msk.f32.gmra.mrb[32].mxu1 %vm2769_vm2, %v9101_v34 }
 0x518   :  { %12282 = vmatprep.mubr.msk.f32.mxu0 %vm2769_vm2, %v16695_v18  ;;  %12516 = vmatprep.mubr.msk.f32.mxu1 %vm2769_vm2, %v16696_v7 }
 0x51b   :  { %12283 = vmatmul.mubr.msk.f32.vlgmr.msra.gmra.mrb[18].mxu0 %vm2769_vm2, %v16697_v44  ;;  %12517 = vmatmul.mubr.msk.f32.vlgmr.msra.gmra.mrb[18].mxu1 %vm2769_vm2, %v16698_v51 }
 0x51c   :  { %12285 = vmatprep.mubr.msk.f32.mxu0 %vm2769_vm2, %v16699_v15  ;;  %12519 = vmatprep.mubr.msk.f32.mxu1 %vm2769_vm2, %v16700_v59 }
 0x51f   :  { %12286 = vmatmul.mubr.msk.f32.gmra.mrb[20].mxu0 %vm2769_vm2, %v16701_v20  ;;  %12520 = vmatmul.mubr.msk.f32.gmra.mrb[20].mxu1 %vm2769_vm2, %v16702_v47 }
 0x520   :  { %12288 = vmatprep.mubr.msk.f32.mxu0 %vm2769_vm2, %v16703_v8  ;;  %12522 = vmatprep.mubr.msk.f32.mxu1 %vm2769_vm2, %v16704_v3 }
 0x523   :  { %12289 = vmatmul.mubr.msk.f32.gmra.mrb[22].mxu0 %vm2769_vm2, %v16678_v29  ;;  %12523 = vmatmul.mubr.msk.f32.gmra.mrb[22].mxu1 %vm2769_vm2, %v16679_v38 }
 0x524   :  { %12291 = vmatprep.mubr.msk.f32.mxu0 %vm2769_vm2, %v16680_v56  ;;  %12525 = vmatprep.mubr.msk.f32.mxu1 %vm2769_vm2, %v16705_v4 }
 0x527   :  { %12292 = vmatmul.mubr.msk.f32.gmra.mrb[24].mxu0 %vm2769_vm2, %v16682_v1  ;;  %12526 = vmatmul.mubr.msk.f32.gmra.mrb[24].mxu1 %vm2769_vm2, %v16683_v22 }
 0x528   :  { %12294 = vmatprep.mubr.msk.f32.mxu0 %vm2769_vm2, %v16706_v16  ;;  %12528 = vmatprep.mubr.msk.f32.mxu1 %vm2769_vm2, %v16707_v17 }
 0x52b   :  { %12295 = vmatmul.mubr.msk.f32.gmra.mrb[26].mxu0 %vm2769_vm2, %v15430_v31  ;;  %12529 = vmatmul.mubr.msk.f32.gmra.mrb[26].mxu1 %vm2769_vm2, %v16708_v48 }
 0x52c   :  { %12297 = vmatprep.mubr.msk.f32.mxu0 %vm2769_vm2, %v16709_v24  ;;  %12531 = vmatprep.mubr.msk.f32.mxu1 %vm2769_vm2, %v16686_v39 }
 0x52f   :  { %12298 = vmatmul.mubr.msk.f32.gmra.mrb[28].mxu0 %vm2769_vm2, %v15446_v28  ;;  %12532 = vmatmul.mubr.msk.f32.gmra.mrb[28].mxu1 %vm2769_vm2, %v15448_v26 }
 0x530   :  { %12300 = vmatprep.mubr.msk.f32.mxu0 %vm2769_vm2, %v15665_v52  ;;  %12534 = vmatprep.mubr.msk.f32.mxu1 %vm2769_vm2, %v16710_v12 }
 0x533   :  { %12301 = vmatmul.mubr.msk.f32.gmra.mrb[30].mxu0 %vm2769_vm2, %v15673_v21  ;;  %12535 = vmatmul.mubr.msk.f32.gmra.mrb[30].mxu1 %vm2769_vm2, %v15675_v14  ;;  %v15873_v21 = vld [vmem:[%s16492_s4] sm:$0x7] }
 0x534   :  { %12303 = vmatprep.mubr.msk.f32.mxu0 %vm2769_vm2, %v7243_v45  ;;  %12537 = vmatprep.mubr.msk.f32.mxu1 %vm2769_vm2, %v9326_v9  ;;  %v15878_v37 = vrot.slane %v15873_v21, %v16713_v43 }
 0x537   :  { %12304 = vmatmul.mubr.msk.f32.gmra.mrb[32].mxu0 %vm2769_vm2, %v7244_v63  ;;  %12538 = vmatmul.mubr.msk.f32.gmra.mrb[32].mxu1 %vm2769_vm2, %v9327_v19 }
 0x538   :  { %12570 = vmatprep.mubr.msk.f32.mxu0 %vm13424_vm3, %v16711_v57  ;;  %12636 = vmatprep.mubr.msk.f32.mxu1 %vm13424_vm3, %v16711_v57 }
 0x5ee   :  { %v12284_v13 = vpop.f32.mrb[18].mxu0  ;;  %v12518_v10 = vpop.f32.mrb[18].mxu1 }
 0x5ef   :  { %v12856_v0 = vadd.f32 %v12284_v13, %v15878_v37  ;;  %v12872_v5 = vadd.f32 %v12518_v10, %v15878_v37  ;;  %v7361_v11 = vpop.f32.mrb[19].mxu0  ;;  %v9443_v30 = vpop.f32.mrb[19].mxu1 }
 0x5f0   :  { %v15883_v61 = vadd.f32 %v7361_v11, %v15878_v37  ;;  %v12873_v27 = vadd.f32 %v9443_v30, %v15878_v37 }
 0x5f1   :  { %7489 = vst.msk [vmem:[%s16493_s5 + $0x8] sm:$0xff] %vm2769_vm2, %v12856_v0  ;;  %10685 = vst.msk [vmem:[%s16493_s5 + $0x88] sm:$0xff] %vm2769_vm2, %v12872_v5 }
 0x5f2   :  { %7488 = vst.msk [vmem:[%s16493_s5] sm:$0xff] %vm2769_vm2, %v15883_v61  ;;  %v12757_v40 = vpack.c.bf16 %v16711_v57, %v12873_v27  ;;  %v9694_v28 = vmul.f32 %v12873_v27, %v12873_v27  ;;  %10684 = vst.msk [vmem:[%s16493_s5 + $0x80] sm:$0xff] %vm2769_vm2, %v12873_v27  ;;  %v12287_v26 = vpop.f32.mrb[20].mxu0  ;;  %v12521_v14 = vpop.f32.mrb[20].mxu1 }
 0x5f3   :  { %v12858_v31 = vadd.f32 %v12287_v26, %v15878_v37  ;;  %v12874_v58 = vadd.f32 %v12521_v14, %v15878_v37  ;;  %v7371_v41 = vpop.f32.mrb[21].mxu0  ;;  %v9453_v49 = vpop.f32.mrb[21].mxu1 }
 0x5f4   :  { %v12799_v36 = vpack.c.bf16 %v16711_v57, %v9694_v28  ;;  %v15908_v1 = vadd.f32 %v7371_v41, %v15878_v37  ;;  %v12875_v22 = vadd.f32 %v9453_v49, %v15878_v37  ;;  %12758 = vmatpush3.bf16.msra.mxu0 %v12757_v40 }
 0x5f5   :  { %7491 = vst.msk [vmem:[%s16493_s5 + $0x18] sm:$0xff] %vm2769_vm2, %v12858_v31  ;;  %10687 = vst.msk [vmem:[%s16493_s5 + $0x98] sm:$0xff] %vm2769_vm2, %v12874_v58  ;;  %12759 = vmatprep.subr.bf16.mxu0 %v16688_v2 }
 0x5f6   :  { %7490 = vst.msk [vmem:[%s16493_s5 + $0x10] sm:$0xff] %vm2769_vm2, %v15908_v1  ;;  %v12760_v29 = vpack.c.bf16 %v16711_v57, %v12875_v22  ;;  %v9696_v38 = vmul.f32 %v12875_v22, %v12875_v22  ;;  %10686 = vst.msk [vmem:[%s16493_s5 + $0x90] sm:$0xff] %vm2769_vm2, %v12875_v22  ;;  %v12290_v56 = vpop.f32.mrb[22].mxu0  ;;  %v12524_v39 = vpop.f32.mrb[22].mxu1  ;;  %12800 = vmatpush3.bf16.msra.mxu1 %v12799_v36 }
 0x5f7   :  { %v12860_v52 = vadd.f32 %v12290_v56, %v15878_v37  ;;  %v12876_v23 = vadd.f32 %v12524_v39, %v15878_v37  ;;  %v7381_v35 = vpop.f32.mrb[23].mxu0  ;;  %v9463_v55 = vpop.f32.mrb[23].mxu1  ;;  %12801 = vmatprep.subr.bf16.mxu1 %v16688_v2 }
 0x5f8   :  { %v12802_v60 = vpack.c.bf16 %v16711_v57, %v9696_v38  ;;  %v15935_v53 = vadd.f32 %v7381_v35, %v15878_v37  ;;  %v12877_v25 = vadd.f32 %v9463_v55, %v15878_v37  ;;  %12761 = vmatpush3.bf16.msra.mxu0 %v12760_v29 }
 0x5f9   :  { %7493 = vst.msk [vmem:[%s16493_s5 + $0x28] sm:$0xff] %vm2769_vm2, %v12860_v52  ;;  %10689 = vst.msk [vmem:[%s16493_s5 + $0xa8] sm:$0xff] %vm2769_vm2, %v12876_v23  ;;  %12762 = vmatprep.subr.bf16.mxu0 %v16688_v2 }
 0x5fa   :  { %7492 = vst.msk [vmem:[%s16493_s5 + $0x20] sm:$0xff] %vm2769_vm2, %v15935_v53  ;;  %v12763_v46 = vpack.c.bf16 %v16711_v57, %v12877_v25  ;;  %v9698_v62 = vmul.f32 %v12877_v25, %v12877_v25  ;;  %10688 = vst.msk [vmem:[%s16493_s5 + $0xa0] sm:$0xff] %vm2769_vm2, %v12877_v25  ;;  %v12293_v54 = vpop.f32.mrb[24].mxu0  ;;  %v12527_v42 = vpop.f32.mrb[24].mxu1  ;;  %12803 = vmatpush3.bf16.msra.mxu1 %v12802_v60  ;;  %v7472_v25 = vmul.f32 %v15883_v61, %v15883_v61 }
 0x5fb   :  { %v12862_v33 = vadd.f32 %v12293_v54, %v15878_v37  ;;  %v12878_v6 = vadd.f32 %v12527_v42, %v15878_v37  ;;  %v7391_v50 = vpop.f32.mrb[25].mxu0  ;;  %v9473_v34 = vpop.f32.mrb[25].mxu1  ;;  %12804 = vmatprep.subr.bf16.mxu1 %v16688_v2  ;;  %v7474_v42 = vmul.f32 %v15908_v1, %v15908_v1 }
 0x5fc   :  { %v12805_v18 = vpack.c.bf16 %v16711_v57, %v9698_v62  ;;  %v15962_v7 = vadd.f32 %v7391_v50, %v15878_v37  ;;  %v12879_v44 = vadd.f32 %v9473_v34, %v15878_v37  ;;  %12764 = vmatpush3.bf16.msra.mxu0 %v12763_v46  ;;  %v16714_v62 = vmov 1.0  }
 0x5fd   :  { %7495 = vst.msk [vmem:[%s16493_s5 + $0x38] sm:$0xff] %vm2769_vm2, %v12862_v33  ;;  %10691 = vst.msk [vmem:[%s16493_s5 + $0xb8] sm:$0xff] %vm2769_vm2, %v12878_v6  ;;  %12765 = vmatprep.subr.bf16.mxu0 %v16688_v2  ;;  %v12820_v54 = vpack.c.bf16 %v16711_v57, %v7472_v25  ;;  %v12823_v33 = vpack.c.bf16 %v16711_v57, %v7474_v42  ;;  %v7476_v6 = vmul.f32 %v15935_v53, %v15935_v53 }
 0x5fe   :  { %7494 = vst.msk [vmem:[%s16493_s5 + $0x30] sm:$0xff] %vm2769_vm2, %v15962_v7  ;;  %v12766_v51 = vpack.c.bf16 %v16711_v57, %v12879_v44  ;;  %v9700_v15 = vmul.f32 %v12879_v44, %v12879_v44  ;;  %10690 = vst.msk [vmem:[%s16493_s5 + $0xb0] sm:$0xff] %vm2769_vm2, %v12879_v44  ;;  %v12296_v59 = vpop.f32.mrb[26].mxu0  ;;  %v12530_v20 = vpop.f32.mrb[26].mxu1  ;;  %12806 = vmatpush3.bf16.msra.mxu1 %v12805_v18  ;;  %v7478_v34 = vmul.f32 %v15962_v7, %v15962_v7 }
 0x5ff   :  { %v12864_v47 = vadd.f32 %v12296_v59, %v15878_v37  ;;  %v12880_v8 = vadd.f32 %v12530_v20, %v15878_v37  ;;  %v7401_v3 = vpop.f32.mrb[27].mxu0  ;;  %v9483_v4 = vpop.f32.mrb[27].mxu1  ;;  %12807 = vmatprep.subr.bf16.mxu1 %v16688_v2  ;;  %v12826_v50 = vpack.c.bf16 %v16711_v57, %v7476_v6  ;;  %v12787_v18 = vpack.c.bf16 %v16711_v57, %v15962_v7 }
 0x600   :  { %v12808_v16 = vpack.c.bf16 %v16711_v57, %v9700_v15  ;;  %v15989_v17 = vadd.f32 %v7401_v3, %v15878_v37  ;;  %v12881_v48 = vadd.f32 %v9483_v4, %v15878_v37  ;;  %12767 = vmatpush3.bf16.msra.mxu0 %v12766_v51  ;;  %v12829_v44 = vpack.c.bf16 %v16711_v57, %v7478_v34 }
 0x601   :  { %7497 = vst.msk [vmem:[%s16493_s5 + $0x48] sm:$0xff] %vm2769_vm2, %v12864_v47  ;;  %10693 = vst.msk [vmem:[%s16493_s5 + $0xc8] sm:$0xff] %vm2769_vm2, %v12880_v8  ;;  %12768 = vmatprep.subr.bf16.mxu0 %v16688_v2 }
 0x602   :  { %7496 = vst.msk [vmem:[%s16493_s5 + $0x40] sm:$0xff] %vm2769_vm2, %v15989_v17  ;;  %v12769_v24 = vpack.c.bf16 %v16711_v57, %v12881_v48  ;;  %v9702_v12 = vmul.f32 %v12881_v48, %v12881_v48  ;;  %10692 = vst.msk [vmem:[%s16493_s5 + $0xc0] sm:$0xff] %vm2769_vm2, %v12881_v48  ;;  %v12299_v45 = vpop.f32.mrb[28].mxu0  ;;  %v12533_v9 = vpop.f32.mrb[28].mxu1  ;;  %12809 = vmatpush3.bf16.msra.mxu1 %v12808_v16  ;;  %v12790_v51 = vpack.c.bf16 %v16711_v57, %v15989_v17 }
 0x603   :  { %v12866_v63 = vadd.f32 %v12299_v45, %v15878_v37  ;;  %v12882_v19 = vadd.f32 %v12533_v9, %v15878_v37  ;;  %v7411_v43 = vpop.f32.mrb[29].mxu0  ;;  %v9493_v13 = vpop.f32.mrb[29].mxu1  ;;  %12810 = vmatprep.subr.bf16.mxu1 %v16688_v2 }
 0x604   :  { %v12811_v10 = vpack.c.bf16 %v16711_v57, %v9702_v12  ;;  %v16016_v0 = vadd.f32 %v7411_v43, %v15878_v37  ;;  %v12883_v5 = vadd.f32 %v9493_v13, %v15878_v37  ;;  %12770 = vmatpush3.bf16.msra.mxu0 %v12769_v24 }
 0x605   :  { %7499 = vst.msk [vmem:[%s16493_s5 + $0x58] sm:$0xff] %vm2769_vm2, %v12866_v63  ;;  %10695 = vst.msk [vmem:[%s16493_s5 + $0xd8] sm:$0xff] %vm2769_vm2, %v12882_v19  ;;  %12771 = vmatprep.subr.bf16.mxu0 %v16688_v2 }
 0x606   :  { %7498 = vst.msk [vmem:[%s16493_s5 + $0x50] sm:$0xff] %vm2769_vm2, %v16016_v0  ;;  %v12772_v11 = vpack.c.bf16 %v16711_v57, %v12883_v5  ;;  %v9704_v30 = vmul.f32 %v12883_v5, %v12883_v5  ;;  %10694 = vst.msk [vmem:[%s16493_s5 + $0xd0] sm:$0xff] %vm2769_vm2, %v12883_v5  ;;  %v12302_v27 = vpop.f32.mrb[30].mxu0  ;;  %v12536_v40 = vpop.f32.mrb[30].mxu1  ;;  %12812 = vmatpush3.bf16.msra.mxu1 %v12811_v10  ;;  %v7482_v7 = vmul.f32 %v16016_v0, %v16016_v0  ;;  %v9887_v10 = vld [vmem:[%s16493_s5 + $0x8] sm:$0xff] }
 0x607   :  { %v12868_v28 = vadd.f32 %v12302_v27, %v15878_v37  ;;  %v12884_v26 = vadd.f32 %v12536_v40, %v15878_v37  ;;  %v7421_v14 = vpop.f32.mrb[31].mxu0  ;;  %v9503_v31 = vpop.f32.mrb[31].mxu1  ;;  %12813 = vmatprep.subr.bf16.mxu1 %v16688_v2  ;;  %v12793_v59 = vpack.c.bf16 %v16711_v57, %v16016_v0  ;;  %v9886_v0 = vld [vmem:[%s16493_s5] sm:$0xff]  ;;  %v9889_v27 = vld [vmem:[%s16493_s5 + $0x18] sm:$0xff]  ;;  %v9888_v40 = vld [vmem:[%s16493_s5 + $0x10] sm:$0xff] }
 0x608   :  { %v12814_v58 = vpack.c.bf16 %v16711_v57, %v9704_v30  ;;  %v16043_v41 = vadd.f32 %v7421_v14, %v15878_v37  ;;  %v12885_v49 = vadd.f32 %v9503_v31, %v15878_v37  ;;  %12773 = vmatpush3.bf16.msra.mxu0 %v12772_v11  ;;  %v12835_v20 = vpack.c.bf16 %v16711_v57, %v7482_v7  ;;  %v9893_v14 = vld [vmem:[%s16493_s5 + $0x38] sm:$0xff]  ;;  %v9892_v31 = vld [vmem:[%s16493_s5 + $0x30] sm:$0xff] }
 0x609   :  { %7501 = vst.msk [vmem:[%s16493_s5 + $0x68] sm:$0xff] %vm2769_vm2, %v12868_v28  ;;  %10697 = vst.msk [vmem:[%s16493_s5 + $0xe8] sm:$0xff] %vm2769_vm2, %v12884_v26  ;;  %12774 = vmatprep.subr.bf16.mxu0 %v16688_v2  ;;  %v16715_v11 = vsub.s32 1, %v16712_v32  ;;  %v9891_v28 = vld [vmem:[%s16493_s5 + $0x28] sm:$0xff]  ;;  %v9890_v26 = vld [vmem:[%s16493_s5 + $0x20] sm:$0xff] }
 0x60a   :  { %7500 = vst.msk [vmem:[%s16493_s5 + $0x60] sm:$0xff] %vm2769_vm2, %v16043_v41  ;;  %v12775_v36 = vpack.c.bf16 %v16711_v57, %v12885_v49  ;;  %v9706_v22 = vmul.f32 %v12885_v49, %v12885_v49  ;;  %10696 = vst.msk [vmem:[%s16493_s5 + $0xe0] sm:$0xff] %vm2769_vm2, %v12885_v49  ;;  %v12305_v29 = vpop.f32.mrb[32].mxu0  ;;  %v12539_v38 = vpop.f32.mrb[32].mxu1  ;;  %12815 = vmatpush3.bf16.msra.mxu1 %v12814_v58  ;;  %v7484_v47 = vmul.f32 %v16043_v41, %v16043_v41 }
 0x60b   :  { %v12870_v56 = vadd.f32 %v12305_v29, %v15878_v37  ;;  %v12886_v39 = vadd.f32 %v12539_v38, %v15878_v37  ;;  %v7431_v52 = vpop.f32.mrb[33].mxu0  ;;  %v9513_v23 = vpop.f32.mrb[33].mxu1  ;;  %12816 = vmatprep.subr.bf16.mxu1 %v16688_v2  ;;  %v12796_v8 = vpack.c.bf16 %v16711_v57, %v16043_v41  ;;  %v9895_v29 = vld [vmem:[%s16493_s5 + $0x48] sm:$0xff]  ;;  %v9894_v38 = vld [vmem:[%s16493_s5 + $0x40] sm:$0xff] }
 0x60c   :  { %v12817_v35 = vpack.c.bf16 %v16711_v57, %v9706_v22  ;;  %v16070_v55 = vadd.f32 %v7431_v52, %v15878_v37  ;;  %v12887_v60 = vadd.f32 %v9513_v23, %v15878_v37  ;;  %12776 = vmatpush3.bf16.msra.mxu0 %v12775_v36  ;;  %v12778_v37 = vpack.c.bf16 %v16711_v57, %v15883_v61  ;;  %v10700_v22 = vld [vmem:[%s16493_s5 + $0x80] sm:$0xff] }
 0x60d   :  { %7503 = vst.msk [vmem:[%s16493_s5 + $0x78] sm:$0xff] %vm2769_vm2, %v12870_v56  ;;  %10699 = vst.msk [vmem:[%s16493_s5 + $0xf8] sm:$0xff] %vm2769_vm2, %v12886_v39  ;;  %12568 = vmatprep.subr.mxu0 %v16711_v57  ;;  %v12781_v61 = vpack.c.bf16 %v16711_v57, %v15908_v1  ;;  %v12784_v1 = vpack.c.bf16 %v16711_v57, %v15935_v53  ;;  %v7480_v53 = vmul.f32 %v15989_v17, %v15989_v17  ;;  %v9897_v56 = vld [vmem:[%s16493_s5 + $0x58] sm:$0xff] }
 0x60e   :  { %7502 = vst.msk [vmem:[%s16493_s5 + $0x70] sm:$0xff] %vm2769_vm2, %v16070_v55  ;;  %10698 = vst.msk [vmem:[%s16493_s5 + $0xf0] sm:$0xff] %vm2769_vm2, %v12887_v60  ;;  %12818 = vmatpush3.bf16.msra.mxu1 %v12817_v35  ;;  %v9708_v46 = vmul.f32 %v12887_v60, %v12887_v60  ;;  %v12838_v3 = vpack.c.bf16 %v16711_v57, %v7484_v47  ;;  %v7486_v4 = vmul.f32 %v16070_v55, %v16070_v55  ;;  %v10707_v47 = vld [vmem:[%s16493_s5 + $0xb8] sm:$0xff] }
 0x60f   :  { %12634 = vmatprep.subr.mxu1 %v16711_v57  ;;  %v12832_v15 = vpack.c.bf16 %v16711_v57, %v7480_v53  ;;  %v10705_v53 = vld [vmem:[%s16493_s5 + $0xa8] sm:$0xff] }
 0x610   :  { %12569 = vmatpush3.msra.mxu0 %v12887_v60  ;;  %v9896_v60 = vld [vmem:[%s16493_s5 + $0x50] sm:$0xff]  ;;  %v9899_v25 = vld [vmem:[%s16493_s5 + $0x68] sm:$0xff] }
 0x611   :  { %12777 = vmatprep.subr.bf16.mxu0 %v16688_v2  ;;  %12571 = vmatmul.mubr.f32.vlgmr.msra.gmra.mrb[34].mxu0 %v16714_v62 }
 0x612   :  { %12779 = vmatpush3.bf16.msra.mxu0 %v12778_v37  ;;  %12635 = vmatpush3.msra.mxu1 %v9708_v46  ;;  %v9898_v37 = vld [vmem:[%s16493_s5 + $0x60] sm:$0xff] }
 0x613   :  { %12819 = vmatprep.subr.bf16.mxu1 %v16688_v2  ;;  %12637 = vmatmul.mubr.f32.vlgmr.msra.gmra.mrb[34].mxu1 %v16714_v62 }
 0x614   :  { %12821 = vmatpush3.bf16.msra.mxu1 %v12820_v54  ;;  %12780 = vmatprep.subr.bf16.mxu0 %v16688_v2 }
 0x615   :  { %12822 = vmatprep.subr.bf16.mxu1 %v16688_v2  ;;  %12603 = vmatprep.mubr.msk.f32.mxu0 %vm13424_vm3, %v16711_v57  ;;  %v9900_v6 = vld [vmem:[%s16493_s5 + $0x70] sm:$0xff] }
 0x616   :  { %12782 = vmatpush3.bf16.msra.mxu0 %v12781_v61  ;;  %12669 = vmatprep.mubr.msk.f32.mxu1 %vm13424_vm3, %v16711_v57  ;;  %v10703_v61 = vld [vmem:[%s16493_s5 + $0x98] sm:$0xff] }
 0x617   :  { %12783 = vmatprep.subr.bf16.mxu0 %v16688_v2 }
 0x618   :  { %12824 = vmatpush3.bf16.msra.mxu1 %v12823_v33  ;;  %v9901_v33 = vld [vmem:[%s16493_s5 + $0x78] sm:$0xff] }
 0x619   :  { %12825 = vmatprep.subr.bf16.mxu1 %v16688_v2 }
 0x61a   :  { %12785 = vmatpush3.bf16.msra.mxu0 %v12784_v1 }
 0x61b   :  { %12786 = vmatprep.subr.bf16.mxu0 %v16688_v2 }
 0x61c   :  { %12827 = vmatpush3.bf16.msra.mxu1 %v12826_v50 }
 0x61d   :  { %12828 = vmatprep.subr.bf16.mxu1 %v16688_v2 }
 0x61e   :  { %12788 = vmatpush3.bf16.msra.mxu0 %v12787_v18 }
 0x61f   :  { %12789 = vmatprep.subr.bf16.mxu0 %v16688_v2 }
 0x620   :  { %12830 = vmatpush3.bf16.msra.mxu1 %v12829_v44  ;;  %v10702_v44 = vld [vmem:[%s16493_s5 + $0x90] sm:$0xff] }
 0x621   :  { %12831 = vmatprep.subr.bf16.mxu1 %v16688_v2 }
 0x622   :  { %12791 = vmatpush3.bf16.msra.mxu0 %v12790_v51  ;;  %v10704_v51 = vld [vmem:[%s16493_s5 + $0xa0] sm:$0xff] }
 0x623   :  { %12792 = vmatprep.subr.bf16.mxu0 %v16688_v2 }
 0x624   :  { %12833 = vmatpush3.bf16.msra.mxu1 %v12832_v15 }
 0x625   :  { %12834 = vmatprep.subr.bf16.mxu1 %v16688_v2 }
 0x626   :  { %12794 = vmatpush3.bf16.msra.mxu0 %v12793_v59 }
 0x627   :  { %12795 = vmatprep.subr.bf16.mxu0 %v16688_v2 }
 0x628   :  { %12836 = vmatpush3.bf16.msra.mxu1 %v12835_v20 }
 0x629   :  { %12837 = vmatprep.subr.bf16.mxu1 %v16688_v2 }
 0x62a   :  { %12797 = vmatpush3.bf16.msra.mxu0 %v12796_v8  ;;  %v10706_v8 = vld [vmem:[%s16493_s5 + $0xb0] sm:$0xff] }
 0x62b   :  { %12601 = vmatprep.subr.mxu0 %v16711_v57 }
 0x62c   :  { %12839 = vmatpush3.bf16.msra.mxu1 %v12838_v3  ;;  %v10709_v3 = vld [vmem:[%s16493_s5 + $0xc8] sm:$0xff] }
 0x62d   :  { %12667 = vmatprep.subr.mxu1 %v16711_v57 }
 0x62e   :  { %12602 = vmatpush3.msra.mxu0 %v16070_v55  ;;  %v10701_v55 = vld [vmem:[%s16493_s5 + $0x88] sm:$0xff] }
 0x62f   :  { %12604 = vmatmul.mubr.f32.vlgmr.msra.gmra.mrb[34].mxu0 %v16714_v62 }
 0x630   :  { %12668 = vmatpush3.msra.mxu1 %v7486_v4 }
 0x631   :  { %12670 = vmatmul.mubr.f32.vlgmr.msra.gmra.mrb[34].mxu1 %v16714_v62 }
 0x702   :  { %v9690_v16 = vpop.f32.mrb[34].mxu0 }
 0x703   :  { %v9867_v2 = vmul.f32 0.0078125, %v9690_v16  ;;  %v12605_v17 = vpop.f32.mrb[35].mxu0 }
 0x704   :  { %v9846_v48 = vpop.f32.mrb[34].mxu1  ;;  %v10708_v17 = vld [vmem:[%s16493_s5 + $0xc0] sm:$0xff] }
 0x705   :  { %v9869_v24 = vmul.f32 %v9867_v2, %v9867_v2  ;;  %v9868_v12 = vmul.f32 0.0078125, %v9846_v48  ;;  %v12671_v45 = vpop.f32.mrb[35].mxu1  ;;  %v10711_v48 = vld [vmem:[%s16493_s5 + $0xd8] sm:$0xff] }
 0x707   :  { %v9870_v9 = vsub.f32 %v9868_v12, %v9869_v24  ;;  %v10710_v24 = vld [vmem:[%s16493_s5 + $0xd0] sm:$0xff]  ;;  %v16716_v12 = vsub.s32 2, %v16712_v32 }
 0x709   :  { %v9871_v63 = vmax.f32 %v9870_v9, 0.0 }
 0x70b   :  { %v9872_v57 = vadd.f32 1e-05, %v9871_v63 }
 0x70d   :  { %13417 = vrsqrt.f32 %v9872_v57 }
 0x717   :  { %v13418_v19 = vpop.eup %13417 }
 0x718   :  { %v9875_v43 = vrot.slane %v13418_v19, 7 }
 0x71a   :  { %v9877_v13 = vmul.f32 %v9875_v43, %v15873_v21 }
 0x71c   :  { %v9879_v5 = vrot.slane %v9877_v13, 1  ;;  %v16163_v30 = vrot.slane %v9877_v13, %v16715_v11 }
 0x71e   :  { %v9881_v58 = vmul.f32 %v9879_v5, %v9867_v2  ;;  %v9906_v41 = vmul.f32 %v16163_v30, %v9886_v0  ;;  %v9907_v49 = vmul.f32 %v16163_v30, %v9887_v10  ;;  %v9908_v36 = vmul.f32 %v16163_v30, %v9888_v40 }
 0x71f   :  { %v9909_v39 = vmul.f32 %v16163_v30, %v9889_v27  ;;  %v9910_v52 = vmul.f32 %v16163_v30, %v9890_v26  ;;  %v9911_v23 = vmul.f32 %v16163_v30, %v9891_v28  ;;  %v9912_v35 = vmul.f32 %v16163_v30, %v9892_v31 }
 0x720   :  { %v9883_v46 = vrot.slane %v9881_v58, 6  ;;  %v9913_v62 = vmul.f32 %v16163_v30, %v9893_v14  ;;  %v9914_v54 = vmul.f32 %v16163_v30, %v9894_v38  ;;  %v9915_v42 = vmul.f32 %v16163_v30, %v9895_v29 }
 0x721   :  { %v9916_v1 = vmul.f32 %v16163_v30, %v9896_v60  ;;  %v9917_v50 = vmul.f32 %v16163_v30, %v9897_v56  ;;  %v9918_v34 = vmul.f32 %v16163_v30, %v9898_v37  ;;  %v9919_v18 = vmul.f32 %v16163_v30, %v9899_v25  ;;  %v10713_v25 = vld [vmem:[%s16493_s5 + $0xe8] sm:$0xff]  ;;  %v10712_v37 = vld [vmem:[%s16493_s5 + $0xe0] sm:$0xff] }
 0x722   :  { %v9885_v15 = vsub.f32 %v15873_v21, %v9883_v46  ;;  %v9920_v7 = vmul.f32 %v16163_v30, %v9900_v6  ;;  %v9921_v59 = vmul.f32 %v16163_v30, %v9901_v33  ;;  %v16243_v20 = vmul.f32 %v10700_v22, %v16163_v30  ;;  %v10714_v33 = vld [vmem:[%s16493_s5 + $0xf0] sm:$0xff] }
 0x723   :  { %v16255_v21 = vmul.f32 %v10701_v55, %v16163_v30  ;;  %v16258_v4 = vmul.f32 %v10702_v44, %v16163_v30  ;;  %v16261_v16 = vmul.f32 %v10703_v61, %v16163_v30  ;;  %v16264_v2 = vmul.f32 %v10704_v51, %v16163_v30  ;;  %v10715_v61 = vld [vmem:[%s16493_s5 + $0xf8] sm:$0xff] }
 0x724   :  { %v16277_v45 = vrot.slane %v9885_v15, %v16716_v12  ;;  %v16280_v9 = vmul.f32 %v10705_v53, %v16163_v30  ;;  %v16283_v63 = vmul.f32 %v10706_v8, %v16163_v30  ;;  %v16286_v57 = vmul.f32 %v10707_v47, %v16163_v30 }
 0x725   :  { %v16289_v19 = vmul.f32 %v10708_v17, %v16163_v30  ;;  %v16292_v43 = vmul.f32 %v10709_v3, %v16163_v30  ;;  %v16295_v13 = vmul.f32 %v10710_v24, %v16163_v30  ;;  %v16298_v32 = vmul.f32 %v10711_v48, %v16163_v30 }
 0x726   :  { %v9926_v10 = vadd.f32 %v16277_v45, %v9906_v41  ;;  %v9927_v0 = vadd.f32 %v16277_v45, %v9907_v49  ;;  %v9928_v5 = vadd.f32 %v16277_v45, %v9908_v36  ;;  %v9929_v11 = vadd.f32 %v16277_v45, %v9909_v39 }
 0x727   :  { %v9930_v27 = vadd.f32 %v16277_v45, %v9910_v52  ;;  %v9931_v40 = vadd.f32 %v16277_v45, %v9911_v23  ;;  %v9932_v28 = vadd.f32 %v16277_v45, %v9912_v35  ;;  %v9933_v26 = vadd.f32 %v16277_v45, %v9913_v62 }
 0x728   :  { %v9934_v14 = vadd.f32 %v16277_v45, %v9914_v54  ;;  %v9935_v31 = vadd.f32 %v16277_v45, %v9915_v42  ;;  %v9936_v58 = vadd.f32 %v16277_v45, %v9916_v1  ;;  %v9937_v41 = vadd.f32 %v16277_v45, %v9917_v50 }
 0x729   :  { %v9938_v49 = vadd.f32 %v16277_v45, %v9918_v34  ;;  %v9939_v36 = vadd.f32 %v16277_v45, %v9919_v18  ;;  %v9940_v22 = vadd.f32 %v16277_v45, %v9920_v7  ;;  %v9941_v29 = vadd.f32 %v16277_v45, %v9921_v59 }
 0x72a   :  { %v9942_v38 = vmax.f32 %v9926_v10, 0.0  ;;  %v9943_v56 = vmax.f32 %v9927_v0, 0.0  ;;  %v9944_v39 = vmax.f32 %v9928_v5, 0.0  ;;  %v9945_v52 = vmax.f32 %v9929_v11, 0.0 }
 0x72b   :  { %v9946_v23 = vmax.f32 %v9930_v27, 0.0  ;;  %v9947_v35 = vmax.f32 %v9931_v40, 0.0  ;;  %v9948_v55 = vmax.f32 %v9932_v28, 0.0  ;;  %v9949_v60 = vmax.f32 %v9933_v26, 0.0 }
 0x72c   :  { %v9950_v46 = vmax.f32 %v9934_v14, 0.0  ;;  %v9951_v62 = vmax.f32 %v9935_v31, 0.0  ;;  %v9952_v54 = vmax.f32 %v9936_v58, 0.0  ;;  %v9953_v42 = vmax.f32 %v9937_v41, 0.0  ;;  %9958 = vst.msk [vmem:[%s16493_s5] sm:$0xff] %vm2769_vm2, %v9942_v38  ;;  %9959 = vst.msk [vmem:[%s16493_s5 + $0x8] sm:$0xff] %vm2769_vm2, %v9943_v56 }
 0x72d   :  { %9960 = vst.msk [vmem:[%s16493_s5 + $0x10] sm:$0xff] %vm2769_vm2, %v9944_v39  ;;  %9961 = vst.msk [vmem:[%s16493_s5 + $0x18] sm:$0xff] %vm2769_vm2, %v9945_v52  ;;  %v9954_v6 = vmax.f32 %v9938_v49, 0.0  ;;  %v9955_v1 = vmax.f32 %v9939_v36, 0.0  ;;  %v9956_v50 = vmax.f32 %v9940_v22, 0.0  ;;  %v9957_v34 = vmax.f32 %v9941_v29, 0.0 }
 0x72e   :  { %9962 = vst.msk [vmem:[%s16493_s5 + $0x20] sm:$0xff] %vm2769_vm2, %v9946_v23  ;;  %9963 = vst.msk [vmem:[%s16493_s5 + $0x28] sm:$0xff] %vm2769_vm2, %v9947_v35  ;;  %v10002_v18 = vmul.f32 %v10712_v37, %v16163_v30  ;;  %v10003_v44 = vmul.f32 %v10713_v25, %v16163_v30  ;;  %v10004_v53 = vmul.f32 %v10714_v33, %v16163_v30 }
 0x72f   :  { %9964 = vst.msk [vmem:[%s16493_s5 + $0x30] sm:$0xff] %vm2769_vm2, %v9948_v55  ;;  %9965 = vst.msk [vmem:[%s16493_s5 + $0x38] sm:$0xff] %vm2769_vm2, %v9949_v60  ;;  %v10005_v51 = vmul.f32 %v10715_v61, %v16163_v30  ;;  %v10006_v30 = vadd.f32 %v16243_v20, %v16277_v45  ;;  %v10007_v15 = vadd.f32 %v16255_v21, %v16277_v45 }
 0x730   :  { %9966 = vst.msk [vmem:[%s16493_s5 + $0x40] sm:$0xff] %vm2769_vm2, %v9950_v46  ;;  %9967 = vst.msk [vmem:[%s16493_s5 + $0x48] sm:$0xff] %vm2769_vm2, %v9951_v62  ;;  %v10008_v7 = vadd.f32 %v16258_v4, %v16277_v45  ;;  %v10009_v59 = vadd.f32 %v16261_v16, %v16277_v45  ;;  %v10010_v47 = vadd.f32 %v16264_v2, %v16277_v45 }
 0x731   :  { %9968 = vst.msk [vmem:[%s16493_s5 + $0x50] sm:$0xff] %vm2769_vm2, %v9952_v54  ;;  %9969 = vst.msk [vmem:[%s16493_s5 + $0x58] sm:$0xff] %vm2769_vm2, %v9953_v42  ;;  %v10011_v8 = vadd.f32 %v16280_v9, %v16277_v45  ;;  %v10012_v3 = vadd.f32 %v16283_v63, %v16277_v45  ;;  %v10013_v20 = vadd.f32 %v16286_v57, %v16277_v45  ;;  %v10022_v9 = vmax.f32 %v10006_v30, 0.0 }
 0x732   :  { %9970 = vst.msk [vmem:[%s16493_s5 + $0x60] sm:$0xff] %vm2769_vm2, %v9954_v6  ;;  %9971 = vst.msk [vmem:[%s16493_s5 + $0x68] sm:$0xff] %vm2769_vm2, %v9955_v1  ;;  %v10014_v21 = vadd.f32 %v16289_v19, %v16277_v45  ;;  %v10015_v4 = vadd.f32 %v16292_v43, %v16277_v45  ;;  %v10016_v16 = vadd.f32 %v16295_v13, %v16277_v45  ;;  %v10023_v63 = vmax.f32 %v10007_v15, 0.0 }
 0x733   :  { %9972 = vst.msk [vmem:[%s16493_s5 + $0x70] sm:$0xff] %vm2769_vm2, %v9956_v50  ;;  %9973 = vst.msk [vmem:[%s16493_s5 + $0x78] sm:$0xff] %vm2769_vm2, %v9957_v34  ;;  %v10017_v2 = vadd.f32 %v16298_v32, %v16277_v45  ;;  %v10018_v17 = vadd.f32 %v10002_v18, %v16277_v45  ;;  %v10019_v48 = vadd.f32 %v10003_v44, %v16277_v45  ;;  %v10024_v57 = vmax.f32 %v10008_v7, 0.0 }
 0x734   :  { %v10020_v24 = vadd.f32 %v10004_v53, %v16277_v45  ;;  %v10021_v12 = vadd.f32 %v10005_v51, %v16277_v45  ;;  %v10025_v19 = vmax.f32 %v10009_v59, 0.0  ;;  %v10026_v10 = vmax.f32 %v10010_v47, 0.0  ;;  %10716 = vst.msk [vmem:[%s16493_s5 + $0x80] sm:$0xff] %vm2769_vm2, %v10022_v9  ;;  %10717 = vst.msk [vmem:[%s16493_s5 + $0x88] sm:$0xff] %vm2769_vm2, %v10023_v63 }
 0x735   :  { %v10027_v43 = vmax.f32 %v10011_v8, 0.0  ;;  %v10028_v0 = vmax.f32 %v10012_v3, 0.0  ;;  %v10029_v5 = vmax.f32 %v10013_v20, 0.0  ;;  %v10030_v13 = vmax.f32 %v10014_v21, 0.0  ;;  %10718 = vst.msk [vmem:[%s16493_s5 + $0x90] sm:$0xff] %vm2769_vm2, %v10024_v57 }
 0x736   :  { %v10031_v11 = vmax.f32 %v10015_v4, 0.0  ;;  %v10032_v27 = vmax.f32 %v10016_v16, 0.0  ;;  %v10033_v32 = vmax.f32 %v10017_v2, 0.0  ;;  %10719 = vst.msk [vmem:[%s16493_s5 + $0x98] sm:$0xff] %vm2769_vm2, %v10025_v19  ;;  %v10034_v45 = vmax.f32 %v10018_v17, 0.0  ;;  %10720 = vst.msk [vmem:[%s16493_s5 + $0xa0] sm:$0xff] %vm2769_vm2, %v10026_v10 }
 0x737   :  { %v10035_v40 = vmax.f32 %v10019_v48, 0.0  ;;  %v10036_v28 = vmax.f32 %v10020_v24, 0.0  ;;  %v10037_v26 = vmax.f32 %v10021_v12, 0.0  ;;  %10721 = vst.msk [vmem:[%s16493_s5 + $0xa8] sm:$0xff] %vm2769_vm2, %v10027_v43  ;;  %10722 = vst.msk [vmem:[%s16493_s5 + $0xb0] sm:$0xff] %vm2769_vm2, %v10028_v0 }
 0x738   :  { %10723 = vst.msk [vmem:[%s16493_s5 + $0xb8] sm:$0xff] %vm2769_vm2, %v10029_v5  ;;  %10724 = vst.msk [vmem:[%s16493_s5 + $0xc0] sm:$0xff] %vm2769_vm2, %v10030_v13 }
 0x739   :  { %10725 = vst.msk [vmem:[%s16493_s5 + $0xc8] sm:$0xff] %vm2769_vm2, %v10031_v11  ;;  %10726 = vst.msk [vmem:[%s16493_s5 + $0xd0] sm:$0xff] %vm2769_vm2, %v10032_v27 }
 0x73a   :  { %10727 = vst.msk [vmem:[%s16493_s5 + $0xd8] sm:$0xff] %vm2769_vm2, %v10033_v32  ;;  %10728 = vst.msk [vmem:[%s16493_s5 + $0xe0] sm:$0xff] %vm2769_vm2, %v10034_v45 }
 0x73b   :  { %10729 = vst.msk [vmem:[%s16493_s5 + $0xe8] sm:$0xff] %vm2769_vm2, %v10035_v40  ;;  %10730 = vst.msk [vmem:[%s16493_s5 + $0xf0] sm:$0xff] %vm2769_vm2, %v10036_v28 }
 0x73c   :  { %10731 = vst.msk [vmem:[%s16493_s5 + $0xf8] sm:$0xff] %vm2769_vm2, %v10037_v26 }

</bundles_post_ra>
